<compile_context>
chip_gen: v7x
topology: tpu7x:2x2x1
jax: 0.10.0
libtpu: 0.0.40
codegen_flags: <defaults>
</compile_context>

<pallas_src>
import functools

import jax
import jax.numpy as jnp
import numpy as np
from jax.experimental import pallas as pl
from jax.experimental.pallas import tpu as pltpu


# ----------------------------- canvas format -------------------------------
def _canvas_geometry(H, W):
    """Flat, zero-bordered, lane-aligned activation canvas geometry.

    x[h, w] lives at flat index LEAD + (h+1)*Wp + (w+1); everything outside
    the valid interior is zero.  LEAD is chosen so the interior origin
    (ALIGNED) sits on a 128-lane boundary.
    """
    Wp = W + 2
    lead = (-(Wp + 1)) % 128
    aligned = lead + Wp + 1                       # multiple of 128
    plen = lead + (H + 2) * Wp + 2                # +2 keeps the (2,2) tap slice in-bounds
    plen = ((plen + 127) // 128) * 128
    return Wp, lead, aligned, plen


def to_canvas(x_nchw, *, dtype=jnp.bfloat16):
    """Pack NCHW activations into the canvas format (done once at the stem)."""
    N, C, H, W = x_nchw.shape
    Wp, lead, _, plen = _canvas_geometry(H, W)
    xp = jnp.pad(x_nchw, ((0, 0), (0, 0), (1, 1), (1, 1)))
    xp = xp.reshape(N, C, (H + 2) * Wp).astype(dtype)
    canvas = jnp.zeros((N, C, plen), dtype)
    return canvas.at[:, :, lead:lead + (H + 2) * Wp].set(xp)


def from_canvas(canvas, H, W):
    """Unpack the canvas back to NCHW (only needed at the network head)."""
    Wp, lead, _, _ = _canvas_geometry(H, W)
    N, C, _ = canvas.shape
    body = canvas[:, :, lead:lead + (H + 2) * Wp].reshape(N, C, H + 2, Wp)
    return body[:, :, 1:H + 1, 1:W + 1]


# ------------------------------- kernel ------------------------------------
def basic_block_kernel(x_ref, w1_ref, b1_ref, w2_ref, b2_ref, mask_ref,
                       out_ref, ypad_sc, *, H, W, LEAD, TN):
    # Block shapes:
    #   x_ref    : (B_BLK, C, PLEN)   bf16 zero-bordered input canvas
    #   w*_ref   : (9, Cout, Cin)     bf16, BN scale folded, tap t = kh*3+kw
    #   b*_ref   : (Cout, 1)          f32 folded BN bias
    #   mask_ref : (1, H*Wp)          f32 {0,1}: 1 on valid width columns
    #   out_ref  : (B_BLK, Cout, PLEN) bf16 output canvas (same format as input)
    # Scratch:
    #   ypad_sc  : (Cout, PLEN)       bf16 conv1 output canvas (reused per image)
    Wp = W + 2
    HWp = H * Wp
    ALIGNED = LEAD + Wp + 1                       # 128-aligned interior origin
    B, _, PLEN = x_ref.shape
    Cout = out_ref.shape[1]
    TAIL = PLEN - (ALIGNED + HWp)

    def conv_chunk(src, w_ref, q0, tn):
        # 3x3 conv on a lane chunk = 9 accumulating bf16 matmuls on statically
        # shifted slices (no materialized im2col buffer).
        acc = None
        for kh in range(3):
            for kw in range(3):
                off = ALIGNED + q0 + (kh - 1) * Wp + (kw - 1)
                taps = src(off, tn)                                  # (Cin, tn) bf16
                p = jnp.dot(w_ref[kh * 3 + kw], taps,
                            preferred_element_type=jnp.float32)
                acc = p if acc is None else acc + p
        return acc                                                   # (Cout, tn) f32

    for b in range(B):
        # Re-zero the canvas borders every step: no cross-step scratch state,
        # so the batch grid axis is safe to run "parallel" (v7x megacore).
        ypad_sc[:, 0:ALIGNED] = jnp.zeros((Cout, ALIGNED), jnp.bfloat16)
        ypad_sc[:, ALIGNED + HWp:PLEN] = jnp.zeros((Cout, TAIL), jnp.bfloat16)
        out_ref[b, :, 0:ALIGNED] = jnp.zeros((Cout, ALIGNED), out_ref.dtype)
        out_ref[b, :, ALIGNED + HWp:PLEN] = jnp.zeros((Cout, TAIL), out_ref.dtype)

        # ---- conv1 (+folded bn1) + relu -> bf16 canvas scratch --------------
        # Lane-chunked so accumulator/epilogue temporaries stay in registers.
        for q0 in range(0, HWp, TN):
            tn = min(TN, HWp - q0)
            acc = conv_chunk(lambda off, n: x_ref[b, :, off:off + n],
                             w1_ref, q0, tn)
            y = jnp.maximum(acc + b1_ref[...], 0.0) * mask_ref[:, q0:q0 + tn]
            ypad_sc[:, ALIGNED + q0:ALIGNED + q0 + tn] = y.astype(jnp.bfloat16)

        # ---- conv2 (+folded bn2) + residual + relu -> output canvas ---------
        for q0 in range(0, HWp, TN):
            tn = min(TN, HWp - q0)
            acc = conv_chunk(lambda off, n: ypad_sc[:, off:off + n],
                             w2_ref, q0, tn)
            ident = x_ref[b, :, ALIGNED + q0:ALIGNED + q0 + tn].astype(jnp.float32)
            z = jnp.maximum(acc + b2_ref[...] + ident, 0.0)
            z = z * mask_ref[:, q0:q0 + tn]            # pad cols stay zero for the next block
            out_ref[b, :, ALIGNED + q0:ALIGNED + q0 + tn] = z.astype(out_ref.dtype)


# ------------------------------- wrapper ------------------------------------
def basic_block(x_canvas, w1_hwio, s1, b1, w2_hwio, s2, b2, *, H, W, b_blk=None):
    """ResNet BasicBlock (stride=1, identity shortcut) on canvas activations.

    x_canvas : (N, C, PLEN) bf16 canvas (see to_canvas)
    w*_hwio  : (3, 3, Cin, Cout) f32 conv weights (HWIO)
    s*, b*   : (Cout,) BatchNorm running stats folded to scale/bias.
    Returns the output activations in the same canvas format (chains directly
    into the next block with no HBM re-layout).
    """
    N, C, PLEN = x_canvas.shape
    Cout = w1_hwio.shape[-1]
    assert C == Cout, "identity shortcut requires inplanes == planes"
    Wp, LEAD, _, plen = _canvas_geometry(H, W)
    assert plen == PLEN, "input canvas geometry mismatch"
    HWp = H * Wp

    if b_blk is None:                     # amortize per-grid-step overhead
        b_blk = 2 if N % 2 == 0 else 1
    assert N % b_blk == 0

    # Lane-axis chunk for matmul + epilogue (multiple of 128 when chunked).
    TN = HWp if HWp <= 512 else 512

    # Fold BN scale into the conv weights; (9, Cout, Cin) per-tap layout, bf16.
    def fold(w_hwio, s):
        w = jnp.transpose(w_hwio, (0, 1, 3, 2)).reshape(9, Cout, C)
        return (w * s[None, :, None]).astype(jnp.bfloat16)

    w1m = fold(w1_hwio, s1)
    w2m = fold(w2_hwio, s2)
    b1c = b1.reshape(Cout, 1).astype(jnp.float32)
    b2c = b2.reshape(Cout, 1).astype(jnp.float32)

    # Valid-width-column mask for the flat (h*Wp + w) output axis.
    col = jnp.arange(HWp, dtype=jnp.int32) % Wp
    col_mask = (col < W).astype(jnp.float32).reshape(1, HWp)

    kernel = functools.partial(basic_block_kernel, H=H, W=W, LEAD=LEAD, TN=TN)
    return pl.pallas_call(
        kernel,
        out_shape=jax.ShapeDtypeStruct((N, Cout, PLEN), jnp.bfloat16),
        grid_spec=pltpu.PrefetchScalarGridSpec(
            num_scalar_prefetch=0,
            grid=(N // b_blk,),
            in_specs=[
                pl.BlockSpec((b_blk, C, PLEN), lambda n: (n, 0, 0)),
                pl.BlockSpec((9, Cout, C), lambda n: (0, 0, 0)),
                pl.BlockSpec((Cout, 1), lambda n: (0, 0)),
                pl.BlockSpec((9, Cout, C), lambda n: (0, 0, 0)),
                pl.BlockSpec((Cout, 1), lambda n: (0, 0)),
                pl.BlockSpec((1, HWp), lambda n: (0, 0)),
            ],
            out_specs=pl.BlockSpec((b_blk, Cout, PLEN), lambda n: (n, 0, 0)),
            scratch_shapes=[
                pltpu.VMEM((Cout, PLEN), jnp.bfloat16),   # conv1 output canvas
            ],
        ),
        compiler_params=pltpu.CompilerParams(
            # No cross-step scratch state (canvas borders re-zeroed each step),
            # so the batch axis can run in parallel across TensorCores.
            dimension_semantics=("parallel",)),
    )(x_canvas, w1m, b1c, w2m, b2c, col_mask)


def basic_block_nchw(x_nchw, w1, s1, b1, w2, s2, b2):
    """Convenience: NCHW in / NCHW out (canvas pack/unpack at the boundary)."""
    N, C, H, W = x_nchw.shape
    y = basic_block(to_canvas(x_nchw), w1, s1, b1, w2, s2, b2, H=H, W=W)
    return from_canvas(y, H, W).astype(jnp.float32)


# ---------------- references (pure JAX) for verification ----------------
def _conv3x3_nhwc(x, w, acc_dtype=None):
    return jax.lax.conv_general_dilated(
        x, w, window_strides=(1, 1), padding=((1, 1), (1, 1)),
        dimension_numbers=("NHWC", "HWIO", "NHWC"),
        preferred_element_type=acc_dtype)


def basic_block_ref_f32(x_nchw, w1, s1, b1, w2, s2, b2):
    """Exact f32 semantics of the PyTorch BasicBlock (inference BN)."""
    x = jnp.transpose(x_nchw, (0, 2, 3, 1))
    y = jnp.maximum(_conv3x3_nhwc(x, w1) * s1 + b1, 0.0)
    y = _conv3x3_nhwc(y, w2) * s2 + b2
    return jnp.transpose(jnp.maximum(y + x, 0.0), (0, 3, 1, 2))


def basic_block_ref_matched(x_nchw, w1, s1, b1, w2, s2, b2):
    """Precision-matched reference: bf16 canvas activations in/out, BN scale
    folded into bf16 weights, f32 accumulation, f32 epilogue (mirrors kernel)."""
    xb = jnp.transpose(x_nchw, (0, 2, 3, 1)).astype(jnp.bfloat16)
    w1f = (w1 * s1).astype(jnp.bfloat16)
    w2f = (w2 * s2).astype(jnp.bfloat16)
    y = _conv3x3_nhwc(xb, w1f, jnp.float32) + b1
    y = jnp.maximum(y, 0.0)
    z = _conv3x3_nhwc(y.astype(jnp.bfloat16), w2f, jnp.float32) + b2
    out = jnp.maximum(z + xb.astype(jnp.float32), 0.0).astype(jnp.bfloat16)
    return jnp.transpose(out, (0, 3, 1, 2)).astype(jnp.float32)


if __name__ == "__main__":
    key = jax.random.PRNGKey(0)
    N, C, H, W = 2, 4, 16, 16        # inplanes == planes, stride=1, no downsample
    eps = 1e-5

    ks = jax.random.split(key, 11)
    x = jax.random.normal(ks[0], (N, C, H, W), jnp.float32)

    # conv weights in HWIO (= PyTorch (O,I,kh,kw) transposed)
    w1 = jax.random.normal(ks[1], (3, 3, C, C), jnp.float32) * 0.1
    w2 = jax.random.normal(ks[2], (3, 3, C, C), jnp.float32) * 0.1

    # BatchNorm params (inference mode: running stats folded into scale/bias)
    g1 = jax.random.uniform(ks[3], (C,), jnp.float32, 0.5, 1.5)
    be1 = jax.random.normal(ks[4], (C,), jnp.float32) * 0.1
    m1 = jax.random.normal(ks[5], (C,), jnp.float32) * 0.1
    v1 = jax.random.uniform(ks[6], (C,), jnp.float32, 0.5, 1.5)
    g2 = jax.random.uniform(ks[7], (C,), jnp.float32, 0.5, 1.5)
    be2 = jax.random.normal(ks[8], (C,), jnp.float32) * 0.1
    m2 = jax.random.normal(ks[9], (C,), jnp.float32) * 0.1
    v2 = jax.random.uniform(ks[10], (C,), jnp.float32, 0.5, 1.5)

    s1 = g1 / jnp.sqrt(v1 + eps)
    b1 = be1 - m1 * s1
    s2 = g2 / jnp.sqrt(v2 + eps)
    b2 = be2 - m2 * s2

    out = jax.block_until_ready(basic_block_nchw(x, w1, s1, b1, w2, s2, b2))

    # Tight check vs a reference with identical precision behaviour.
    ref_m = basic_block_ref_matched(x, w1, s1, b1, w2, s2, b2)
    np.testing.assert_allclose(np.asarray(out), np.asarray(ref_m),
                               rtol=1e-2, atol=1e-2)
    # Loose sanity check vs exact f32 PyTorch semantics (bf16 rounding).
    ref_f = basic_block_ref_f32(x, w1, s1, b1, w2, s2, b2)
    np.testing.assert_allclose(np.asarray(out), np.asarray(ref_f),
                               rtol=5e-2, atol=5e-2)
    print("KERNEL_OK")
</pallas_src>

<mosaic_0001>
module attributes {stable_mosaic.version = 11 : i64} {
  func.func @basic_block_kernel(%arg0: i32, %arg1: memref<2x4x512xbf16, #tpu.memory_space<vmem>>, %arg2: memref<9x4x4xbf16, #tpu.memory_space<vmem>>, %arg3: memref<4x1xf32, #tpu.memory_space<vmem>>, %arg4: memref<9x4x4xbf16, #tpu.memory_space<vmem>>, %arg5: memref<4x1xf32, #tpu.memory_space<vmem>>, %arg6: memref<1x288xf32, #tpu.memory_space<vmem>>, %arg7: memref<2x4x512xbf16, #tpu.memory_space<vmem>>, %arg8: memref<4x512xbf16, #tpu.memory_space<vmem>>) attributes {dimension_semantics = [#tpu.dimension_semantics<parallel>], iteration_bounds = array<i64: 1>, scalar_prefetch = 0 : i64, scratch_operands = 1 : i64, tpu.core_type = #tpu.core_type<tc>, window_params = [{transform_indices = @transform_0, window_bounds = array<i64: 2, 4, 512>}, {pipeline_mode = #tpu.pipeline_mode<synchronous>, transform_indices = @transform_1, window_bounds = array<i64: 9, 4, 4>}, {pipeline_mode = #tpu.pipeline_mode<synchronous>, transform_indices = @transform_2, window_bounds = array<i64: 4, 1>}, {pipeline_mode = #tpu.pipeline_mode<synchronous>, transform_indices = @transform_3, window_bounds = array<i64: 9, 4, 4>}, {pipeline_mode = #tpu.pipeline_mode<synchronous>, transform_indices = @transform_4, window_bounds = array<i64: 4, 1>}, {pipeline_mode = #tpu.pipeline_mode<synchronous>, transform_indices = @transform_5, window_bounds = array<i64: 1, 288>}, {transform_indices = @transform_6, window_bounds = array<i64: 2, 4, 512>}]} {
    %cst = arith.constant 0.000000e+00 : bf16
    %0 = vector.broadcast %cst : bf16 to vector<4x128xbf16>
    %c0 = arith.constant 0 : index
    %c0_0 = arith.constant 0 : index
    %1 = vector.load %arg8[%c0, %c0_0] : memref<4x512xbf16, #tpu.memory_space<vmem>>, vector<4x128xbf16>
    tpu.vector_store %arg8[%c0, %c0_0], %0 {strides = array<i32>} : memref<4x512xbf16, #tpu.memory_space<vmem>>, vector<4x128xbf16>,
    %cst_1 = arith.constant 0.000000e+00 : bf16
    %2 = vector.broadcast %cst_1 : bf16 to vector<4x96xbf16>
    %c0_2 = arith.constant 0 : index
    %c416 = arith.constant 416 : index
    %3 = vector.load %arg8[%c0_2, %c416] : memref<4x512xbf16, #tpu.memory_space<vmem>>, vector<4x96xbf16>
    tpu.vector_store %arg8[%c0_2, %c416], %2 {strides = array<i32>} : memref<4x512xbf16, #tpu.memory_space<vmem>>, vector<4x96xbf16>,
    %cst_3 = arith.constant 0.000000e+00 : bf16
    %4 = vector.broadcast %cst_3 : bf16 to vector<4x128xbf16>
    %c0_4 = arith.constant 0 : index
    %c0_5 = arith.constant 0 : index
    %c0_6 = arith.constant 0 : index
    %5 = vector.load %arg7[%c0_4, %c0_5, %c0_6] : memref<2x4x512xbf16, #tpu.memory_space<vmem>>, vector<1x4x128xbf16>
    %6 = vector.shape_cast %5 : vector<1x4x128xbf16> to vector<4x128xbf16>
    %7 = vector.shape_cast %4 : vector<4x128xbf16> to vector<1x4x128xbf16>
    tpu.vector_store %arg7[%c0_4, %c0_5, %c0_6], %7 {strides = array<i32>} : memref<2x4x512xbf16, #tpu.memory_space<vmem>>, vector<1x4x128xbf16>,
    %cst_7 = arith.constant 0.000000e+00 : bf16
    %8 = vector.broadcast %cst_7 : bf16 to vector<4x96xbf16>
    %c0_8 = arith.constant 0 : index
    %c0_9 = arith.constant 0 : index
    %c416_10 = arith.constant 416 : index
    %9 = vector.load %arg7[%c0_8, %c0_9, %c416_10] : memref<2x4x512xbf16, #tpu.memory_space<vmem>>, vector<1x4x96xbf16>
    %10 = vector.shape_cast %9 : vector<1x4x96xbf16> to vector<4x96xbf16>
    %11 = vector.shape_cast %8 : vector<4x96xbf16> to vector<1x4x96xbf16>
    tpu.vector_store %arg7[%c0_8, %c0_9, %c416_10], %11 {strides = array<i32>} : memref<2x4x512xbf16, #tpu.memory_space<vmem>>, vector<1x4x96xbf16>,
    %c0_11 = arith.constant 0 : index
    %c0_12 = arith.constant 0 : index
    %c109 = arith.constant 109 : index
    %12 = vector.load %arg1[%c0_11, %c0_12, %c109] : memref<2x4x512xbf16, #tpu.memory_space<vmem>>, vector<1x4x288xbf16>
    %13 = vector.shape_cast %12 : vector<1x4x288xbf16> to vector<4x288xbf16>
    %c0_13 = arith.constant 0 : index
    %c0_14 = arith.constant 0 : index
    %c0_15 = arith.constant 0 : index
    %14 = vector.load %arg2[%c0_13, %c0_14, %c0_15] : memref<9x4x4xbf16, #tpu.memory_space<vmem>>, vector<1x4x4xbf16>
    %15 = vector.shape_cast %14 : vector<1x4x4xbf16> to vector<4x4xbf16>
    %cst_16 = arith.constant dense<0.000000e+00> : vector<4x288xf32>
    %16 = tpu.matmul %15, %13, %cst_16 {dimension_numbers = #tpu.dot_dimension_numbers<[1], [0], [0], [1], [0, 0, 1, 1], [], []>} : vector<4x4xbf16>, vector<4x288xbf16>, vector<4x288xf32> -> vector<4x288xf32>
    %c0_17 = arith.constant 0 : index
    %c0_18 = arith.constant 0 : index
    %c110 = arith.constant 110 : index
    %17 = vector.load %arg1[%c0_17, %c0_18, %c110] : memref<2x4x512xbf16, #tpu.memory_space<vmem>>, vector<1x4x288xbf16>
    %18 = vector.shape_cast %17 : vector<1x4x288xbf16> to vector<4x288xbf16>
    %c1 = arith.constant 1 : index
    %c0_19 = arith.constant 0 : index
    %c0_20 = arith.constant 0 : index
    %19 = vector.load %arg2[%c1, %c0_19, %c0_20] : memref<9x4x4xbf16, #tpu.memory_space<vmem>>, vector<1x4x4xbf16>
    %20 = vector.shape_cast %19 : vector<1x4x4xbf16> to vector<4x4xbf16>
    %cst_21 = arith.constant dense<0.000000e+00> : vector<4x288xf32>
    %21 = tpu.matmul %20, %18, %cst_21 {dimension_numbers = #tpu.dot_dimension_numbers<[1], [0], [0], [1], [0, 0, 1, 1], [], []>} : vector<4x4xbf16>, vector<4x288xbf16>, vector<4x288xf32> -> vector<4x288xf32>
    %22 = arith.addf %16, %21 : vector<4x288xf32>
    %c0_22 = arith.constant 0 : index
    %c0_23 = arith.constant 0 : index
    %c111 = arith.constant 111 : index
    %23 = vector.load %arg1[%c0_22, %c0_23, %c111] : memref<2x4x512xbf16, #tpu.memory_space<vmem>>, vector<1x4x288xbf16>
    %24 = vector.shape_cast %23 : vector<1x4x288xbf16> to vector<4x288xbf16>
    %c2 = arith.constant 2 : index
    %c0_24 = arith.constant 0 : index
    %c0_25 = arith.constant 0 : index
    %25 = vector.load %arg2[%c2, %c0_24, %c0_25] : memref<9x4x4xbf16, #tpu.memory_space<vmem>>, vector<1x4x4xbf16>
    %26 = vector.shape_cast %25 : vector<1x4x4xbf16> to vector<4x4xbf16>
    %cst_26 = arith.constant dense<0.000000e+00> : vector<4x288xf32>
    %27 = tpu.matmul %26, %24, %cst_26 {dimension_numbers = #tpu.dot_dimension_numbers<[1], [0], [0], [1], [0, 0, 1, 1], [], []>} : vector<4x4xbf16>, vector<4x288xbf16>, vector<4x288xf32> -> vector<4x288xf32>
    %28 = arith.addf %22, %27 : vector<4x288xf32>
    %c0_27 = arith.constant 0 : index
    %c0_28 = arith.constant 0 : index
    %c127 = arith.constant 127 : index
    %29 = vector.load %arg1[%c0_27, %c0_28, %c127] : memref<2x4x512xbf16, #tpu.memory_space<vmem>>, vector<1x4x288xbf16>
    %30 = vector.shape_cast %29 : vector<1x4x288xbf16> to vector<4x288xbf16>
    %c3 = arith.constant 3 : index
    %c0_29 = arith.constant 0 : index
    %c0_30 = arith.constant 0 : index
    %31 = vector.load %arg2[%c3, %c0_29, %c0_30] : memref<9x4x4xbf16, #tpu.memory_space<vmem>>, vector<1x4x4xbf16>
    %32 = vector.shape_cast %31 : vector<1x4x4xbf16> to vector<4x4xbf16>
    %cst_31 = arith.constant dense<0.000000e+00> : vector<4x288xf32>
    %33 = tpu.matmul %32, %30, %cst_31 {dimension_numbers = #tpu.dot_dimension_numbers<[1], [0], [0], [1], [0, 0, 1, 1], [], []>} : vector<4x4xbf16>, vector<4x288xbf16>, vector<4x288xf32> -> vector<4x288xf32>
    %34 = arith.addf %28, %33 : vector<4x288xf32>
    %c0_32 = arith.constant 0 : index
    %c0_33 = arith.constant 0 : index
    %c128 = arith.constant 128 : index
    %35 = vector.load %arg1[%c0_32, %c0_33, %c128] : memref<2x4x512xbf16, #tpu.memory_space<vmem>>, vector<1x4x288xbf16>
    %36 = vector.shape_cast %35 : vector<1x4x288xbf16> to vector<4x288xbf16>
    %c4 = arith.constant 4 : index
    %c0_34 = arith.constant 0 : index
    %c0_35 = arith.constant 0 : index
    %37 = vector.load %arg2[%c4, %c0_34, %c0_35] : memref<9x4x4xbf16, #tpu.memory_space<vmem>>, vector<1x4x4xbf16>
    %38 = vector.shape_cast %37 : vector<1x4x4xbf16> to vector<4x4xbf16>
    %cst_36 = arith.constant dense<0.000000e+00> : vector<4x288xf32>
    %39 = tpu.matmul %38, %36, %cst_36 {dimension_numbers = #tpu.dot_dimension_numbers<[1], [0], [0], [1], [0, 0, 1, 1], [], []>} : vector<4x4xbf16>, vector<4x288xbf16>, vector<4x288xf32> -> vector<4x288xf32>
    %40 = arith.addf %34, %39 : vector<4x288xf32>
    %c0_37 = arith.constant 0 : index
    %c0_38 = arith.constant 0 : index
    %c129 = arith.constant 129 : index
    %41 = vector.load %arg1[%c0_37, %c0_38, %c129] : memref<2x4x512xbf16, #tpu.memory_space<vmem>>, vector<1x4x288xbf16>
    %42 = vector.shape_cast %41 : vector<1x4x288xbf16> to vector<4x288xbf16>
    %c5 = arith.constant 5 : index
    %c0_39 = arith.constant 0 : index
    %c0_40 = arith.constant 0 : index
    %43 = vector.load %arg2[%c5, %c0_39, %c0_40] : memref<9x4x4xbf16, #tpu.memory_space<vmem>>, vector<1x4x4xbf16>
    %44 = vector.shape_cast %43 : vector<1x4x4xbf16> to vector<4x4xbf16>
    %cst_41 = arith.constant dense<0.000000e+00> : vector<4x288xf32>
    %45 = tpu.matmul %44, %42, %cst_41 {dimension_numbers = #tpu.dot_dimension_numbers<[1], [0], [0], [1], [0, 0, 1, 1], [], []>} : vector<4x4xbf16>, vector<4x288xbf16>, vector<4x288xf32> -> vector<4x288xf32>
    %46 = arith.addf %40, %45 : vector<4x288xf32>
    %c0_42 = arith.constant 0 : index
    %c0_43 = arith.constant 0 : index
    %c145 = arith.constant 145 : index
    %47 = vector.load %arg1[%c0_42, %c0_43, %c145] : memref<2x4x512xbf16, #tpu.memory_space<vmem>>, vector<1x4x288xbf16>
    %48 = vector.shape_cast %47 : vector<1x4x288xbf16> to vector<4x288xbf16>
    %c6 = arith.constant 6 : index
    %c0_44 = arith.constant 0 : index
    %c0_45 = arith.constant 0 : index
    %49 = vector.load %arg2[%c6, %c0_44, %c0_45] : memref<9x4x4xbf16, #tpu.memory_space<vmem>>, vector<1x4x4xbf16>
    %50 = vector.shape_cast %49 : vector<1x4x4xbf16> to vector<4x4xbf16>
    %cst_46 = arith.constant dense<0.000000e+00> : vector<4x288xf32>
    %51 = tpu.matmul %50, %48, %cst_46 {dimension_numbers = #tpu.dot_dimension_numbers<[1], [0], [0], [1], [0, 0, 1, 1], [], []>} : vector<4x4xbf16>, vector<4x288xbf16>, vector<4x288xf32> -> vector<4x288xf32>
    %52 = arith.addf %46, %51 : vector<4x288xf32>
    %c0_47 = arith.constant 0 : index
    %c0_48 = arith.constant 0 : index
    %c146 = arith.constant 146 : index
    %53 = vector.load %arg1[%c0_47, %c0_48, %c146] : memref<2x4x512xbf16, #tpu.memory_space<vmem>>, vector<1x4x288xbf16>
    %54 = vector.shape_cast %53 : vector<1x4x288xbf16> to vector<4x288xbf16>
    %c7 = arith.constant 7 : index
    %c0_49 = arith.constant 0 : index
    %c0_50 = arith.constant 0 : index
    %55 = vector.load %arg2[%c7, %c0_49, %c0_50] : memref<9x4x4xbf16, #tpu.memory_space<vmem>>, vector<1x4x4xbf16>
    %56 = vector.shape_cast %55 : vector<1x4x4xbf16> to vector<4x4xbf16>
    %cst_51 = arith.constant dense<0.000000e+00> : vector<4x288xf32>
    %57 = tpu.matmul %56, %54, %cst_51 {dimension_numbers = #tpu.dot_dimension_numbers<[1], [0], [0], [1], [0, 0, 1, 1], [], []>} : vector<4x4xbf16>, vector<4x288xbf16>, vector<4x288xf32> -> vector<4x288xf32>
    %58 = arith.addf %52, %57 : vector<4x288xf32>
    %c0_52 = arith.constant 0 : index
    %c0_53 = arith.constant 0 : index
    %c147 = arith.constant 147 : index
    %59 = vector.load %arg1[%c0_52, %c0_53, %c147] : memref<2x4x512xbf16, #tpu.memory_space<vmem>>, vector<1x4x288xbf16>
    %60 = vector.shape_cast %59 : vector<1x4x288xbf16> to vector<4x288xbf16>
    %c8 = arith.constant 8 : index
    %c0_54 = arith.constant 0 : index
    %c0_55 = arith.constant 0 : index
    %61 = vector.load %arg2[%c8, %c0_54, %c0_55] : memref<9x4x4xbf16, #tpu.memory_space<vmem>>, vector<1x4x4xbf16>
    %62 = vector.shape_cast %61 : vector<1x4x4xbf16> to vector<4x4xbf16>
    %cst_56 = arith.constant dense<0.000000e+00> : vector<4x288xf32>
    %63 = tpu.matmul %62, %60, %cst_56 {dimension_numbers = #tpu.dot_dimension_numbers<[1], [0], [0], [1], [0, 0, 1, 1], [], []>} : vector<4x4xbf16>, vector<4x288xbf16>, vector<4x288xf32> -> vector<4x288xf32>
    %64 = arith.addf %58, %63 : vector<4x288xf32>
    %c0_57 = arith.constant 0 : index
    %c0_58 = arith.constant 0 : index
    %65 = vector.load %arg3[%c0_57, %c0_58] : memref<4x1xf32, #tpu.memory_space<vmem>>, vector<4x1xf32>
    %66 = vector.broadcast %65 : vector<4x1xf32> to vector<4x288xf32>
    %67 = arith.addf %64, %66 : vector<4x288xf32>
    %cst_59 = arith.constant 0.000000e+00 : f32
    %68 = vector.broadcast %cst_59 : f32 to vector<4x288xf32>
    %69 = arith.maximumf %67, %68 : vector<4x288xf32>
    %c0_60 = arith.constant 0 : index
    %c0_61 = arith.constant 0 : index
    %70 = vector.load %arg6[%c0_60, %c0_61] : memref<1x288xf32, #tpu.memory_space<vmem>>, vector<1x288xf32>
    %71 = vector.broadcast %70 : vector<1x288xf32> to vector<4x288xf32>
    %72 = arith.mulf %69, %71 : vector<4x288xf32>
    %73 = arith.truncf %72 : vector<4x288xf32> to vector<4x288xbf16>
    %c0_62 = arith.constant 0 : index
    %c128_63 = arith.constant 128 : index
    %74 = vector.load %arg8[%c0_62, %c128_63] : memref<4x512xbf16, #tpu.memory_space<vmem>>, vector<4x288xbf16>
    tpu.vector_store %arg8[%c0_62, %c128_63], %73 {strides = array<i32>} : memref<4x512xbf16, #tpu.memory_space<vmem>>, vector<4x288xbf16>,
    %c0_64 = arith.constant 0 : index
    %c109_65 = arith.constant 109 : index
    %75 = vector.load %arg8[%c0_64, %c109_65] : memref<4x512xbf16, #tpu.memory_space<vmem>>, vector<4x288xbf16>
    %c0_66 = arith.constant 0 : index
    %c0_67 = arith.constant 0 : index
    %c0_68 = arith.constant 0 : index
    %76 = vector.load %arg4[%c0_66, %c0_67, %c0_68] : memref<9x4x4xbf16, #tpu.memory_space<vmem>>, vector<1x4x4xbf16>
    %77 = vector.shape_cast %76 : vector<1x4x4xbf16> to vector<4x4xbf16>
    %cst_69 = arith.constant dense<0.000000e+00> : vector<4x288xf32>
    %78 = tpu.matmul %77, %75, %cst_69 {dimension_numbers = #tpu.dot_dimension_numbers<[1], [0], [0], [1], [0, 0, 1, 1], [], []>} : vector<4x4xbf16>, vector<4x288xbf16>, vector<4x288xf32> -> vector<4x288xf32>
    %c0_70 = arith.constant 0 : index
    %c110_71 = arith.constant 110 : index
    %79 = vector.load %arg8[%c0_70, %c110_71] : memref<4x512xbf16, #tpu.memory_space<vmem>>, vector<4x288xbf16>
    %c1_72 = arith.constant 1 : index
    %c0_73 = arith.constant 0 : index
    %c0_74 = arith.constant 0 : index
    %80 = vector.load %arg4[%c1_72, %c0_73, %c0_74] : memref<9x4x4xbf16, #tpu.memory_space<vmem>>, vector<1x4x4xbf16>
    %81 = vector.shape_cast %80 : vector<1x4x4xbf16> to vector<4x4xbf16>
    %cst_75 = arith.constant dense<0.000000e+00> : vector<4x288xf32>
    %82 = tpu.matmul %81, %79, %cst_75 {dimension_numbers = #tpu.dot_dimension_numbers<[1], [0], [0], [1], [0, 0, 1, 1], [], []>} : vector<4x4xbf16>, vector<4x288xbf16>, vector<4x288xf32> -> vector<4x288xf32>
    %83 = arith.addf %78, %82 : vector<4x288xf32>
    %c0_76 = arith.constant 0 : index
    %c111_77 = arith.constant 111 : index
    %84 = vector.load %arg8[%c0_76, %c111_77] : memref<4x512xbf16, #tpu.memory_space<vmem>>, vector<4x288xbf16>
    %c2_78 = arith.constant 2 : index
    %c0_79 = arith.constant 0 : index
    %c0_80 = arith.constant 0 : index
    %85 = vector.load %arg4[%c2_78, %c0_79, %c0_80] : memref<9x4x4xbf16, #tpu.memory_space<vmem>>, vector<1x4x4xbf16>
    %86 = vector.shape_cast %85 : vector<1x4x4xbf16> to vector<4x4xbf16>
    %cst_81 = arith.constant dense<0.000000e+00> : vector<4x288xf32>
    %87 = tpu.matmul %86, %84, %cst_81 {dimension_numbers = #tpu.dot_dimension_numbers<[1], [0], [0], [1], [0, 0, 1, 1], [], []>} : vector<4x4xbf16>, vector<4x288xbf16>, vector<4x288xf32> -> vector<4x288xf32>
    %88 = arith.addf %83, %87 : vector<4x288xf32>
    %c0_82 = arith.constant 0 : index
    %c127_83 = arith.constant 127 : index
    %89 = vector.load %arg8[%c0_82, %c127_83] : memref<4x512xbf16, #tpu.memory_space<vmem>>, vector<4x288xbf16>
    %c3_84 = arith.constant 3 : index
    %c0_85 = arith.constant 0 : index
    %c0_86 = arith.constant 0 : index
    %90 = vector.load %arg4[%c3_84, %c0_85, %c0_86] : memref<9x4x4xbf16, #tpu.memory_space<vmem>>, vector<1x4x4xbf16>
    %91 = vector.shape_cast %90 : vector<1x4x4xbf16> to vector<4x4xbf16>
    %cst_87 = arith.constant dense<0.000000e+00> : vector<4x288xf32>
    %92 = tpu.matmul %91, %89, %cst_87 {dimension_numbers = #tpu.dot_dimension_numbers<[1], [0], [0], [1], [0, 0, 1, 1], [], []>} : vector<4x4xbf16>, vector<4x288xbf16>, vector<4x288xf32> -> vector<4x288xf32>
    %93 = arith.addf %88, %92 : vector<4x288xf32>
    %c0_88 = arith.constant 0 : index
    %c128_89 = arith.constant 128 : index
    %94 = vector.load %arg8[%c0_88, %c128_89] : memref<4x512xbf16, #tpu.memory_space<vmem>>, vector<4x288xbf16>
    %c4_90 = arith.constant 4 : index
    %c0_91 = arith.constant 0 : index
    %c0_92 = arith.constant 0 : index
    %95 = vector.load %arg4[%c4_90, %c0_91, %c0_92] : memref<9x4x4xbf16, #tpu.memory_space<vmem>>, vector<1x4x4xbf16>
    %96 = vector.shape_cast %95 : vector<1x4x4xbf16> to vector<4x4xbf16>
    %cst_93 = arith.constant dense<0.000000e+00> : vector<4x288xf32>
    %97 = tpu.matmul %96, %94, %cst_93 {dimension_numbers = #tpu.dot_dimension_numbers<[1], [0], [0], [1], [0, 0, 1, 1], [], []>} : vector<4x4xbf16>, vector<4x288xbf16>, vector<4x288xf32> -> vector<4x288xf32>
    %98 = arith.addf %93, %97 : vector<4x288xf32>
    %c0_94 = arith.constant 0 : index
    %c129_95 = arith.constant 129 : index
    %99 = vector.load %arg8[%c0_94, %c129_95] : memref<4x512xbf16, #tpu.memory_space<vmem>>, vector<4x288xbf16>
    %c5_96 = arith.constant 5 : index
    %c0_97 = arith.constant 0 : index
    %c0_98 = arith.constant 0 : index
    %100 = vector.load %arg4[%c5_96, %c0_97, %c0_98] : memref<9x4x4xbf16, #tpu.memory_space<vmem>>, vector<1x4x4xbf16>
    %101 = vector.shape_cast %100 : vector<1x4x4xbf16> to vector<4x4xbf16>
    %cst_99 = arith.constant dense<0.000000e+00> : vector<4x288xf32>
    %102 = tpu.matmul %101, %99, %cst_99 {dimension_numbers = #tpu.dot_dimension_numbers<[1], [0], [0], [1], [0, 0, 1, 1], [], []>} : vector<4x4xbf16>, vector<4x288xbf16>, vector<4x288xf32> -> vector<4x288xf32>
    %103 = arith.addf %98, %102 : vector<4x288xf32>
    %c0_100 = arith.constant 0 : index
    %c145_101 = arith.constant 145 : index
    %104 = vector.load %arg8[%c0_100, %c145_101] : memref<4x512xbf16, #tpu.memory_space<vmem>>, vector<4x288xbf16>
    %c6_102 = arith.constant 6 : index
    %c0_103 = arith.constant 0 : index
    %c0_104 = arith.constant 0 : index
    %105 = vector.load %arg4[%c6_102, %c0_103, %c0_104] : memref<9x4x4xbf16, #tpu.memory_space<vmem>>, vector<1x4x4xbf16>
    %106 = vector.shape_cast %105 : vector<1x4x4xbf16> to vector<4x4xbf16>
    %cst_105 = arith.constant dense<0.000000e+00> : vector<4x288xf32>
    %107 = tpu.matmul %106, %104, %cst_105 {dimension_numbers = #tpu.dot_dimension_numbers<[1], [0], [0], [1], [0, 0, 1, 1], [], []>} : vector<4x4xbf16>, vector<4x288xbf16>, vector<4x288xf32> -> vector<4x288xf32>
    %108 = arith.addf %103, %107 : vector<4x288xf32>
    %c0_106 = arith.constant 0 : index
    %c146_107 = arith.constant 146 : index
    %109 = vector.load %arg8[%c0_106, %c146_107] : memref<4x512xbf16, #tpu.memory_space<vmem>>, vector<4x288xbf16>
    %c7_108 = arith.constant 7 : index
    %c0_109 = arith.constant 0 : index
    %c0_110 = arith.constant 0 : index
    %110 = vector.load %arg4[%c7_108, %c0_109, %c0_110] : memref<9x4x4xbf16, #tpu.memory_space<vmem>>, vector<1x4x4xbf16>
    %111 = vector.shape_cast %110 : vector<1x4x4xbf16> to vector<4x4xbf16>
    %cst_111 = arith.constant dense<0.000000e+00> : vector<4x288xf32>
    %112 = tpu.matmul %111, %109, %cst_111 {dimension_numbers = #tpu.dot_dimension_numbers<[1], [0], [0], [1], [0, 0, 1, 1], [], []>} : vector<4x4xbf16>, vector<4x288xbf16>, vector<4x288xf32> -> vector<4x288xf32>
    %113 = arith.addf %108, %112 : vector<4x288xf32>
    %c0_112 = arith.constant 0 : index
    %c147_113 = arith.constant 147 : index
    %114 = vector.load %arg8[%c0_112, %c147_113] : memref<4x512xbf16, #tpu.memory_space<vmem>>, vector<4x288xbf16>
    %c8_114 = arith.constant 8 : index
    %c0_115 = arith.constant 0 : index
    %c0_116 = arith.constant 0 : index
    %115 = vector.load %arg4[%c8_114, %c0_115, %c0_116] : memref<9x4x4xbf16, #tpu.memory_space<vmem>>, vector<1x4x4xbf16>
    %116 = vector.shape_cast %115 : vector<1x4x4xbf16> to vector<4x4xbf16>
    %cst_117 = arith.constant dense<0.000000e+00> : vector<4x288xf32>
    %117 = tpu.matmul %116, %114, %cst_117 {dimension_numbers = #tpu.dot_dimension_numbers<[1], [0], [0], [1], [0, 0, 1, 1], [], []>} : vector<4x4xbf16>, vector<4x288xbf16>, vector<4x288xf32> -> vector<4x288xf32>
    %118 = arith.addf %113, %117 : vector<4x288xf32>
    %c0_118 = arith.constant 0 : index
    %c0_119 = arith.constant 0 : index
    %c128_120 = arith.constant 128 : index
    %119 = vector.load %arg1[%c0_118, %c0_119, %c128_120] : memref<2x4x512xbf16, #tpu.memory_space<vmem>>, vector<1x4x288xbf16>
    %120 = vector.shape_cast %119 : vector<1x4x288xbf16> to vector<4x288xbf16>
    %121 = arith.extf %120 : vector<4x288xbf16> to vector<4x288xf32>
    %c0_121 = arith.constant 0 : index
    %c0_122 = arith.constant 0 : index
    %122 = vector.load %arg5[%c0_121, %c0_122] : memref<4x1xf32, #tpu.memory_space<vmem>>, vector<4x1xf32>
    %123 = vector.broadcast %122 : vector<4x1xf32> to vector<4x288xf32>
    %124 = arith.addf %118, %123 : vector<4x288xf32>
    %125 = arith.addf %124, %121 : vector<4x288xf32>
    %cst_123 = arith.constant 0.000000e+00 : f32
    %126 = vector.broadcast %cst_123 : f32 to vector<4x288xf32>
    %127 = arith.maximumf %125, %126 : vector<4x288xf32>
    %c0_124 = arith.constant 0 : index
    %c0_125 = arith.constant 0 : index
    %128 = vector.load %arg6[%c0_124, %c0_125] : memref<1x288xf32, #tpu.memory_space<vmem>>, vector<1x288xf32>
    %129 = vector.broadcast %128 : vector<1x288xf32> to vector<4x288xf32>
    %130 = arith.mulf %127, %129 : vector<4x288xf32>
    %131 = arith.truncf %130 : vector<4x288xf32> to vector<4x288xbf16>
    %c0_126 = arith.constant 0 : index
    %c0_127 = arith.constant 0 : index
    %c128_128 = arith.constant 128 : index
    %132 = vector.load %arg7[%c0_126, %c0_127, %c128_128] : memref<2x4x512xbf16, #tpu.memory_space<vmem>>, vector<1x4x288xbf16>
    %133 = vector.shape_cast %132 : vector<1x4x288xbf16> to vector<4x288xbf16>
    %134 = vector.shape_cast %131 : vector<4x288xbf16> to vector<1x4x288xbf16>
    tpu.vector_store %arg7[%c0_126, %c0_127, %c128_128], %134 {strides = array<i32>} : memref<2x4x512xbf16, #tpu.memory_space<vmem>>, vector<1x4x288xbf16>,
    %cst_129 = arith.constant 0.000000e+00 : bf16
    %135 = vector.broadcast %cst_129 : bf16 to vector<4x128xbf16>
    %c0_130 = arith.constant 0 : index
    %c0_131 = arith.constant 0 : index
    %136 = vector.load %arg8[%c0_130, %c0_131] : memref<4x512xbf16, #tpu.memory_space<vmem>>, vector<4x128xbf16>
    tpu.vector_store %arg8[%c0_130, %c0_131], %135 {strides = array<i32>} : memref<4x512xbf16, #tpu.memory_space<vmem>>, vector<4x128xbf16>,
    %cst_132 = arith.constant 0.000000e+00 : bf16
    %137 = vector.broadcast %cst_132 : bf16 to vector<4x96xbf16>
    %c0_133 = arith.constant 0 : index
    %c416_134 = arith.constant 416 : index
    %138 = vector.load %arg8[%c0_133, %c416_134] : memref<4x512xbf16, #tpu.memory_space<vmem>>, vector<4x96xbf16>
    tpu.vector_store %arg8[%c0_133, %c416_134], %137 {strides = array<i32>} : memref<4x512xbf16, #tpu.memory_space<vmem>>, vector<4x96xbf16>,
    %cst_135 = arith.constant 0.000000e+00 : bf16
    %139 = vector.broadcast %cst_135 : bf16 to vector<4x128xbf16>
    %c1_136 = arith.constant 1 : index
    %c0_137 = arith.constant 0 : index
    %c0_138 = arith.constant 0 : index
    %140 = vector.load %arg7[%c1_136, %c0_137, %c0_138] : memref<2x4x512xbf16, #tpu.memory_space<vmem>>, vector<1x4x128xbf16>
    %141 = vector.shape_cast %140 : vector<1x4x128xbf16> to vector<4x128xbf16>
    %142 = vector.shape_cast %139 : vector<4x128xbf16> to vector<1x4x128xbf16>
    tpu.vector_store %arg7[%c1_136, %c0_137, %c0_138], %142 {strides = array<i32>} : memref<2x4x512xbf16, #tpu.memory_space<vmem>>, vector<1x4x128xbf16>,
    %cst_139 = arith.constant 0.000000e+00 : bf16
    %143 = vector.broadcast %cst_139 : bf16 to vector<4x96xbf16>
    %c1_140 = arith.constant 1 : index
    %c0_141 = arith.constant 0 : index
    %c416_142 = arith.constant 416 : index
    %144 = vector.load %arg7[%c1_140, %c0_141, %c416_142] : memref<2x4x512xbf16, #tpu.memory_space<vmem>>, vector<1x4x96xbf16>
    %145 = vector.shape_cast %144 : vector<1x4x96xbf16> to vector<4x96xbf16>
    %146 = vector.shape_cast %143 : vector<4x96xbf16> to vector<1x4x96xbf16>
    tpu.vector_store %arg7[%c1_140, %c0_141, %c416_142], %146 {strides = array<i32>} : memref<2x4x512xbf16, #tpu.memory_space<vmem>>, vector<1x4x96xbf16>,
    %c1_143 = arith.constant 1 : index
    %c0_144 = arith.constant 0 : index
    %c109_145 = arith.constant 109 : index
    %147 = vector.load %arg1[%c1_143, %c0_144, %c109_145] : memref<2x4x512xbf16, #tpu.memory_space<vmem>>, vector<1x4x288xbf16>
    %148 = vector.shape_cast %147 : vector<1x4x288xbf16> to vector<4x288xbf16>
    %c0_146 = arith.constant 0 : index
    %c0_147 = arith.constant 0 : index
    %c0_148 = arith.constant 0 : index
    %149 = vector.load %arg2[%c0_146, %c0_147, %c0_148] : memref<9x4x4xbf16, #tpu.memory_space<vmem>>, vector<1x4x4xbf16>
    %150 = vector.shape_cast %149 : vector<1x4x4xbf16> to vector<4x4xbf16>
    %cst_149 = arith.constant dense<0.000000e+00> : vector<4x288xf32>
    %151 = tpu.matmul %150, %148, %cst_149 {dimension_numbers = #tpu.dot_dimension_numbers<[1], [0], [0], [1], [0, 0, 1, 1], [], []>} : vector<4x4xbf16>, vector<4x288xbf16>, vector<4x288xf32> -> vector<4x288xf32>
    %c1_150 = arith.constant 1 : index
    %c0_151 = arith.constant 0 : index
    %c110_152 = arith.constant 110 : index
    %152 = vector.load %arg1[%c1_150, %c0_151, %c110_152] : memref<2x4x512xbf16, #tpu.memory_space<vmem>>, vector<1x4x288xbf16>
    %153 = vector.shape_cast %152 : vector<1x4x288xbf16> to vector<4x288xbf16>
    %c1_153 = arith.constant 1 : index
    %c0_154 = arith.constant 0 : index
    %c0_155 = arith.constant 0 : index
    %154 = vector.load %arg2[%c1_153, %c0_154, %c0_155] : memref<9x4x4xbf16, #tpu.memory_space<vmem>>, vector<1x4x4xbf16>
    %155 = vector.shape_cast %154 : vector<1x4x4xbf16> to vector<4x4xbf16>
    %cst_156 = arith.constant dense<0.000000e+00> : vector<4x288xf32>
    %156 = tpu.matmul %155, %153, %cst_156 {dimension_numbers = #tpu.dot_dimension_numbers<[1], [0], [0], [1], [0, 0, 1, 1], [], []>} : vector<4x4xbf16>, vector<4x288xbf16>, vector<4x288xf32> -> vector<4x288xf32>
    %157 = arith.addf %151, %156 : vector<4x288xf32>
    %c1_157 = arith.constant 1 : index
    %c0_158 = arith.constant 0 : index
    %c111_159 = arith.constant 111 : index
    %158 = vector.load %arg1[%c1_157, %c0_158, %c111_159] : memref<2x4x512xbf16, #tpu.memory_space<vmem>>, vector<1x4x288xbf16>
    %159 = vector.shape_cast %158 : vector<1x4x288xbf16> to vector<4x288xbf16>
    %c2_160 = arith.constant 2 : index
    %c0_161 = arith.constant 0 : index
    %c0_162 = arith.constant 0 : index
    %160 = vector.load %arg2[%c2_160, %c0_161, %c0_162] : memref<9x4x4xbf16, #tpu.memory_space<vmem>>, vector<1x4x4xbf16>
    %161 = vector.shape_cast %160 : vector<1x4x4xbf16> to vector<4x4xbf16>
    %cst_163 = arith.constant dense<0.000000e+00> : vector<4x288xf32>
    %162 = tpu.matmul %161, %159, %cst_163 {dimension_numbers = #tpu.dot_dimension_numbers<[1], [0], [0], [1], [0, 0, 1, 1], [], []>} : vector<4x4xbf16>, vector<4x288xbf16>, vector<4x288xf32> -> vector<4x288xf32>
    %163 = arith.addf %157, %162 : vector<4x288xf32>
    %c1_164 = arith.constant 1 : index
    %c0_165 = arith.constant 0 : index
    %c127_166 = arith.constant 127 : index
    %164 = vector.load %arg1[%c1_164, %c0_165, %c127_166] : memref<2x4x512xbf16, #tpu.memory_space<vmem>>, vector<1x4x288xbf16>
    %165 = vector.shape_cast %164 : vector<1x4x288xbf16> to vector<4x288xbf16>
    %c3_167 = arith.constant 3 : index
    %c0_168 = arith.constant 0 : index
    %c0_169 = arith.constant 0 : index
    %166 = vector.load %arg2[%c3_167, %c0_168, %c0_169] : memref<9x4x4xbf16, #tpu.memory_space<vmem>>, vector<1x4x4xbf16>
    %167 = vector.shape_cast %166 : vector<1x4x4xbf16> to vector<4x4xbf16>
    %cst_170 = arith.constant dense<0.000000e+00> : vector<4x288xf32>
    %168 = tpu.matmul %167, %165, %cst_170 {dimension_numbers = #tpu.dot_dimension_numbers<[1], [0], [0], [1], [0, 0, 1, 1], [], []>} : vector<4x4xbf16>, vector<4x288xbf16>, vector<4x288xf32> -> vector<4x288xf32>
    %169 = arith.addf %163, %168 : vector<4x288xf32>
    %c1_171 = arith.constant 1 : index
    %c0_172 = arith.constant 0 : index
    %c128_173 = arith.constant 128 : index
    %170 = vector.load %arg1[%c1_171, %c0_172, %c128_173] : memref<2x4x512xbf16, #tpu.memory_space<vmem>>, vector<1x4x288xbf16>
    %171 = vector.shape_cast %170 : vector<1x4x288xbf16> to vector<4x288xbf16>
    %c4_174 = arith.constant 4 : index
    %c0_175 = arith.constant 0 : index
    %c0_176 = arith.constant 0 : index
    %172 = vector.load %arg2[%c4_174, %c0_175, %c0_176] : memref<9x4x4xbf16, #tpu.memory_space<vmem>>, vector<1x4x4xbf16>
    %173 = vector.shape_cast %172 : vector<1x4x4xbf16> to vector<4x4xbf16>
    %cst_177 = arith.constant dense<0.000000e+00> : vector<4x288xf32>
    %174 = tpu.matmul %173, %171, %cst_177 {dimension_numbers = #tpu.dot_dimension_numbers<[1], [0], [0], [1], [0, 0, 1, 1], [], []>} : vector<4x4xbf16>, vector<4x288xbf16>, vector<4x288xf32> -> vector<4x288xf32>
    %175 = arith.addf %169, %174 : vector<4x288xf32>
    %c1_178 = arith.constant 1 : index
    %c0_179 = arith.constant 0 : index
    %c129_180 = arith.constant 129 : index
    %176 = vector.load %arg1[%c1_178, %c0_179, %c129_180] : memref<2x4x512xbf16, #tpu.memory_space<vmem>>, vector<1x4x288xbf16>
    %177 = vector.shape_cast %176 : vector<1x4x288xbf16> to vector<4x288xbf16>
    %c5_181 = arith.constant 5 : index
    %c0_182 = arith.constant 0 : index
    %c0_183 = arith.constant 0 : index
    %178 = vector.load %arg2[%c5_181, %c0_182, %c0_183] : memref<9x4x4xbf16, #tpu.memory_space<vmem>>, vector<1x4x4xbf16>
    %179 = vector.shape_cast %178 : vector<1x4x4xbf16> to vector<4x4xbf16>
    %cst_184 = arith.constant dense<0.000000e+00> : vector<4x288xf32>
    %180 = tpu.matmul %179, %177, %cst_184 {dimension_numbers = #tpu.dot_dimension_numbers<[1], [0], [0], [1], [0, 0, 1, 1], [], []>} : vector<4x4xbf16>, vector<4x288xbf16>, vector<4x288xf32> -> vector<4x288xf32>
    %181 = arith.addf %175, %180 : vector<4x288xf32>
    %c1_185 = arith.constant 1 : index
    %c0_186 = arith.constant 0 : index
    %c145_187 = arith.constant 145 : index
    %182 = vector.load %arg1[%c1_185, %c0_186, %c145_187] : memref<2x4x512xbf16, #tpu.memory_space<vmem>>, vector<1x4x288xbf16>
    %183 = vector.shape_cast %182 : vector<1x4x288xbf16> to vector<4x288xbf16>
    %c6_188 = arith.constant 6 : index
    %c0_189 = arith.constant 0 : index
    %c0_190 = arith.constant 0 : index
    %184 = vector.load %arg2[%c6_188, %c0_189, %c0_190] : memref<9x4x4xbf16, #tpu.memory_space<vmem>>, vector<1x4x4xbf16>
    %185 = vector.shape_cast %184 : vector<1x4x4xbf16> to vector<4x4xbf16>
    %cst_191 = arith.constant dense<0.000000e+00> : vector<4x288xf32>
    %186 = tpu.matmul %185, %183, %cst_191 {dimension_numbers = #tpu.dot_dimension_numbers<[1], [0], [0], [1], [0, 0, 1, 1], [], []>} : vector<4x4xbf16>, vector<4x288xbf16>, vector<4x288xf32> -> vector<4x288xf32>
    %187 = arith.addf %181, %186 : vector<4x288xf32>
    %c1_192 = arith.constant 1 : index
    %c0_193 = arith.constant 0 : index
    %c146_194 = arith.constant 146 : index
    %188 = vector.load %arg1[%c1_192, %c0_193, %c146_194] : memref<2x4x512xbf16, #tpu.memory_space<vmem>>, vector<1x4x288xbf16>
    %189 = vector.shape_cast %188 : vector<1x4x288xbf16> to vector<4x288xbf16>
    %c7_195 = arith.constant 7 : index
    %c0_196 = arith.constant 0 : index
    %c0_197 = arith.constant 0 : index
    %190 = vector.load %arg2[%c7_195, %c0_196, %c0_197] : memref<9x4x4xbf16, #tpu.memory_space<vmem>>, vector<1x4x4xbf16>
    %191 = vector.shape_cast %190 : vector<1x4x4xbf16> to vector<4x4xbf16>
    %cst_198 = arith.constant dense<0.000000e+00> : vector<4x288xf32>
    %192 = tpu.matmul %191, %189, %cst_198 {dimension_numbers = #tpu.dot_dimension_numbers<[1], [0], [0], [1], [0, 0, 1, 1], [], []>} : vector<4x4xbf16>, vector<4x288xbf16>, vector<4x288xf32> -> vector<4x288xf32>
    %193 = arith.addf %187, %192 : vector<4x288xf32>
    %c1_199 = arith.constant 1 : index
    %c0_200 = arith.constant 0 : index
    %c147_201 = arith.constant 147 : index
    %194 = vector.load %arg1[%c1_199, %c0_200, %c147_201] : memref<2x4x512xbf16, #tpu.memory_space<vmem>>, vector<1x4x288xbf16>
    %195 = vector.shape_cast %194 : vector<1x4x288xbf16> to vector<4x288xbf16>
    %c8_202 = arith.constant 8 : index
    %c0_203 = arith.constant 0 : index
    %c0_204 = arith.constant 0 : index
    %196 = vector.load %arg2[%c8_202, %c0_203, %c0_204] : memref<9x4x4xbf16, #tpu.memory_space<vmem>>, vector<1x4x4xbf16>
    %197 = vector.shape_cast %196 : vector<1x4x4xbf16> to vector<4x4xbf16>
    %cst_205 = arith.constant dense<0.000000e+00> : vector<4x288xf32>
    %198 = tpu.matmul %197, %195, %cst_205 {dimension_numbers = #tpu.dot_dimension_numbers<[1], [0], [0], [1], [0, 0, 1, 1], [], []>} : vector<4x4xbf16>, vector<4x288xbf16>, vector<4x288xf32> -> vector<4x288xf32>
    %199 = arith.addf %193, %198 : vector<4x288xf32>
    %c0_206 = arith.constant 0 : index
    %c0_207 = arith.constant 0 : index
    %200 = vector.load %arg3[%c0_206, %c0_207] : memref<4x1xf32, #tpu.memory_space<vmem>>, vector<4x1xf32>
    %201 = vector.broadcast %200 : vector<4x1xf32> to vector<4x288xf32>
    %202 = arith.addf %199, %201 : vector<4x288xf32>
    %cst_208 = arith.constant 0.000000e+00 : f32
    %203 = vector.broadcast %cst_208 : f32 to vector<4x288xf32>
    %204 = arith.maximumf %202, %203 : vector<4x288xf32>
    %c0_209 = arith.constant 0 : index
    %c0_210 = arith.constant 0 : index
    %205 = vector.load %arg6[%c0_209, %c0_210] : memref<1x288xf32, #tpu.memory_space<vmem>>, vector<1x288xf32>
    %206 = vector.broadcast %205 : vector<1x288xf32> to vector<4x288xf32>
    %207 = arith.mulf %204, %206 : vector<4x288xf32>
    %208 = arith.truncf %207 : vector<4x288xf32> to vector<4x288xbf16>
    %c0_211 = arith.constant 0 : index
    %c128_212 = arith.constant 128 : index
    %209 = vector.load %arg8[%c0_211, %c128_212] : memref<4x512xbf16, #tpu.memory_space<vmem>>, vector<4x288xbf16>
    tpu.vector_store %arg8[%c0_211, %c128_212], %208 {strides = array<i32>} : memref<4x512xbf16, #tpu.memory_space<vmem>>, vector<4x288xbf16>,
    %c0_213 = arith.constant 0 : index
    %c109_214 = arith.constant 109 : index
    %210 = vector.load %arg8[%c0_213, %c109_214] : memref<4x512xbf16, #tpu.memory_space<vmem>>, vector<4x288xbf16>
    %c0_215 = arith.constant 0 : index
    %c0_216 = arith.constant 0 : index
    %c0_217 = arith.constant 0 : index
    %211 = vector.load %arg4[%c0_215, %c0_216, %c0_217] : memref<9x4x4xbf16, #tpu.memory_space<vmem>>, vector<1x4x4xbf16>
    %212 = vector.shape_cast %211 : vector<1x4x4xbf16> to vector<4x4xbf16>
    %cst_218 = arith.constant dense<0.000000e+00> : vector<4x288xf32>
    %213 = tpu.matmul %212, %210, %cst_218 {dimension_numbers = #tpu.dot_dimension_numbers<[1], [0], [0], [1], [0, 0, 1, 1], [], []>} : vector<4x4xbf16>, vector<4x288xbf16>, vector<4x288xf32> -> vector<4x288xf32>
    %c0_219 = arith.constant 0 : index
    %c110_220 = arith.constant 110 : index
    %214 = vector.load %arg8[%c0_219, %c110_220] : memref<4x512xbf16, #tpu.memory_space<vmem>>, vector<4x288xbf16>
    %c1_221 = arith.constant 1 : index
    %c0_222 = arith.constant 0 : index
    %c0_223 = arith.constant 0 : index
    %215 = vector.load %arg4[%c1_221, %c0_222, %c0_223] : memref<9x4x4xbf16, #tpu.memory_space<vmem>>, vector<1x4x4xbf16>
    %216 = vector.shape_cast %215 : vector<1x4x4xbf16> to vector<4x4xbf16>
    %cst_224 = arith.constant dense<0.000000e+00> : vector<4x288xf32>
    %217 = tpu.matmul %216, %214, %cst_224 {dimension_numbers = #tpu.dot_dimension_numbers<[1], [0], [0], [1], [0, 0, 1, 1], [], []>} : vector<4x4xbf16>, vector<4x288xbf16>, vector<4x288xf32> -> vector<4x288xf32>
    %218 = arith.addf %213, %217 : vector<4x288xf32>
    %c0_225 = arith.constant 0 : index
    %c111_226 = arith.constant 111 : index
    %219 = vector.load %arg8[%c0_225, %c111_226] : memref<4x512xbf16, #tpu.memory_space<vmem>>, vector<4x288xbf16>
    %c2_227 = arith.constant 2 : index
    %c0_228 = arith.constant 0 : index
    %c0_229 = arith.constant 0 : index
    %220 = vector.load %arg4[%c2_227, %c0_228, %c0_229] : memref<9x4x4xbf16, #tpu.memory_space<vmem>>, vector<1x4x4xbf16>
    %221 = vector.shape_cast %220 : vector<1x4x4xbf16> to vector<4x4xbf16>
    %cst_230 = arith.constant dense<0.000000e+00> : vector<4x288xf32>
    %222 = tpu.matmul %221, %219, %cst_230 {dimension_numbers = #tpu.dot_dimension_numbers<[1], [0], [0], [1], [0, 0, 1, 1], [], []>} : vector<4x4xbf16>, vector<4x288xbf16>, vector<4x288xf32> -> vector<4x288xf32>
    %223 = arith.addf %218, %222 : vector<4x288xf32>
    %c0_231 = arith.constant 0 : index
    %c127_232 = arith.constant 127 : index
    %224 = vector.load %arg8[%c0_231, %c127_232] : memref<4x512xbf16, #tpu.memory_space<vmem>>, vector<4x288xbf16>
    %c3_233 = arith.constant 3 : index
    %c0_234 = arith.constant 0 : index
    %c0_235 = arith.constant 0 : index
    %225 = vector.load %arg4[%c3_233, %c0_234, %c0_235] : memref<9x4x4xbf16, #tpu.memory_space<vmem>>, vector<1x4x4xbf16>
    %226 = vector.shape_cast %225 : vector<1x4x4xbf16> to vector<4x4xbf16>
    %cst_236 = arith.constant dense<0.000000e+00> : vector<4x288xf32>
    %227 = tpu.matmul %226, %224, %cst_236 {dimension_numbers = #tpu.dot_dimension_numbers<[1], [0], [0], [1], [0, 0, 1, 1], [], []>} : vector<4x4xbf16>, vector<4x288xbf16>, vector<4x288xf32> -> vector<4x288xf32>
    %228 = arith.addf %223, %227 : vector<4x288xf32>
    %c0_237 = arith.constant 0 : index
    %c128_238 = arith.constant 128 : index
    %229 = vector.load %arg8[%c0_237, %c128_238] : memref<4x512xbf16, #tpu.memory_space<vmem>>, vector<4x288xbf16>
    %c4_239 = arith.constant 4 : index
    %c0_240 = arith.constant 0 : index
    %c0_241 = arith.constant 0 : index
    %230 = vector.load %arg4[%c4_239, %c0_240, %c0_241] : memref<9x4x4xbf16, #tpu.memory_space<vmem>>, vector<1x4x4xbf16>
    %231 = vector.shape_cast %230 : vector<1x4x4xbf16> to vector<4x4xbf16>
    %cst_242 = arith.constant dense<0.000000e+00> : vector<4x288xf32>
    %232 = tpu.matmul %231, %229, %cst_242 {dimension_numbers = #tpu.dot_dimension_numbers<[1], [0], [0], [1], [0, 0, 1, 1], [], []>} : vector<4x4xbf16>, vector<4x288xbf16>, vector<4x288xf32> -> vector<4x288xf32>
    %233 = arith.addf %228, %232 : vector<4x288xf32>
    %c0_243 = arith.constant 0 : index
    %c129_244 = arith.constant 129 : index
    %234 = vector.load %arg8[%c0_243, %c129_244] : memref<4x512xbf16, #tpu.memory_space<vmem>>, vector<4x288xbf16>
    %c5_245 = arith.constant 5 : index
    %c0_246 = arith.constant 0 : index
    %c0_247 = arith.constant 0 : index
    %235 = vector.load %arg4[%c5_245, %c0_246, %c0_247] : memref<9x4x4xbf16, #tpu.memory_space<vmem>>, vector<1x4x4xbf16>
    %236 = vector.shape_cast %235 : vector<1x4x4xbf16> to vector<4x4xbf16>
    %cst_248 = arith.constant dense<0.000000e+00> : vector<4x288xf32>
    %237 = tpu.matmul %236, %234, %cst_248 {dimension_numbers = #tpu.dot_dimension_numbers<[1], [0], [0], [1], [0, 0, 1, 1], [], []>} : vector<4x4xbf16>, vector<4x288xbf16>, vector<4x288xf32> -> vector<4x288xf32>
    %238 = arith.addf %233, %237 : vector<4x288xf32>
    %c0_249 = arith.constant 0 : index
    %c145_250 = arith.constant 145 : index
    %239 = vector.load %arg8[%c0_249, %c145_250] : memref<4x512xbf16, #tpu.memory_space<vmem>>, vector<4x288xbf16>
    %c6_251 = arith.constant 6 : index
    %c0_252 = arith.constant 0 : index
    %c0_253 = arith.constant 0 : index
    %240 = vector.load %arg4[%c6_251, %c0_252, %c0_253] : memref<9x4x4xbf16, #tpu.memory_space<vmem>>, vector<1x4x4xbf16>
    %241 = vector.shape_cast %240 : vector<1x4x4xbf16> to vector<4x4xbf16>
    %cst_254 = arith.constant dense<0.000000e+00> : vector<4x288xf32>
    %242 = tpu.matmul %241, %239, %cst_254 {dimension_numbers = #tpu.dot_dimension_numbers<[1], [0], [0], [1], [0, 0, 1, 1], [], []>} : vector<4x4xbf16>, vector<4x288xbf16>, vector<4x288xf32> -> vector<4x288xf32>
    %243 = arith.addf %238, %242 : vector<4x288xf32>
    %c0_255 = arith.constant 0 : index
    %c146_256 = arith.constant 146 : index
    %244 = vector.load %arg8[%c0_255, %c146_256] : memref<4x512xbf16, #tpu.memory_space<vmem>>, vector<4x288xbf16>
    %c7_257 = arith.constant 7 : index
    %c0_258 = arith.constant 0 : index
    %c0_259 = arith.constant 0 : index
    %245 = vector.load %arg4[%c7_257, %c0_258, %c0_259] : memref<9x4x4xbf16, #tpu.memory_space<vmem>>, vector<1x4x4xbf16>
    %246 = vector.shape_cast %245 : vector<1x4x4xbf16> to vector<4x4xbf16>
    %cst_260 = arith.constant dense<0.000000e+00> : vector<4x288xf32>
    %247 = tpu.matmul %246, %244, %cst_260 {dimension_numbers = #tpu.dot_dimension_numbers<[1], [0], [0], [1], [0, 0, 1, 1], [], []>} : vector<4x4xbf16>, vector<4x288xbf16>, vector<4x288xf32> -> vector<4x288xf32>
    %248 = arith.addf %243, %247 : vector<4x288xf32>
    %c0_261 = arith.constant 0 : index
    %c147_262 = arith.constant 147 : index
    %249 = vector.load %arg8[%c0_261, %c147_262] : memref<4x512xbf16, #tpu.memory_space<vmem>>, vector<4x288xbf16>
    %c8_263 = arith.constant 8 : index
    %c0_264 = arith.constant 0 : index
    %c0_265 = arith.constant 0 : index
    %250 = vector.load %arg4[%c8_263, %c0_264, %c0_265] : memref<9x4x4xbf16, #tpu.memory_space<vmem>>, vector<1x4x4xbf16>
    %251 = vector.shape_cast %250 : vector<1x4x4xbf16> to vector<4x4xbf16>
    %cst_266 = arith.constant dense<0.000000e+00> : vector<4x288xf32>
    %252 = tpu.matmul %251, %249, %cst_266 {dimension_numbers = #tpu.dot_dimension_numbers<[1], [0], [0], [1], [0, 0, 1, 1], [], []>} : vector<4x4xbf16>, vector<4x288xbf16>, vector<4x288xf32> -> vector<4x288xf32>
    %253 = arith.addf %248, %252 : vector<4x288xf32>
    %c1_267 = arith.constant 1 : index
    %c0_268 = arith.constant 0 : index
    %c128_269 = arith.constant 128 : index
    %254 = vector.load %arg1[%c1_267, %c0_268, %c128_269] : memref<2x4x512xbf16, #tpu.memory_space<vmem>>, vector<1x4x288xbf16>
    %255 = vector.shape_cast %254 : vector<1x4x288xbf16> to vector<4x288xbf16>
    %256 = arith.extf %255 : vector<4x288xbf16> to vector<4x288xf32>
    %c0_270 = arith.constant 0 : index
    %c0_271 = arith.constant 0 : index
    %257 = vector.load %arg5[%c0_270, %c0_271] : memref<4x1xf32, #tpu.memory_space<vmem>>, vector<4x1xf32>
    %258 = vector.broadcast %257 : vector<4x1xf32> to vector<4x288xf32>
    %259 = arith.addf %253, %258 : vector<4x288xf32>
    %260 = arith.addf %259, %256 : vector<4x288xf32>
    %cst_272 = arith.constant 0.000000e+00 : f32
    %261 = vector.broadcast %cst_272 : f32 to vector<4x288xf32>
    %262 = arith.maximumf %260, %261 : vector<4x288xf32>
    %c0_273 = arith.constant 0 : index
    %c0_274 = arith.constant 0 : index
    %263 = vector.load %arg6[%c0_273, %c0_274] : memref<1x288xf32, #tpu.memory_space<vmem>>, vector<1x288xf32>
    %264 = vector.broadcast %263 : vector<1x288xf32> to vector<4x288xf32>
    %265 = arith.mulf %262, %264 : vector<4x288xf32>
    %266 = arith.truncf %265 : vector<4x288xf32> to vector<4x288xbf16>
    %c1_275 = arith.constant 1 : index
    %c0_276 = arith.constant 0 : index
    %c128_277 = arith.constant 128 : index
    %267 = vector.load %arg7[%c1_275, %c0_276, %c128_277] : memref<2x4x512xbf16, #tpu.memory_space<vmem>>, vector<1x4x288xbf16>
    %268 = vector.shape_cast %267 : vector<1x4x288xbf16> to vector<4x288xbf16>
    %269 = vector.shape_cast %266 : vector<4x288xbf16> to vector<1x4x288xbf16>
    tpu.vector_store %arg7[%c1_275, %c0_276, %c128_277], %269 {strides = array<i32>} : memref<2x4x512xbf16, #tpu.memory_space<vmem>>, vector<1x4x288xbf16>,
    return
  }
  func.func @transform_0(%arg0: i32) -> (i32, i32, i32) {
    %c0_i32 = arith.constant 0 : i32
    %c0_i32_0 = arith.constant 0 : i32
    %c0_i32_1 = arith.constant 0 : i32
    return %arg0, %c0_i32, %c0_i32_0 : i32, i32, i32
  }
  func.func @transform_1(%arg0: i32) -> (i32, i32, i32) {
    %c0_i32 = arith.constant 0 : i32
    %c0_i32_0 = arith.constant 0 : i32
    %c0_i32_1 = arith.constant 0 : i32
    %c0_i32_2 = arith.constant 0 : i32
    return %c0_i32, %c0_i32_0, %c0_i32_1 : i32, i32, i32
  }
  func.func @transform_2(%arg0: i32) -> (i32, i32) {
    %c0_i32 = arith.constant 0 : i32
    %c0_i32_0 = arith.constant 0 : i32
    %c0_i32_1 = arith.constant 0 : i32
    return %c0_i32, %c0_i32_0 : i32, i32
  }
  func.func @transform_3(%arg0: i32) -> (i32, i32, i32) {
    %c0_i32 = arith.constant 0 : i32
    %c0_i32_0 = arith.constant 0 : i32
    %c0_i32_1 = arith.constant 0 : i32
    %c0_i32_2 = arith.constant 0 : i32
    return %c0_i32, %c0_i32_0, %c0_i32_1 : i32, i32, i32
  }
  func.func @transform_4(%arg0: i32) -> (i32, i32) {
    %c0_i32 = arith.constant 0 : i32
    %c0_i32_0 = arith.constant 0 : i32
    %c0_i32_1 = arith.constant 0 : i32
    return %c0_i32, %c0_i32_0 : i32, i32
  }
  func.func @transform_5(%arg0: i32) -> (i32, i32) {
    %c0_i32 = arith.constant 0 : i32
    %c0_i32_0 = arith.constant 0 : i32
    %c0_i32_1 = arith.constant 0 : i32
    return %c0_i32, %c0_i32_0 : i32, i32
  }
  func.func @transform_6(%arg0: i32) -> (i32, i32, i32) {
    %c0_i32 = arith.constant 0 : i32
    %c0_i32_0 = arith.constant 0 : i32
    %c0_i32_1 = arith.constant 0 : i32
    return %arg0, %c0_i32, %c0_i32_0 : i32, i32, i32
  }
}

</mosaic_0001>

<bundles_post_ra>
// kernel: tpu_custom_call.1
= control target key start
LH: loop header
LB: loop body
LE: loop exit
PB: predicated region body
PF: predicated region fallthrough
CT: control target
= control target key end

     0   :  { %v39_v1 = vlaneseq  ;;  %v5189_v2 = vmov 1983009808   ;;  %v5190_v7 = vmov 0.0   ;;  %v5191_v9 = vmov 0   ;;  %s6064_s0 = inlined_call_operand.vmem [shape: bf16[2,4,512], index: 0, kind: input, shape index: {}]   ;;  %s6065_s1 = inlined_call_operand.vmem [shape: bf16[9,4,4], index: 1, kind: input, shape index: {}]   ;;  %s6066_s2 = inlined_call_operand.vmem [shape: f32[4,1], index: 2, kind: input, shape index: {}]   ;;  %s6067_s3 = inlined_call_operand.vmem [shape: bf16[9,4,4], index: 3, kind: input, shape index: {}]   ;;  %s6068_s4 = inlined_call_operand.vmem [shape: f32[4,1], index: 4, kind: input, shape index: {}]   ;;  %s6069_s5 = inlined_call_operand.vmem [shape: f32[1,288], index: 5, kind: input, shape index: {}]   ;;  %s6070_s6 = inlined_call_operand.hbm [shape: bf16[2,4,512], index: 6, kind: output, shape index: {}]  }
   0x1   :  { %v30_v0 = vld [vmem:[%s6064_s0] sm:$0xff]  ;;  %v37_v3 = vunpack.c.l.s4 %v5189_v2  ;;  %4909 = vmatprep.subr.bf16.mxu1 %v5190_v7  ;;  %110 = vmatprep.mubr.bf16.mxu0 %v5191_v9  ;;  %25 = vst [vmem:[#allocation2] sm:$0x3] %v5191_v9  ;;  %28 = vst [vmem:[#allocation3] sm:$0x3] %v5191_v9  ;;  %vm5192_vm0 = vmmov 0  }
   0x2   :  { %v5242_v4 = vshrl.u32 %v39_v1, 7  ;;  %v35_v6 = vcombine.high %v30_v0, %v30_v0  ;;  %2364 = vst [vmem:[#allocation3 + $0x8] sm:$0x3] %v5191_v9  ;;  %4911 = vmatprep.mubr.msk.bf16.mxu1 %vm5192_vm0, %v5190_v7 }
   0x3   :  { %v38_v5 = vunpack.c.0.s8 %v37_v3 }
   0x5   :  { %v5246_v8 = vsub.s32 %v38_v5, %v5242_v4 }
   0x6   :  { %11 = vsyncpa [#allocation4], 0  ;;  %5140 = vset.pattern.permute.xlu0 %v5191_v9  ;;  %5141 = vset.pattern.permute.xlu1 %v5191_v9  ;;  %s5193_s23 = smov 18   ;;  %s5194_s24 = smov 19   ;;  %v638_v14 = vld [vmem:[%s6064_s0 + $0x2] sm:$0x3f] }
   0x7   :  { %v42_v10 = vrot.slane %v30_v0, %v5246_v8  ;;  %v49_v11 = vrot.slane %v35_v6, %v5246_v8  ;;  %s5195_s25 = smov 17   ;;  %s5196_s28 = smov 1   ;;  %v649_v15 = vrot.slane %v638_v14, %v5246_v8  ;;  %v642_v16 = vcombine.high %v638_v14, %v638_v14  ;;  %v763_v18 = vld [vmem:[%s6064_s0 + $0x2] sm:$0x3f]  ;;  %v31_v54 = vld [vmem:[%s6065_s1] sm:$0x3] }
   0x8   :  { %s5197_s7 = smov 127   ;;  %v774_v20 = vrot.slane %v763_v18, %v5246_v8  ;;  %v767_v21 = vcombine.high %v763_v18, %v763_v18  ;;  %v888_v22 = vld [vmem:[%s6064_s0 + $0x2] sm:$0x3f]  ;;  %s5198_s10 = smov 111   ;;  %vm60_vm1 = vcmask 146432   ;;  %vm68_vm2 = vcmask 1041408  }
   0x9   :  { %52 = vrot.lane.b32.xlu0 %v42_v10, %s5193_s23  ;;  %56 = vrot.lane.b32.xlu1 %v49_v11, %s5193_s23  ;;  %v50_v12 = vcombine.high %v42_v10, %v42_v10  ;;  %v51_v13 = vcombine.high %v49_v11, %v49_v11  ;;  %v657_v17 = vcombine.high %v649_v15, %v649_v15  ;;  %v1013_v28 = vld [vmem:[%s6064_s0 + $0x2] sm:$0x3f]  ;;  %s5199_s13 = smov 110   ;;  %s5200_s14 = smov 109   ;;  %vm64_vm3 = vcmask 31744  }
   0xa   :  { %v656_v19 = vrot.slane %v642_v16, %v5246_v8  ;;  %v782_v23 = vcombine.high %v774_v20, %v774_v20  ;;  %v781_v24 = vrot.slane %v767_v21, %v5246_v8  ;;  %v899_v25 = vrot.slane %v888_v22, %v5246_v8  ;;  %v1138_v34 = vld [vmem:[%s6066_s2] sm:$0xf]  ;;  %v4691_v1 = vld [vmem:[%s6065_s1 + $0x4] sm:$0x3] }
   0xb   :  { %v892_v26 = vcombine.high %v888_v22, %v888_v22  ;;  %v1024_v30 = vrot.slane %v1013_v28, %v5246_v8  ;;  %v1017_v31 = vcombine.high %v1013_v28, %v1013_v28  ;;  %v4684_v44 = vld [vmem:[%s6065_s1 + $0x2] sm:$0x3]  ;;  %vm167_vm4 = vcmask 154624   ;;  %v4699_v28 = vld [vmem:[%s6065_s1 + $0x8] sm:$0x3] }
   0xc   :  { %v907_v27 = vcombine.high %v899_v25, %v899_v25  ;;  %vm293_vm5 = vcmask 138240   ;;  %v522_v62 = vld [vmem:[%s6064_s0 + $0x2] sm:$0x3f]  ;;  %vm422_vm6 = vcmask 7168   ;;  %vm664_vm7 = vcmask 1039360  }
   0xd   :  { %54 = vrot.lane.b32.xlu0 %v50_v12, %s5193_s23  ;;  %58 = vrot.lane.b32.xlu1 %v51_v13, %s5193_s23  ;;  %v906_v29 = vrot.slane %v892_v26, %v5246_v8  ;;  %v1032_v32 = vcombine.high %v1024_v30, %v1024_v30  ;;  %v1031_v33 = vrot.slane %v1017_v31, %v5246_v8  ;;  %vm789_vm8 = vcmask 908288  }
   0xe   :  { %v533_v5 = vrot.slane %v522_v62, %v5246_v8  ;;  %v526_v6 = vcombine.high %v522_v62, %v522_v62  ;;  %vm914_vm9 = vcmask 900096   ;;  %vm1039_vm10 = vcmask 891904  }
   0xf   :  { %vm26_vm11 = vcmask 1041664   ;;  %vm1193_vm12 = vcmask 1043458   ;;  %vm1195_vm14 = vcmask 259076  }
  0x10   :  { %v540_v14 = vrot.slane %v526_v6, %v5246_v8  ;;  %v546_v21 = vsel %vm68_vm2, %v533_v5, 0  ;;  %27 = vst.msk [vmem:[#allocation2 + $0x6] sm:$0x3] %vm26_vm11, %v5191_v9  ;;  %29 = vst.msk [vmem:[#allocation3 + $0x6] sm:$0x3] %vm26_vm11, %v5191_v9 }
  0x11   :  { %159 = vrot.lane.b32.xlu0 %v42_v10, %s5194_s24  ;;  %161 = vrot.lane.b32.xlu1 %v50_v12, %s5194_s24  ;;  %2365 = vst.msk [vmem:[#allocation3 + $0xe] sm:$0x3] %vm26_vm11, %v5191_v9  ;;  %vm1194_vm13 = vmor %vm1193_vm12, %vm68_vm2 }
  0x12   :  { %v552_v22 = vsel %vm68_vm2, %v540_v14, 0  ;;  %vm5466_vm15 = vmor %vm1195_vm14, %vm1194_vm13 }
  0x15   :  { %163 = vrot.lane.b32.xlu0 %v49_v11, %s5194_s24  ;;  %165 = vrot.lane.b32.xlu1 %v51_v13, %s5194_s24 }
  0x19   :  { %285 = vrot.lane.b32.xlu0 %v42_v10, %s5195_s25  ;;  %287 = vrot.lane.b32.xlu1 %v50_v12, %s5195_s25 }
  0x1d   :  { %289 = vrot.lane.b32.xlu0 %v49_v11, %s5195_s25  ;;  %291 = vrot.lane.b32.xlu1 %v51_v13, %s5195_s25 }
  0x21   :  { %414 = vrot.lane.b32.xlu0 %v42_v10, %s5196_s28  ;;  %416 = vrot.lane.b32.xlu1 %v50_v12, %s5196_s28 }
  0x25   :  { %418 = vrot.lane.b32.xlu0 %v49_v11, %s5196_s28  ;;  %420 = vrot.lane.b32.xlu1 %v51_v13, %s5196_s28  ;;  %v541_v13 = vcombine.high %v533_v5, %v533_v5 }
  0x29   :  { %658 = vrot.lane.b32.xlu0 %v649_v15, %s5197_s7  ;;  %660 = vrot.lane.b32.xlu1 %v657_v17, %s5197_s7 }
  0x2d   :  { %662 = vrot.lane.b32.xlu0 %v656_v19, %s5197_s7  ;;  %783 = vrot.lane.b32.xlu1 %v774_v20, %s5198_s10  ;;  %v4695_v19 = vld [vmem:[%s6065_s1 + $0x6] sm:$0x3] }
  0x31   :  { %785 = vrot.lane.b32.xlu0 %v782_v23, %s5198_s10  ;;  %787 = vrot.lane.b32.xlu1 %v781_v24, %s5198_s10 }
  0x35   :  { %908 = vrot.lane.b32.xlu0 %v899_v25, %s5199_s13  ;;  %910 = vrot.lane.b32.xlu1 %v907_v27, %s5199_s13 }
  0x39   :  { %912 = vrot.lane.b32.xlu0 %v906_v29, %s5199_s13  ;;  %1033 = vrot.lane.b32.xlu1 %v1024_v30, %s5200_s14 }
  0x3d   :  { %1035 = vrot.lane.b32.xlu0 %v1032_v32, %s5200_s14  ;;  %1037 = vrot.lane.b32.xlu1 %v1031_v33, %s5200_s14 }
  0x41   :  { %1141 = vperm.xlu0 %5140, %v1138_v34  }
  0x7b   :  { %v53_v35 = vpop.permute.xlu0 %52  ;;  %v57_v36 = vpop.permute.xlu1 %56 }
  0x7f   :  { %v55_v37 = vpop.permute.xlu0 %54  ;;  %v59_v38 = vpop.permute.xlu1 %58 }
  0x80   :  { %v62_v39 = vsel %vm60_vm1, %v55_v37, %v57_v36  ;;  %v61_v40 = vsel %vm60_vm1, %v53_v35, %v55_v37  ;;  %v63_v41 = vsel %vm60_vm1, %v57_v36, %v59_v38  ;;  %v4703_v37 = vld [vmem:[%s6065_s1 + $0xa] sm:$0x3] }
  0x81   :  { %4685 = vmatprep.subr.msk.bf16.mxu0 %vm68_vm2, %v62_v39  ;;  %v70_v42 = vsel %vm68_vm2, %v61_v40, 0  ;;  %v76_v43 = vsel %vm68_vm2, %v63_v41, 0 }
  0x82   :  { %79 = vmatpush1.bf16.msra.mxu0 %v70_v42  ;;  %4910 = vmatpush3.bf16.msra.mxu1 %v76_v43 }
  0x83   :  { %v160_v45 = vpop.permute.xlu0 %159  ;;  %v162_v46 = vpop.permute.xlu1 %161  ;;  %4915 = vmatprep.subr.bf16.mxu1 %v5190_v7 }
  0x84   :  { %v168_v47 = vsel %vm167_vm4, %v160_v45, %v162_v46 }
  0x85   :  { %4686 = vmatmul.mubr.msk.bf16.vlgmr.msra.gmra.mrb[0].mxu0 %vm64_vm3, %v4684_v44  ;;  %4912 = vmatmul.mubr.msk.bf16.vlgmr.msra.gmra.mrb[0].mxu1 %vm64_vm3, %v4684_v44  ;;  %v175_v53 = vsel %vm68_vm2, %v168_v47, 0  ;;  %v4707_v44 = vld [vmem:[%s6065_s1 + $0xc] sm:$0x3] }
  0x86   :  { %215 = vmatprep.mubr.bf16.mxu0 %v5191_v9  ;;  %4917 = vmatprep.mubr.msk.bf16.mxu1 %vm5192_vm0, %v5190_v7 }
  0x87   :  { %v164_v48 = vpop.permute.xlu0 %163  ;;  %v166_v49 = vpop.permute.xlu1 %165 }
  0x88   :  { %v170_v50 = vsel %vm167_vm4, %v164_v48, %v166_v49  ;;  %v169_v51 = vsel %vm167_vm4, %v162_v46, %v164_v48 }
  0x89   :  { %v181_v52 = vsel %vm68_vm2, %v170_v50, 0  ;;  %4688 = vmatprep.subr.msk.bf16.mxu0 %vm68_vm2, %v169_v51  ;;  %v4711_v51 = vld [vmem:[%s6065_s1 + $0xe] sm:$0x3] }
  0x8a   :  { %184 = vmatpush1.bf16.msra.mxu0 %v175_v53  ;;  %4916 = vmatpush3.bf16.msra.mxu1 %v181_v52 }
  0x8b   :  { %v286_v55 = vpop.permute.xlu0 %285  ;;  %v288_v56 = vpop.permute.xlu1 %287  ;;  %4921 = vmatprep.subr.bf16.mxu1 %v5190_v7 }
  0x8c   :  { %v294_v57 = vsel %vm293_vm5, %v286_v55, %v288_v56 }
  0x8d   :  { %4689 = vmatmul.mubr.msk.bf16.vlgmr.msra.gmra.mrb[4].mxu0 %vm64_vm3, %v31_v54  ;;  %4918 = vmatmul.mubr.msk.bf16.vlgmr.msra.gmra.mrb[4].mxu1 %vm64_vm3, %v31_v54  ;;  %v301_v0 = vsel %vm68_vm2, %v294_v57, 0  ;;  %v4715_v54 = vld [vmem:[%s6065_s1 + $0x10] sm:$0x3] }
  0x8e   :  { %341 = vmatprep.mubr.bf16.mxu0 %v5191_v9  ;;  %4923 = vmatprep.mubr.msk.bf16.mxu1 %vm5192_vm0, %v5190_v7 }
  0x8f   :  { %v290_v58 = vpop.permute.xlu0 %289  ;;  %v292_v59 = vpop.permute.xlu1 %291 }
  0x90   :  { %v296_v60 = vsel %vm293_vm5, %v290_v58, %v292_v59  ;;  %v295_v61 = vsel %vm293_vm5, %v288_v56, %v290_v58 }
  0x91   :  { %v307_v63 = vsel %vm68_vm2, %v296_v60, 0  ;;  %4692 = vmatprep.subr.msk.bf16.mxu0 %vm68_vm2, %v295_v61 }
  0x92   :  { %310 = vmatpush1.bf16.msra.mxu0 %v301_v0  ;;  %4922 = vmatpush3.bf16.msra.mxu1 %v307_v63 }
  0x93   :  { %v415_v2 = vpop.permute.xlu0 %414  ;;  %v417_v3 = vpop.permute.xlu1 %416  ;;  %4927 = vmatprep.subr.bf16.mxu1 %v5190_v7 }
  0x94   :  { %v423_v10 = vsel %vm422_vm6, %v415_v2, %v417_v3 }
  0x95   :  { %4693 = vmatmul.mubr.msk.bf16.vlgmr.msra.gmra.mrb[8].mxu0 %vm64_vm3, %v4691_v1  ;;  %4924 = vmatmul.mubr.msk.bf16.vlgmr.msra.gmra.mrb[8].mxu1 %vm64_vm3, %v4691_v1  ;;  %v430_v18 = vsel %vm68_vm2, %v423_v10, 0 }
  0x96   :  { %470 = vmatprep.mubr.bf16.mxu0 %v5191_v9  ;;  %4929 = vmatprep.mubr.msk.bf16.mxu1 %vm5192_vm0, %v5190_v7 }
  0x97   :  { %v419_v11 = vpop.permute.xlu0 %418  ;;  %v421_v12 = vpop.permute.xlu1 %420 }
  0x98   :  { %v425_v15 = vsel %vm422_vm6, %v419_v11, %v421_v12  ;;  %v424_v16 = vsel %vm422_vm6, %v417_v3, %v419_v11 }
  0x99   :  { %v436_v17 = vsel %vm68_vm2, %v425_v15, 0  ;;  %4696 = vmatprep.subr.msk.bf16.mxu0 %vm68_vm2, %v424_v16 }
  0x9a   :  { %439 = vmatpush1.bf16.msra.mxu0 %v430_v18  ;;  %4928 = vmatpush3.bf16.msra.mxu1 %v436_v17 }
  0x9b   :  { %v659_v20 = vpop.permute.xlu0 %658  ;;  %4700 = vmatprep.subr.msk.bf16.mxu0 %vm68_vm2, %v541_v13  ;;  %4933 = vmatprep.subr.bf16.mxu1 %v5190_v7  ;;  %v661_v23 = vpop.permute.xlu1 %660 }
  0x9c   :  { %v665_v26 = vsel %vm664_vm7, %v659_v20, %v661_v23 }
  0x9d   :  { %4697 = vmatmul.mubr.msk.bf16.vlgmr.msra.gmra.mrb[12].mxu0 %vm64_vm3, %v4695_v19  ;;  %4930 = vmatmul.mubr.msk.bf16.vlgmr.msra.gmra.mrb[12].mxu1 %vm64_vm3, %v4695_v19  ;;  %v671_v30 = vsel %vm68_vm2, %v665_v26, 0 }
  0x9e   :  { %555 = vmatpush1.bf16.msra.mxu0 %v546_v21  ;;  %4934 = vmatpush3.bf16.msra.mxu1 %v552_v22 }
  0x9f   :  { %v663_v24 = vpop.permute.xlu0 %662  ;;  %586 = vmatprep.mubr.bf16.mxu0 %v5191_v9  ;;  %4935 = vmatprep.mubr.msk.bf16.mxu1 %vm5192_vm0, %v5190_v7  ;;  %v784_v25 = vpop.permute.xlu1 %783 }
  0xa0   :  { %v666_v27 = vsel %vm664_vm7, %v661_v23, %v663_v24  ;;  %4939 = vmatprep.subr.bf16.mxu1 %v5190_v7  ;;  %v677_v29 = vsel %vm68_vm2, %v663_v24, 0 }
  0xa1   :  { %4704 = vmatprep.subr.msk.bf16.mxu0 %vm68_vm2, %v666_v27 }
  0xa3   :  { %v786_v31 = vpop.permute.xlu0 %785  ;;  %v788_v32 = vpop.permute.xlu1 %787 }
  0xa4   :  { %v791_v33 = vsel %vm789_vm8, %v786_v31, %v788_v32  ;;  %v790_v36 = vsel %vm789_vm8, %v784_v25, %v786_v31  ;;  %v802_v39 = vsel %vm68_vm2, %v788_v32, 0 }
  0xa5   :  { %4701 = vmatmul.mubr.msk.bf16.vlgmr.msra.gmra.mrb[16].mxu0 %vm64_vm3, %v4699_v28  ;;  %4936 = vmatmul.mubr.msk.bf16.vlgmr.msra.gmra.mrb[16].mxu1 %vm64_vm3, %v4699_v28  ;;  %v796_v38 = vsel %vm68_vm2, %v790_v36, 0 }
  0xa6   :  { %680 = vmatpush1.bf16.msra.mxu0 %v671_v30  ;;  %4940 = vmatpush3.bf16.msra.mxu1 %v677_v29 }
  0xa7   :  { %711 = vmatprep.mubr.bf16.mxu0 %v5191_v9  ;;  %4941 = vmatprep.mubr.msk.bf16.mxu1 %vm5192_vm0, %v5190_v7  ;;  %v909_v34 = vpop.permute.xlu0 %908  ;;  %v911_v35 = vpop.permute.xlu1 %910 }
  0xa8   :  { %4708 = vmatprep.subr.msk.bf16.mxu0 %vm68_vm2, %v791_v33  ;;  %4945 = vmatprep.subr.bf16.mxu1 %v5190_v7  ;;  %v915_v43 = vsel %vm914_vm9, %v909_v34, %v911_v35 }
  0xa9   :  { %v921_v48 = vsel %vm68_vm2, %v915_v43, 0 }
  0xab   :  { %v913_v40 = vpop.permute.xlu0 %912  ;;  %v1034_v41 = vpop.permute.xlu1 %1033 }
  0xac   :  { %v916_v42 = vsel %vm914_vm9, %v911_v35, %v913_v40  ;;  %v927_v47 = vsel %vm68_vm2, %v913_v40, 0 }
  0xad   :  { %4705 = vmatmul.mubr.msk.bf16.vlgmr.msra.gmra.mrb[20].mxu0 %vm64_vm3, %v4703_v37  ;;  %4942 = vmatmul.mubr.msk.bf16.vlgmr.msra.gmra.mrb[20].mxu1 %vm64_vm3, %v4703_v37 }
  0xae   :  { %805 = vmatpush1.bf16.msra.mxu0 %v796_v38  ;;  %4946 = vmatpush3.bf16.msra.mxu1 %v802_v39 }
  0xaf   :  { %836 = vmatprep.mubr.bf16.mxu0 %v5191_v9  ;;  %4947 = vmatprep.mubr.msk.bf16.mxu1 %vm5192_vm0, %v5190_v7  ;;  %v1036_v45 = vpop.permute.xlu0 %1035  ;;  %v1038_v46 = vpop.permute.xlu1 %1037 }
  0xb0   :  { %4712 = vmatprep.subr.msk.bf16.mxu0 %vm68_vm2, %v916_v42  ;;  %4951 = vmatprep.subr.bf16.mxu1 %v5190_v7  ;;  %v1041_v49 = vsel %vm1039_vm10, %v1036_v45, %v1038_v46  ;;  %v1040_v50 = vsel %vm1039_vm10, %v1034_v41, %v1036_v45  ;;  %v1052_v53 = vsel %vm68_vm2, %v1038_v46, 0 }
  0xb1   :  { %v1046_v52 = vsel %vm68_vm2, %v1040_v50, 0 }
  0xb5   :  { %4709 = vmatmul.mubr.msk.bf16.vlgmr.msra.gmra.mrb[24].mxu0 %vm64_vm3, %v4707_v44  ;;  %4948 = vmatmul.mubr.msk.bf16.vlgmr.msra.gmra.mrb[24].mxu1 %vm64_vm3, %v4707_v44 }
  0xb6   :  { %930 = vmatpush1.bf16.msra.mxu0 %v921_v48  ;;  %4952 = vmatpush3.bf16.msra.mxu1 %v927_v47 }
  0xb7   :  { %961 = vmatprep.mubr.bf16.mxu0 %v5191_v9  ;;  %4953 = vmatprep.mubr.msk.bf16.mxu1 %vm5192_vm0, %v5190_v7 }
  0xb8   :  { %4716 = vmatprep.subr.msk.bf16.mxu0 %vm68_vm2, %v1041_v49  ;;  %4957 = vmatprep.subr.bf16.mxu1 %v5190_v7 }
  0xbd   :  { %4713 = vmatmul.mubr.msk.bf16.vlgmr.msra.gmra.mrb[28].mxu0 %vm64_vm3, %v4711_v51  ;;  %4954 = vmatmul.mubr.msk.bf16.vlgmr.msra.gmra.mrb[28].mxu1 %vm64_vm3, %v4711_v51 }
  0xbe   :  { %1055 = vmatpush1.bf16.msra.mxu0 %v1046_v52  ;;  %4958 = vmatpush3.bf16.msra.mxu1 %v1052_v53 }
  0xbf   :  { %1086 = vmatprep.mubr.bf16.mxu0 %v5191_v9  ;;  %4959 = vmatprep.mubr.msk.bf16.mxu1 %vm5192_vm0, %v5190_v7 }
  0xc0   :  { %4963 = vmatprep.subr.bf16.mxu1 %v5190_v7 }
  0xc5   :  { %4717 = vmatmul.mubr.msk.bf16.vlgmr.msra.gmra.mrb[32].mxu0 %vm64_vm3, %v4715_v54  ;;  %4960 = vmatmul.mubr.msk.bf16.vlgmr.msra.gmra.mrb[32].mxu1 %vm64_vm3, %v4715_v54 }
  0xc6   :  { %1275 = vmatprep.mubr.bf16.mxu0 %v5191_v9  ;;  %4965 = vmatprep.mubr.msk.bf16.mxu1 %vm5192_vm0, %v5190_v7 }
 0x158   :  { %v112_v55 = vpop.f32.mrb[0].mxu0  ;;  %v153_v56 = vpop.f32.mrb[0].mxu1 }
 0x159   :  { %v114_v57 = vpop.f32.mrb[1].mxu0  ;;  %v4913_v58 = vpop.f32.mrb[1].mxu1 }
 0x15a   :  { %v116_v59 = vpop.f32.mrb[2].mxu0  ;;  %v156_v60 = vpop.f32.mrb[2].mxu1 }
 0x15b   :  { %v117_v61 = vpop.f32.mrb[3].mxu0  ;;  %v4914_v62 = vpop.f32.mrb[3].mxu1 }
 0x160   :  { %v217_v63 = vpop.f32.mrb[4].mxu0  ;;  %v258_v0 = vpop.f32.mrb[4].mxu1 }
 0x161   :  { %v218_v1 = vadd.f32 %v217_v63, %v112_v55  ;;  %v259_v2 = vadd.f32 %v258_v0, %v153_v56  ;;  %v219_v3 = vpop.f32.mrb[5].mxu0  ;;  %v4919_v5 = vpop.f32.mrb[5].mxu1 }
 0x162   :  { %v220_v6 = vadd.f32 %v219_v3, %v114_v57  ;;  %v221_v10 = vpop.f32.mrb[6].mxu0  ;;  %v261_v11 = vpop.f32.mrb[6].mxu1 }
 0x163   :  { %v222_v12 = vpop.f32.mrb[7].mxu0  ;;  %v4920_v13 = vpop.f32.mrb[7].mxu1 }
 0x168   :  { %v343_v14 = vpop.f32.mrb[8].mxu0  ;;  %v384_v15 = vpop.f32.mrb[8].mxu1 }
 0x169   :  { %v390_v16 = vadd.f32 %v343_v14, %v218_v1  ;;  %v392_v17 = vadd.f32 %v384_v15, %v259_v2  ;;  %v345_v18 = vpop.f32.mrb[9].mxu0  ;;  %v4925_v19 = vpop.f32.mrb[9].mxu1 }
 0x16a   :  { %v391_v20 = vadd.f32 %v345_v18, %v220_v6  ;;  %v347_v21 = vpop.f32.mrb[10].mxu0  ;;  %v387_v22 = vpop.f32.mrb[10].mxu1 }
 0x16b   :  { %v348_v23 = vpop.f32.mrb[11].mxu0  ;;  %v4926_v24 = vpop.f32.mrb[11].mxu1  ;;  %v5452_v21 = vsub.s32 2, %v5242_v4 }
 0x16c   :  { %v1142_v22 = vpop.permute.xlu0 %1141 }
 0x170   :  { %v472_v25 = vpop.f32.mrb[12].mxu0  ;;  %v513_v26 = vpop.f32.mrb[12].mxu1 }
 0x171   :  { %v519_v27 = vadd.f32 %v472_v25, %v390_v16  ;;  %v521_v28 = vadd.f32 %v513_v26, %v392_v17  ;;  %v474_v29 = vpop.f32.mrb[13].mxu0  ;;  %v4931_v30 = vpop.f32.mrb[13].mxu1  ;;  %v1150_v25 = vld [vmem:[%s6069_s5] sm:$0x7]  ;;  %v5458_v26 = vsub.s32 1, %v5242_v4 }
 0x172   :  { %v520_v31 = vadd.f32 %v474_v29, %v391_v20  ;;  %v476_v32 = vpop.f32.mrb[14].mxu0  ;;  %v516_v33 = vpop.f32.mrb[14].mxu1  ;;  %v5449_v20 = vsub.s32 0, %v5242_v4 }
 0x173   :  { %v477_v34 = vpop.f32.mrb[15].mxu0  ;;  %v4932_v35 = vpop.f32.mrb[15].mxu1 }
 0x174   :  { %v1155_v34 = vrot.slane %v1150_v25, %v5449_v20  ;;  %v1163_v35 = vrot.slane %v1150_v25, %v5452_v21 }
 0x178   :  { %v588_v36 = vpop.f32.mrb[16].mxu0  ;;  %v629_v37 = vpop.f32.mrb[16].mxu1 }
 0x179   :  { %v635_v38 = vadd.f32 %v588_v36, %v519_v27  ;;  %v637_v39 = vadd.f32 %v629_v37, %v521_v28  ;;  %v590_v40 = vpop.f32.mrb[17].mxu0  ;;  %v4937_v41 = vpop.f32.mrb[17].mxu1 }
 0x17a   :  { %v636_v42 = vadd.f32 %v590_v40, %v520_v31  ;;  %v592_v43 = vpop.f32.mrb[18].mxu0  ;;  %v632_v44 = vpop.f32.mrb[18].mxu1  ;;  %v1159_v40 = vrot.slane %v1150_v25, %v5458_v26 }
 0x17b   :  { %v593_v45 = vpop.f32.mrb[19].mxu0  ;;  %v4938_v46 = vpop.f32.mrb[19].mxu1 }
 0x180   :  { %v713_v47 = vpop.f32.mrb[20].mxu0  ;;  %v754_v48 = vpop.f32.mrb[20].mxu1 }
 0x181   :  { %v760_v49 = vadd.f32 %v713_v47, %v635_v38  ;;  %v762_v50 = vadd.f32 %v754_v48, %v637_v39  ;;  %v715_v51 = vpop.f32.mrb[21].mxu0  ;;  %v4943_v52 = vpop.f32.mrb[21].mxu1 }
 0x182   :  { %v761_v53 = vadd.f32 %v715_v51, %v636_v42  ;;  %v717_v54 = vpop.f32.mrb[22].mxu0  ;;  %v757_v55 = vpop.f32.mrb[22].mxu1 }
 0x183   :  { %v718_v56 = vpop.f32.mrb[23].mxu0  ;;  %v4944_v57 = vpop.f32.mrb[23].mxu1 }
 0x188   :  { %v838_v58 = vpop.f32.mrb[24].mxu0  ;;  %v879_v59 = vpop.f32.mrb[24].mxu1 }
 0x189   :  { %v885_v60 = vadd.f32 %v838_v58, %v760_v49  ;;  %v887_v61 = vadd.f32 %v879_v59, %v762_v50  ;;  %v840_v62 = vpop.f32.mrb[25].mxu0  ;;  %v4949_v63 = vpop.f32.mrb[25].mxu1 }
 0x18a   :  { %v886_v0 = vadd.f32 %v840_v62, %v761_v53  ;;  %v842_v1 = vpop.f32.mrb[26].mxu0  ;;  %v882_v2 = vpop.f32.mrb[26].mxu1 }
 0x18b   :  { %v843_v3 = vpop.f32.mrb[27].mxu0  ;;  %v4950_v5 = vpop.f32.mrb[27].mxu1 }
 0x190   :  { %v963_v6 = vpop.f32.mrb[28].mxu0  ;;  %v1004_v10 = vpop.f32.mrb[28].mxu1 }
 0x191   :  { %v1010_v11 = vadd.f32 %v963_v6, %v885_v60  ;;  %v1012_v12 = vadd.f32 %v1004_v10, %v887_v61  ;;  %v965_v13 = vpop.f32.mrb[29].mxu0  ;;  %v4955_v14 = vpop.f32.mrb[29].mxu1 }
 0x192   :  { %v1011_v15 = vadd.f32 %v965_v13, %v886_v0  ;;  %v967_v16 = vpop.f32.mrb[30].mxu0  ;;  %v1007_v17 = vpop.f32.mrb[30].mxu1 }
 0x193   :  { %v968_v18 = vpop.f32.mrb[31].mxu0  ;;  %v4956_v19 = vpop.f32.mrb[31].mxu1  ;;  %v4756_v17 = vld [vmem:[%s6064_s0 + $0x8] sm:$0xff] }
 0x194   :  { %v2378_v19 = vrot.slane %v4756_v17, %v5246_v8 }
 0x198   :  { %v1088_v23 = vpop.f32.mrb[32].mxu0  ;;  %v1129_v24 = vpop.f32.mrb[32].mxu1 }
 0x199   :  { %v1135_v27 = vadd.f32 %v1088_v23, %v1010_v11  ;;  %v1137_v28 = vadd.f32 %v1129_v24, %v1012_v12  ;;  %v1090_v29 = vpop.f32.mrb[33].mxu0  ;;  %v4961_v30 = vpop.f32.mrb[33].mxu1  ;;  %v2371_v23 = vcombine.high %v4756_v17, %v4756_v17 }
 0x19a   :  { %v1136_v31 = vadd.f32 %v1090_v29, %v1011_v15  ;;  %v1132_v32 = vpop.f32.mrb[34].mxu1  ;;  %v1092_v33 = vpop.f32.mrb[34].mxu0  ;;  %v4779_v29 = vld [vmem:[%s6064_s0 + $0xa] sm:$0x3f] }
 0x19b   :  { %v1144_v36 = vadd.f32 %v1142_v22, %v1135_v27  ;;  %v1146_v37 = vadd.f32 %v1142_v22, %v1137_v28  ;;  %v1093_v38 = vpop.f32.mrb[35].mxu0  ;;  %v4962_v39 = vpop.f32.mrb[35].mxu1  ;;  %v2385_v25 = vrot.slane %v2371_v23, %v5246_v8  ;;  %v2386_v27 = vcombine.high %v2378_v19, %v2378_v19  ;;  %v4784_v32 = vld [vmem:[%s6064_s0 + $0xa] sm:$0x3f] }
 0x19c   :  { %v1145_v41 = vadd.f32 %v1142_v22, %v1136_v31  ;;  %v2975_v30 = vrot.slane %v4779_v29, %v5246_v8  ;;  %v2968_v31 = vcombine.high %v4779_v29, %v4779_v29  ;;  %v3091_v38 = vcombine.high %v4784_v32, %v4784_v32 }
 0x19d   :  { %v1147_v4 = vmax.f32 %v1144_v36, 0.0  ;;  %v1149_v42 = vmax.f32 %v1146_v37, 0.0  ;;  %v2387_v28 = vcombine.high %v2385_v25, %v2385_v25  ;;  %v4789_v37 = vld [vmem:[%s6064_s0 + $0xa] sm:$0x3f] }
 0x19e   :  { %v1148_v43 = vmax.f32 %v1145_v41, 0.0  ;;  %v2982_v33 = vrot.slane %v2968_v31, %v5246_v8  ;;  %v3221_v39 = vrot.slane %v4789_v37, %v5246_v8  ;;  %v4794_v41 = vld [vmem:[%s6064_s0 + $0xa] sm:$0x3f] }
 0x19f   :  { %v1167_v44 = vmul.f32 %v1155_v34, %v1147_v4  ;;  %v1169_v45 = vmul.f32 %v1163_v35, %v1149_v42  ;;  %v3098_v34 = vrot.slane %v4784_v32, %v5246_v8  ;;  %v2983_v35 = vcombine.high %v2975_v30, %v2975_v30 }
 0x1a0   :  { %v1168_v46 = vmul.f32 %v1159_v40, %v1148_v43  ;;  %v3214_v40 = vcombine.high %v4789_v37, %v4789_v37  ;;  %v3105_v4 = vrot.slane %v3091_v38, %v5246_v8  ;;  %v3344_v43 = vrot.slane %v4794_v41, %v5246_v8 }
 0x1a1   :  { %v1172_v47 = vpack.c.bf16 %v1169_v45, %v1169_v45  ;;  %v3106_v36 = vcombine.high %v3098_v34, %v3098_v34 }
 0x1a2   :  { %v4719_v48 = vpack.c.bf16 %v1168_v46, %v1167_v44  ;;  %v3228_v42 = vrot.slane %v3214_v40, %v5246_v8  ;;  %v3229_v44 = vcombine.high %v3221_v39, %v3221_v39  ;;  %v3352_v45 = vcombine.high %v3344_v43, %v3344_v43 }
 0x1a3   :  { %v1190_v49 = vrot.slane %v1172_v47, %v5246_v8  ;;  %v3337_v46 = vcombine.high %v4794_v41, %v4794_v41  ;;  %v3457_v47 = vld [vmem:[%s6066_s2] sm:$0xf] }
 0x1a4   :  { %v1183_v50 = vrot.slane %v4719_v48, %v5246_v8 }
 0x1a5   :  { %v3351_v48 = vrot.slane %v3337_v46, %v5246_v8 }
 0x1a6   :  { %v1191_v52 = vcombine.low %v1183_v50, %v1190_v49 }
 0x1a8   :  { %1197 = vst.msk [vmem:[#allocation2 + $0x2] sm:$0x3f] %vm5466_vm15, %v1191_v52 }
 0x1af   :  { %v1198_v53 = vld [vmem:[#allocation2] sm:$0xff] }
 0x1b0   :  { %v1800_v54 = vld [vmem:[#allocation2 + $0x2] sm:$0x3f]  ;;  %v1210_v56 = vrot.slane %v1198_v53, %v5246_v8  ;;  %v1203_v57 = vcombine.high %v1198_v53, %v1198_v53  ;;  %2361 = vst [vmem:[#allocation2] sm:$0x3] %v5191_v9 }
 0x1b1   :  { %v1924_v55 = vld [vmem:[#allocation2 + $0x2] sm:$0x3f]  ;;  %v1811_v0 = vrot.slane %v1800_v54, %v5246_v8  ;;  %v1804_v1 = vcombine.high %v1800_v54, %v1800_v54 }
 0x1b2   :  { %v2048_v58 = vld [vmem:[#allocation2 + $0x2] sm:$0x3f]  ;;  %1220 = vrot.lane.b32.xlu1 %v1210_v56, %s5193_s23  ;;  %v1217_v61 = vrot.slane %v1203_v57, %v5246_v8  ;;  %v1218_v62 = vcombine.high %v1210_v56, %v1210_v56  ;;  %v1935_v3 = vrot.slane %v1924_v55, %v5246_v8  ;;  %v1928_v10 = vcombine.high %v1924_v55, %v1924_v55 }
 0x1b3   :  { %v2172_v59 = vld [vmem:[#allocation2 + $0x2] sm:$0x3f]  ;;  %v1818_v2 = vrot.slane %v1804_v1, %v5246_v8  ;;  %v1819_v5 = vcombine.high %v1811_v0, %v1811_v0  ;;  %v2059_v11 = vrot.slane %v2048_v58, %v5246_v8  ;;  %v2052_v12 = vcombine.high %v2048_v58, %v2048_v58 }
 0x1b4   :  { %v5474_v60 = vld [vmem:[#allocation2 + $0x2] sm:$0x3f]  ;;  %1224 = vrot.lane.b32.xlu0 %v1217_v61, %s5193_s23  ;;  %v1219_v63 = vcombine.high %v1217_v61, %v1217_v61  ;;  %v1943_v6 = vcombine.high %v1935_v3, %v1935_v3  ;;  %v1942_v13 = vrot.slane %v1928_v10, %v5246_v8  ;;  %v2183_v15 = vrot.slane %v2172_v59, %v5246_v8 }
 0x1b5   :  { %2362 = vst.msk [vmem:[#allocation2 + $0x6] sm:$0x3] %vm26_vm11, %v5191_v9  ;;  %v2066_v14 = vrot.slane %v2052_v12, %v5246_v8  ;;  %v2067_v16 = vcombine.high %v2059_v11, %v2059_v11  ;;  %v2176_v22 = vcombine.high %v2172_v59, %v2172_v59  ;;  %v4720_v57 = vld [vmem:[%s6067_s3 + $0x2] sm:$0x3] }
 0x1b6   :  { %1222 = vrot.lane.b32.xlu1 %v1218_v62, %s5193_s23  ;;  %v2191_v18 = vcombine.high %v2183_v15, %v2183_v15 }
 0x1b7   :  { %v2190_v24 = vrot.slane %v2176_v22, %v5246_v8 }
 0x1b8   :  { %1324 = vrot.lane.b32.xlu0 %v1210_v56, %s5194_s24 }
 0x1ba   :  { %1226 = vrot.lane.b32.xlu1 %v1219_v63, %s5193_s23 }
 0x1bc   :  { %1328 = vrot.lane.b32.xlu0 %v1217_v61, %s5194_s24 }
 0x1be   :  { %1326 = vrot.lane.b32.xlu1 %v1218_v62, %s5194_s24 }
 0x1c0   :  { %1449 = vrot.lane.b32.xlu0 %v1210_v56, %s5195_s25 }
 0x1c2   :  { %1330 = vrot.lane.b32.xlu1 %v1219_v63, %s5194_s24 }
 0x1c4   :  { %1453 = vrot.lane.b32.xlu0 %v1217_v61, %s5195_s25 }
 0x1c6   :  { %1451 = vrot.lane.b32.xlu1 %v1218_v62, %s5195_s25 }
 0x1c8   :  { %1577 = vrot.lane.b32.xlu0 %v1210_v56, %s5196_s28 }
 0x1ca   :  { %1455 = vrot.lane.b32.xlu1 %v1219_v63, %s5195_s25 }
 0x1cc   :  { %1581 = vrot.lane.b32.xlu0 %v1217_v61, %s5196_s28 }
 0x1ce   :  { %1579 = vrot.lane.b32.xlu1 %v1218_v62, %s5196_s28 }
 0x1d0   :  { %1820 = vrot.lane.b32.xlu0 %v1811_v0, %s5197_s7 }
 0x1d2   :  { %1583 = vrot.lane.b32.xlu1 %v1219_v63, %s5196_s28 }
 0x1d4   :  { %1824 = vrot.lane.b32.xlu0 %v1818_v2, %s5197_s7 }
 0x1d6   :  { %1822 = vrot.lane.b32.xlu1 %v1819_v5, %s5197_s7  ;;  %v1199_v5 = vld [vmem:[%s6067_s3] sm:$0x3] }
 0x1d8   :  { %1946 = vrot.lane.b32.xlu0 %v1943_v6, %s5198_s10 }
 0x1da   :  { %1944 = vrot.lane.b32.xlu1 %v1935_v3, %s5198_s10 }
 0x1dc   :  { %2068 = vrot.lane.b32.xlu0 %v2059_v11, %s5199_s13 }
 0x1de   :  { %1948 = vrot.lane.b32.xlu1 %v1942_v13, %s5198_s10 }
 0x1e0   :  { %2072 = vrot.lane.b32.xlu0 %v2066_v14, %s5199_s13 }
 0x1e2   :  { %2070 = vrot.lane.b32.xlu1 %v2067_v16, %s5199_s13 }
 0x1e4   :  { %2194 = vrot.lane.b32.xlu0 %v2191_v18, %s5200_s14  ;;  %v4727_v18 = vld [vmem:[%s6067_s3 + $0x4] sm:$0x3] }
 0x1e6   :  { %2192 = vrot.lane.b32.xlu1 %v2183_v15, %s5200_s14 }
 0x1e8   :  { %2388 = vrot.lane.b32.xlu0 %v2378_v19, %s5193_s23 }
 0x1ea   :  { %2196 = vrot.lane.b32.xlu1 %v2190_v24, %s5200_s14 }
 0x1ec   :  { %2392 = vrot.lane.b32.xlu0 %v2385_v25, %s5193_s23 }
 0x1ee   :  { %2390 = vrot.lane.b32.xlu1 %v2386_v27, %s5193_s23 }
 0x1f0   :  { %2492 = vrot.lane.b32.xlu0 %v2378_v19, %s5194_s24 }
 0x1f2   :  { %2394 = vrot.lane.b32.xlu1 %v2387_v28, %s5193_s23 }
 0x1f4   :  { %2496 = vrot.lane.b32.xlu0 %v2385_v25, %s5194_s24 }
 0x1f6   :  { %2494 = vrot.lane.b32.xlu1 %v2386_v27, %s5194_s24 }
 0x1f8   :  { %2616 = vrot.lane.b32.xlu0 %v2378_v19, %s5195_s25 }
 0x1fa   :  { %2498 = vrot.lane.b32.xlu1 %v2387_v28, %s5194_s24 }
 0x1fc   :  { %2620 = vrot.lane.b32.xlu0 %v2385_v25, %s5195_s25 }
 0x1fe   :  { %2618 = vrot.lane.b32.xlu1 %v2386_v27, %s5195_s25 }
 0x200   :  { %2743 = vrot.lane.b32.xlu0 %v2378_v19, %s5196_s28 }
 0x202   :  { %2622 = vrot.lane.b32.xlu1 %v2387_v28, %s5195_s25 }
 0x204   :  { %2747 = vrot.lane.b32.xlu0 %v2385_v25, %s5196_s28  ;;  %v1695_v25 = vrot.slane %v5474_v60, %v5246_v8 }
 0x206   :  { %2745 = vrot.lane.b32.xlu1 %v2386_v27, %s5196_s28  ;;  %v1703_v32 = vcombine.high %v1695_v25, %v1695_v25 }
 0x208   :  { %2984 = vrot.lane.b32.xlu0 %v2975_v30, %s5197_s7 }
 0x20a   :  { %2749 = vrot.lane.b32.xlu1 %v2387_v28, %s5196_s28 }
 0x20c   :  { %2988 = vrot.lane.b32.xlu0 %v2982_v33, %s5197_s7  ;;  %v1688_v33 = vcombine.high %v5474_v60, %v5474_v60  ;;  %v1708_v60 = vsel %vm68_vm2, %v1695_v25, 0 }
 0x20e   :  { %2986 = vrot.lane.b32.xlu1 %v2983_v35, %s5197_s7 }
 0x210   :  { %3109 = vrot.lane.b32.xlu0 %v3106_v36, %s5198_s10 }
 0x212   :  { %3107 = vrot.lane.b32.xlu1 %v3098_v34, %s5198_s10  ;;  %v4731_v34 = vld [vmem:[%s6067_s3 + $0x6] sm:$0x3] }
 0x214   :  { %3230 = vrot.lane.b32.xlu0 %v3221_v39, %s5199_s13  ;;  %v1702_v39 = vrot.slane %v1688_v33, %v5246_v8 }
 0x216   :  { %3111 = vrot.lane.b32.xlu1 %v3105_v4, %s5198_s10 }
 0x218   :  { %3234 = vrot.lane.b32.xlu0 %v3228_v42, %s5199_s13  ;;  %v1714_v42 = vsel %vm68_vm2, %v1702_v39, 0 }
 0x21a   :  { %3232 = vrot.lane.b32.xlu1 %v3229_v44, %s5199_s13  ;;  %v4735_v44 = vld [vmem:[%s6067_s3 + $0x8] sm:$0x3] }
 0x21c   :  { %3355 = vrot.lane.b32.xlu0 %v3352_v45, %s5200_s14 }
 0x21e   :  { %3353 = vrot.lane.b32.xlu1 %v3344_v43, %s5200_s14 }
 0x220   :  { %3460 = vperm.xlu0 %5140, %v3457_v47  }
 0x222   :  { %3357 = vrot.lane.b32.xlu1 %v3351_v48, %s5200_s14 }
 0x224   :  { %v1221_v49 = vpop.permute.xlu1 %1220 }
 0x226   :  { %v1225_v50 = vpop.permute.xlu0 %1224 }
 0x228   :  { %v1223_v52 = vpop.permute.xlu1 %1222 }
 0x229   :  { %v1228_v53 = vsel %vm60_vm1, %v1221_v49, %v1223_v52  ;;  %v1229_v54 = vsel %vm60_vm1, %v1223_v52, %v1225_v50 }
 0x22a   :  { %v1235_v55 = vsel %vm68_vm2, %v1228_v53, 0  ;;  %4721 = vmatprep.subr.msk.bf16.mxu0 %vm68_vm2, %v1229_v54  ;;  %v1325_v56 = vpop.permute.xlu0 %1324  ;;  %v4739_v54 = vld [vmem:[%s6067_s3 + $0xa] sm:$0x3] }
 0x22b   :  { %1244 = vmatpush1.bf16.msra.mxu0 %v1235_v55 }
 0x22c   :  { %v1227_v58 = vpop.permute.xlu1 %1226 }
 0x22d   :  { %v1230_v59 = vsel %vm60_vm1, %v1225_v50, %v1227_v58 }
 0x22e   :  { %v1241_v61 = vsel %vm68_vm2, %v1230_v59, 0  ;;  %4722 = vmatmul.mubr.msk.bf16.vlgmr.msra.gmra.mrb[36].mxu0 %vm64_vm3, %v4720_v57  ;;  %v1329_v62 = vpop.permute.xlu0 %1328 }
 0x22f   :  { %4964 = vmatpush3.bf16.msra.mxu1 %v1241_v61  ;;  %1379 = vmatprep.mubr.bf16.mxu0 %v5191_v9 }
 0x230   :  { %v1327_v63 = vpop.permute.xlu1 %1326  ;;  %4969 = vmatprep.subr.bf16.mxu1 %v5190_v7 }
 0x231   :  { %v1332_v0 = vsel %vm167_vm4, %v1325_v56, %v1327_v63  ;;  %v1333_v1 = vsel %vm167_vm4, %v1327_v63, %v1329_v62 }
 0x232   :  { %v1339_v2 = vsel %vm68_vm2, %v1332_v0, 0  ;;  %v1450_v3 = vpop.permute.xlu0 %1449  ;;  %4966 = vmatmul.mubr.msk.bf16.vlgmr.msra.gmra.mrb[36].mxu1 %vm64_vm3, %v4720_v57  ;;  %4724 = vmatprep.subr.msk.bf16.mxu0 %vm68_vm2, %v1333_v1  ;;  %v4743_v0 = vld [vmem:[%s6067_s3 + $0xc] sm:$0x3] }
 0x233   :  { %1348 = vmatpush1.bf16.msra.mxu0 %v1339_v2  ;;  %4971 = vmatprep.mubr.msk.bf16.mxu1 %vm5192_vm0, %v5190_v7 }
 0x234   :  { %v1331_v6 = vpop.permute.xlu1 %1330 }
 0x235   :  { %v1334_v10 = vsel %vm167_vm4, %v1329_v62, %v1331_v6 }
 0x236   :  { %v1345_v11 = vsel %vm68_vm2, %v1334_v10, 0  ;;  %v1454_v12 = vpop.permute.xlu0 %1453  ;;  %4725 = vmatmul.mubr.msk.bf16.vlgmr.msra.gmra.mrb[40].mxu0 %vm64_vm3, %v1199_v5 }
 0x237   :  { %4970 = vmatpush3.bf16.msra.mxu1 %v1345_v11  ;;  %1504 = vmatprep.mubr.bf16.mxu0 %v5191_v9 }
 0x238   :  { %v1452_v13 = vpop.permute.xlu1 %1451  ;;  %4975 = vmatprep.subr.bf16.mxu1 %v5190_v7 }
 0x239   :  { %v1457_v14 = vsel %vm293_vm5, %v1450_v3, %v1452_v13  ;;  %v1458_v15 = vsel %vm293_vm5, %v1452_v13, %v1454_v12  ;;  %v4747_v13 = vld [vmem:[%s6067_s3 + $0xe] sm:$0x3] }
 0x23a   :  { %v1464_v16 = vsel %vm68_vm2, %v1457_v14, 0  ;;  %v1578_v17 = vpop.permute.xlu0 %1577  ;;  %4972 = vmatmul.mubr.msk.bf16.vlgmr.msra.gmra.mrb[40].mxu1 %vm64_vm3, %v1199_v5  ;;  %4728 = vmatprep.subr.msk.bf16.mxu0 %vm68_vm2, %v1458_v15 }
 0x23b   :  { %1473 = vmatpush1.bf16.msra.mxu0 %v1464_v16  ;;  %4977 = vmatprep.mubr.msk.bf16.mxu1 %vm5192_vm0, %v5190_v7 }
 0x23c   :  { %v1456_v19 = vpop.permute.xlu1 %1455 }
 0x23d   :  { %v1459_v22 = vsel %vm293_vm5, %v1454_v12, %v1456_v19 }
 0x23e   :  { %v1470_v23 = vsel %vm68_vm2, %v1459_v22, 0  ;;  %v1582_v24 = vpop.permute.xlu0 %1581  ;;  %4729 = vmatmul.mubr.msk.bf16.vlgmr.msra.gmra.mrb[44].mxu0 %vm64_vm3, %v4727_v18 }
 0x23f   :  { %4976 = vmatpush3.bf16.msra.mxu1 %v1470_v23  ;;  %1632 = vmatprep.mubr.bf16.mxu0 %v5191_v9 }
 0x240   :  { %v1580_v27 = vpop.permute.xlu1 %1579  ;;  %4981 = vmatprep.subr.bf16.mxu1 %v5190_v7 }
 0x241   :  { %v1585_v28 = vsel %vm422_vm6, %v1578_v17, %v1580_v27  ;;  %v1586_v29 = vsel %vm422_vm6, %v1580_v27, %v1582_v24 }
 0x242   :  { %v1592_v30 = vsel %vm68_vm2, %v1585_v28, 0  ;;  %v1821_v31 = vpop.permute.xlu0 %1820  ;;  %4978 = vmatmul.mubr.msk.bf16.vlgmr.msra.gmra.mrb[44].mxu1 %vm64_vm3, %v4727_v18  ;;  %4732 = vmatprep.subr.msk.bf16.mxu0 %vm68_vm2, %v1586_v29 }
 0x243   :  { %1601 = vmatpush1.bf16.msra.mxu0 %v1592_v30  ;;  %4983 = vmatprep.mubr.msk.bf16.mxu1 %vm5192_vm0, %v5190_v7 }
 0x244   :  { %4736 = vmatprep.subr.msk.bf16.mxu0 %vm68_vm2, %v1703_v32  ;;  %v1584_v35 = vpop.permute.xlu1 %1583 }
 0x245   :  { %v1587_v36 = vsel %vm422_vm6, %v1582_v24, %v1584_v35  ;;  %v4751_v24 = vld [vmem:[%s6067_s3 + $0x10] sm:$0x3] }
 0x246   :  { %v1598_v37 = vsel %vm68_vm2, %v1587_v36, 0  ;;  %v1825_v38 = vpop.permute.xlu0 %1824  ;;  %4733 = vmatmul.mubr.msk.bf16.vlgmr.msra.gmra.mrb[48].mxu0 %vm64_vm3, %v4731_v34 }
 0x247   :  { %4982 = vmatpush3.bf16.msra.mxu1 %v1598_v37  ;;  %1717 = vmatpush1.bf16.msra.mxu0 %v1708_v60  ;;  %v1838_v50 = vsel %vm68_vm2, %v1825_v38, 0 }
 0x248   :  { %v1823_v40 = vpop.permute.xlu1 %1822  ;;  %4987 = vmatprep.subr.bf16.mxu1 %v5190_v7  ;;  %1748 = vmatprep.mubr.bf16.mxu0 %v5191_v9 }
 0x249   :  { %v1827_v41 = vsel %vm664_vm7, %v1823_v40, %v1825_v38  ;;  %v1826_v43 = vsel %vm664_vm7, %v1821_v31, %v1823_v40 }
 0x24a   :  { %v1947_v4 = vpop.permute.xlu0 %1946  ;;  %4984 = vmatmul.mubr.msk.bf16.vlgmr.msra.gmra.mrb[48].mxu1 %vm64_vm3, %v4731_v34  ;;  %4740 = vmatprep.subr.msk.bf16.mxu0 %vm68_vm2, %v1827_v41  ;;  %v1832_v46 = vsel %vm68_vm2, %v1826_v43, 0  ;;  %v4757_v34 = vld [vmem:[%s6065_s1 + $0x2] sm:$0x3] }
 0x24b   :  { %4988 = vmatpush3.bf16.msra.mxu1 %v1714_v42  ;;  %4989 = vmatprep.mubr.msk.bf16.mxu1 %vm5192_vm0, %v5190_v7 }
 0x24c   :  { %v1945_v45 = vpop.permute.xlu1 %1944  ;;  %4993 = vmatprep.subr.bf16.mxu1 %v5190_v7 }
 0x24d   :  { %v1950_v53 = vsel %vm789_vm8, %v1945_v45, %v1947_v4 }
 0x24e   :  { %v2069_v47 = vpop.permute.xlu0 %2068  ;;  %4737 = vmatmul.mubr.msk.bf16.vlgmr.msra.gmra.mrb[52].mxu0 %vm64_vm3, %v4735_v44  ;;  %v1956_v57 = vsel %vm68_vm2, %v1950_v53, 0 }
 0x24f   :  { %1841 = vmatpush1.bf16.msra.mxu0 %v1832_v46  ;;  %1872 = vmatprep.mubr.bf16.mxu0 %v5191_v9  ;;  %v4774_v46 = vld [vmem:[%s6064_s0 + $0xa] sm:$0x3f] }
 0x250   :  { %v1949_v48 = vpop.permute.xlu1 %1948 }
 0x251   :  { %v1951_v49 = vsel %vm789_vm8, %v1947_v4, %v1949_v48  ;;  %v1962_v61 = vsel %vm68_vm2, %v1949_v48, 0  ;;  %v2368_v4 = vld [vmem:[%s6065_s1] sm:$0x3]  ;;  %v2860_v48 = vrot.slane %v4774_v46, %v5246_v8 }
 0x252   :  { %v2073_v52 = vpop.permute.xlu0 %2072  ;;  %4990 = vmatmul.mubr.msk.bf16.vlgmr.msra.gmra.mrb[52].mxu1 %vm64_vm3, %v4735_v44  ;;  %4744 = vmatprep.subr.msk.bf16.mxu0 %vm68_vm2, %v1951_v49 }
 0x253   :  { %4994 = vmatpush3.bf16.msra.mxu1 %v1838_v50  ;;  %4995 = vmatprep.mubr.msk.bf16.mxu1 %vm5192_vm0, %v5190_v7  ;;  %v2086_v10 = vsel %vm68_vm2, %v2073_v52, 0 }
 0x254   :  { %v2071_v55 = vpop.permute.xlu1 %2070  ;;  %4999 = vmatprep.subr.bf16.mxu1 %v5190_v7 }
 0x255   :  { %v2075_v56 = vsel %vm914_vm9, %v2071_v55, %v2073_v52  ;;  %v2074_v63 = vsel %vm914_vm9, %v2069_v47, %v2071_v55  ;;  %v4765_v52 = vld [vmem:[%s6065_s1 + $0x4] sm:$0x3]  ;;  %v2868_v55 = vcombine.high %v2860_v48, %v2860_v48 }
 0x256   :  { %v2195_v58 = vpop.permute.xlu0 %2194  ;;  %4741 = vmatmul.mubr.msk.bf16.vlgmr.msra.gmra.mrb[56].mxu0 %vm64_vm3, %v4739_v54  ;;  %v2080_v3 = vsel %vm68_vm2, %v2074_v63, 0  ;;  %v2873_v63 = vsel %vm68_vm2, %v2860_v48, 0 }
 0x257   :  { %1965 = vmatpush1.bf16.msra.mxu0 %v1956_v57  ;;  %1996 = vmatprep.mubr.bf16.mxu0 %v5191_v9 }
 0x258   :  { %4748 = vmatprep.subr.msk.bf16.mxu0 %vm68_vm2, %v2075_v56  ;;  %v2193_v59 = vpop.permute.xlu1 %2192 }
 0x259   :  { %v2198_v12 = vsel %vm1039_vm10, %v2193_v59, %v2195_v58  ;;  %v2853_v59 = vcombine.high %v4774_v46, %v4774_v46 }
 0x25a   :  { %4996 = vmatmul.mubr.msk.bf16.vlgmr.msra.gmra.mrb[56].mxu1 %vm64_vm3, %v4739_v54  ;;  %v2389_v62 = vpop.permute.xlu0 %2388  ;;  %v2204_v16 = vsel %vm68_vm2, %v2198_v12, 0 }
 0x25b   :  { %5000 = vmatpush3.bf16.msra.mxu1 %v1962_v61  ;;  %5001 = vmatprep.mubr.msk.bf16.mxu1 %vm5192_vm0, %v5190_v7 }
 0x25c   :  { %v2197_v1 = vpop.permute.xlu1 %2196  ;;  %5005 = vmatprep.subr.bf16.mxu1 %v5190_v7 }
 0x25d   :  { %v2199_v2 = vsel %vm1039_vm10, %v2195_v58, %v2197_v1  ;;  %v2210_v22 = vsel %vm68_vm2, %v2197_v1, 0 }
 0x25e   :  { %4745 = vmatmul.mubr.msk.bf16.vlgmr.msra.gmra.mrb[60].mxu0 %vm64_vm3, %v4743_v0  ;;  %v2393_v5 = vpop.permute.xlu0 %2392 }
 0x25f   :  { %2089 = vmatpush1.bf16.msra.mxu0 %v2080_v3  ;;  %2120 = vmatprep.mubr.bf16.mxu0 %v5191_v9 }
 0x260   :  { %4752 = vmatprep.subr.msk.bf16.mxu0 %vm68_vm2, %v2199_v2  ;;  %v2391_v6 = vpop.permute.xlu1 %2390 }
 0x261   :  { %v2397_v15 = vsel %vm60_vm1, %v2391_v6, %v2393_v5  ;;  %v2396_v19 = vsel %vm60_vm1, %v2389_v62, %v2391_v6  ;;  %v4770_v62 = vld [vmem:[%s6065_s1 + $0x6] sm:$0x3] }
 0x262   :  { %5002 = vmatmul.mubr.msk.bf16.vlgmr.msra.gmra.mrb[60].mxu1 %vm64_vm3, %v4743_v0  ;;  %v2493_v11 = vpop.permute.xlu0 %2492  ;;  %v2403_v25 = vsel %vm68_vm2, %v2396_v19, 0  ;;  %v2867_v0 = vrot.slane %v2853_v59, %v5246_v8 }
 0x263   :  { %5006 = vmatpush3.bf16.msra.mxu1 %v2086_v10  ;;  %5007 = vmatprep.mubr.msk.bf16.mxu1 %vm5192_vm0, %v5190_v7 }
 0x264   :  { %5011 = vmatprep.subr.bf16.mxu1 %v5190_v7  ;;  %v2395_v14 = vpop.permute.xlu1 %2394 }
 0x265   :  { %v2398_v28 = vsel %vm60_vm1, %v2393_v5, %v2395_v14  ;;  %v2879_v5 = vsel %vm68_vm2, %v2867_v0, 0 }
 0x266   :  { %4749 = vmatmul.mubr.msk.bf16.vlgmr.msra.gmra.mrb[64].mxu0 %vm64_vm3, %v4747_v13  ;;  %v2497_v17 = vpop.permute.xlu0 %2496  ;;  %v2409_v30 = vsel %vm68_vm2, %v2398_v28, 0 }
 0x267   :  { %2213 = vmatpush1.bf16.msra.mxu0 %v2204_v16  ;;  %2244 = vmatprep.mubr.bf16.mxu0 %v5191_v9 }
 0x268   :  { %4758 = vmatprep.subr.msk.bf16.mxu0 %vm68_vm2, %v2397_v15  ;;  %v2495_v18 = vpop.permute.xlu1 %2494 }
 0x269   :  { %v2501_v29 = vsel %vm167_vm4, %v2495_v18, %v2497_v17  ;;  %v2500_v33 = vsel %vm167_vm4, %v2493_v11, %v2495_v18  ;;  %v4775_v11 = vld [vmem:[%s6065_s1 + $0x8] sm:$0x3]  ;;  %v4780_v18 = vld [vmem:[%s6065_s1 + $0xa] sm:$0x3] }
 0x26a   :  { %5008 = vmatmul.mubr.msk.bf16.vlgmr.msra.gmra.mrb[64].mxu1 %vm64_vm3, %v4747_v13  ;;  %v2617_v23 = vpop.permute.xlu0 %2616  ;;  %v2507_v35 = vsel %vm68_vm2, %v2500_v33, 0 }
 0x26b   :  { %5012 = vmatpush3.bf16.msra.mxu1 %v2210_v22  ;;  %5013 = vmatprep.mubr.msk.bf16.mxu1 %vm5192_vm0, %v5190_v7 }
 0x26c   :  { %5017 = vmatprep.subr.bf16.mxu1 %v5190_v7  ;;  %v2499_v27 = vpop.permute.xlu1 %2498 }
 0x26d   :  { %v2502_v37 = vsel %vm167_vm4, %v2497_v17, %v2499_v27 }
 0x26e   :  { %4753 = vmatmul.mubr.msk.bf16.vlgmr.msra.gmra.mrb[68].mxu0 %vm64_vm3, %v4751_v24  ;;  %v2621_v31 = vpop.permute.xlu0 %2620  ;;  %v2513_v39 = vsel %vm68_vm2, %v2502_v37, 0 }
 0x26f   :  { %2412 = vmatpush1.bf16.msra.mxu0 %v2403_v25  ;;  %2443 = vmatprep.mubr.bf16.mxu0 %v5191_v9 }
 0x270   :  { %4761 = vmatprep.subr.msk.bf16.mxu0 %vm68_vm2, %v2501_v29  ;;  %v2619_v32 = vpop.permute.xlu1 %2618  ;;  %v4785_v29 = vld [vmem:[%s6065_s1 + $0xc] sm:$0x3] }
 0x271   :  { %v2625_v38 = vsel %vm293_vm5, %v2619_v32, %v2621_v31  ;;  %v2624_v40 = vsel %vm293_vm5, %v2617_v23, %v2619_v32 }
 0x272   :  { %5014 = vmatmul.mubr.msk.bf16.vlgmr.msra.gmra.mrb[68].mxu1 %vm64_vm3, %v4751_v24  ;;  %v2744_v60 = vpop.permute.xlu0 %2743  ;;  %v2631_v42 = vsel %vm68_vm2, %v2624_v40, 0 }
 0x273   :  { %5018 = vmatpush3.bf16.msra.mxu1 %v2409_v30  ;;  %5019 = vmatprep.mubr.msk.bf16.mxu1 %vm5192_vm0, %v5190_v7 }
 0x274   :  { %5023 = vmatprep.subr.bf16.mxu1 %v5190_v7  ;;  %v2623_v36 = vpop.permute.xlu1 %2622 }
 0x275   :  { %v2626_v44 = vsel %vm293_vm5, %v2621_v31, %v2623_v36 }
 0x276   :  { %4759 = vmatmul.mubr.msk.bf16.vlgmr.msra.gmra.mrb[72].mxu0 %vm64_vm3, %v4757_v34  ;;  %v2748_v43 = vpop.permute.xlu0 %2747  ;;  %v2637_v47 = vsel %vm68_vm2, %v2626_v44, 0 }
 0x277   :  { %2516 = vmatpush1.bf16.msra.mxu0 %v2507_v35  ;;  %2547 = vmatprep.mubr.bf16.mxu0 %v5191_v9  ;;  %v4790_v35 = vld [vmem:[%s6065_s1 + $0xe] sm:$0x3] }
 0x278   :  { %4766 = vmatprep.subr.msk.bf16.mxu0 %vm68_vm2, %v2625_v38  ;;  %v2746_v41 = vpop.permute.xlu1 %2745  ;;  %v4795_v38 = vld [vmem:[%s6065_s1 + $0x10] sm:$0x3] }
 0x279   :  { %v2752_v45 = vsel %vm422_vm6, %v2746_v41, %v2748_v43  ;;  %v2751_v49 = vsel %vm422_vm6, %v2744_v60, %v2746_v41 }
 0x27a   :  { %5020 = vmatmul.mubr.msk.bf16.vlgmr.msra.gmra.mrb[72].mxu1 %vm64_vm3, %v4757_v34  ;;  %v2985_v53 = vpop.permute.xlu0 %2984  ;;  %v2758_v54 = vsel %vm68_vm2, %v2751_v49, 0 }
 0x27b   :  { %5024 = vmatpush3.bf16.msra.mxu1 %v2513_v39  ;;  %5025 = vmatprep.mubr.msk.bf16.mxu1 %vm5192_vm0, %v5190_v7 }
 0x27c   :  { %5029 = vmatprep.subr.bf16.mxu1 %v5190_v7  ;;  %v2750_v50 = vpop.permute.xlu1 %2749 }
 0x27d   :  { %v2753_v56 = vsel %vm422_vm6, %v2748_v43, %v2750_v50 }
 0x27e   :  { %4762 = vmatmul.mubr.msk.bf16.vlgmr.msra.gmra.mrb[76].mxu0 %vm64_vm3, %v2368_v4  ;;  %v2764_v58 = vsel %vm68_vm2, %v2753_v56, 0  ;;  %v2989_v61 = vpop.permute.xlu0 %2988 }
 0x27f   :  { %2640 = vmatpush1.bf16.msra.mxu0 %v2631_v42  ;;  %2671 = vmatprep.mubr.bf16.mxu0 %v5191_v9  ;;  %v3002_v16 = vsel %vm68_vm2, %v2989_v61, 0 }
 0x280   :  { %4771 = vmatprep.subr.msk.bf16.mxu0 %vm68_vm2, %v2752_v45  ;;  %v2987_v57 = vpop.permute.xlu1 %2986 }
 0x281   :  { %v2991_v2 = vsel %vm664_vm7, %v2987_v57, %v2989_v61  ;;  %v2990_v6 = vsel %vm664_vm7, %v2985_v53, %v2987_v57 }
 0x282   :  { %5026 = vmatmul.mubr.msk.bf16.vlgmr.msra.gmra.mrb[76].mxu1 %vm64_vm3, %v2368_v4  ;;  %v3110_v3 = vpop.permute.xlu0 %3109  ;;  %v2996_v12 = vsel %vm68_vm2, %v2990_v6, 0 }
 0x283   :  { %5030 = vmatpush3.bf16.msra.mxu1 %v2637_v47  ;;  %5031 = vmatprep.mubr.msk.bf16.mxu1 %vm5192_vm0, %v5190_v7 }
 0x284   :  { %5035 = vmatprep.subr.bf16.mxu1 %v5190_v7  ;;  %v3108_v1 = vpop.permute.xlu1 %3107 }
 0x285   :  { %v3113_v17 = vsel %vm789_vm8, %v3108_v1, %v3110_v3 }
 0x286   :  { %4767 = vmatmul.mubr.msk.bf16.vlgmr.msra.gmra.mrb[80].mxu0 %vm64_vm3, %v4765_v52  ;;  %v3231_v14 = vpop.permute.xlu0 %3230  ;;  %v3119_v22 = vsel %vm68_vm2, %v3113_v17, 0 }
 0x287   :  { %2767 = vmatpush1.bf16.msra.mxu0 %v2758_v54  ;;  %2798 = vmatprep.mubr.bf16.mxu0 %v5191_v9 }
 0x288   :  { %4776 = vmatprep.subr.msk.bf16.mxu0 %vm68_vm2, %v2868_v55  ;;  %v3112_v10 = vpop.permute.xlu1 %3111 }
 0x289   :  { %v3114_v13 = vsel %vm789_vm8, %v3110_v3, %v3112_v10  ;;  %v3125_v25 = vsel %vm68_vm2, %v3112_v10, 0 }
 0x28a   :  { %5032 = vmatmul.mubr.msk.bf16.vlgmr.msra.gmra.mrb[80].mxu1 %vm64_vm3, %v4765_v52  ;;  %v3235_v19 = vpop.permute.xlu0 %3234 }
 0x28b   :  { %5036 = vmatpush3.bf16.msra.mxu1 %v2764_v58  ;;  %5037 = vmatprep.mubr.msk.bf16.mxu1 %vm5192_vm0, %v5190_v7  ;;  %v3248_v33 = vsel %vm68_vm2, %v3235_v19, 0 }
 0x28c   :  { %5041 = vmatprep.subr.bf16.mxu1 %v5190_v7  ;;  %v3233_v15 = vpop.permute.xlu1 %3232 }
 0x28d   :  { %v3237_v24 = vsel %vm914_vm9, %v3233_v15, %v3235_v19  ;;  %v3236_v27 = vsel %vm914_vm9, %v3231_v14, %v3233_v15 }
 0x28e   :  { %4772 = vmatmul.mubr.msk.bf16.vlgmr.msra.gmra.mrb[84].mxu0 %vm64_vm3, %v4770_v62  ;;  %v3356_v30 = vpop.permute.xlu0 %3355  ;;  %v3242_v31 = vsel %vm68_vm2, %v3236_v27, 0 }
 0x28f   :  { %2882 = vmatpush1.bf16.msra.mxu0 %v2873_v63  ;;  %2913 = vmatprep.mubr.bf16.mxu0 %v5191_v9 }
 0x290   :  { %4781 = vmatprep.subr.msk.bf16.mxu0 %vm68_vm2, %v2991_v2  ;;  %v3354_v23 = vpop.permute.xlu1 %3353 }
 0x291   :  { %v3359_v34 = vsel %vm1039_vm10, %v3354_v23, %v3356_v30 }
 0x292   :  { %5038 = vmatmul.mubr.msk.bf16.vlgmr.msra.gmra.mrb[84].mxu1 %vm64_vm3, %v4770_v62  ;;  %v3365_v36 = vsel %vm68_vm2, %v3359_v34, 0 }
 0x293   :  { %5042 = vmatpush3.bf16.msra.mxu1 %v2879_v5  ;;  %5043 = vmatprep.mubr.msk.bf16.mxu1 %vm5192_vm0, %v5190_v7 }
 0x294   :  { %5047 = vmatprep.subr.bf16.mxu1 %v5190_v7  ;;  %v3358_v28 = vpop.permute.xlu1 %3357 }
 0x295   :  { %v3360_v32 = vsel %vm1039_vm10, %v3356_v30, %v3358_v28  ;;  %v3371_v37 = vsel %vm68_vm2, %v3358_v28, 0 }
 0x296   :  { %4777 = vmatmul.mubr.msk.bf16.vlgmr.msra.gmra.mrb[88].mxu0 %vm64_vm3, %v4775_v11 }
 0x297   :  { %3005 = vmatpush1.bf16.msra.mxu0 %v2996_v12  ;;  %3036 = vmatprep.mubr.bf16.mxu0 %v5191_v9 }
 0x298   :  { %4786 = vmatprep.subr.msk.bf16.mxu0 %vm68_vm2, %v3114_v13 }
 0x29a   :  { %5044 = vmatmul.mubr.msk.bf16.vlgmr.msra.gmra.mrb[88].mxu1 %vm64_vm3, %v4775_v11 }
 0x29b   :  { %5048 = vmatpush3.bf16.msra.mxu1 %v3002_v16  ;;  %5049 = vmatprep.mubr.msk.bf16.mxu1 %vm5192_vm0, %v5190_v7 }
 0x29c   :  { %5053 = vmatprep.subr.bf16.mxu1 %v5190_v7 }
 0x29e   :  { %4782 = vmatmul.mubr.msk.bf16.vlgmr.msra.gmra.mrb[92].mxu0 %vm64_vm3, %v4780_v18 }
 0x29f   :  { %3128 = vmatpush1.bf16.msra.mxu0 %v3119_v22  ;;  %3159 = vmatprep.mubr.bf16.mxu0 %v5191_v9 }
 0x2a0   :  { %4791 = vmatprep.subr.msk.bf16.mxu0 %vm68_vm2, %v3237_v24 }
 0x2a2   :  { %5050 = vmatmul.mubr.msk.bf16.vlgmr.msra.gmra.mrb[92].mxu1 %vm64_vm3, %v4780_v18 }
 0x2a3   :  { %5054 = vmatpush3.bf16.msra.mxu1 %v3125_v25  ;;  %5055 = vmatprep.mubr.msk.bf16.mxu1 %vm5192_vm0, %v5190_v7 }
 0x2a4   :  { %5059 = vmatprep.subr.bf16.mxu1 %v5190_v7 }
 0x2a6   :  { %4787 = vmatmul.mubr.msk.bf16.vlgmr.msra.gmra.mrb[96].mxu0 %vm64_vm3, %v4785_v29 }
 0x2a7   :  { %3251 = vmatpush1.bf16.msra.mxu0 %v3242_v31  ;;  %3282 = vmatprep.mubr.bf16.mxu0 %v5191_v9 }
 0x2a8   :  { %4796 = vmatprep.subr.msk.bf16.mxu0 %vm68_vm2, %v3360_v32 }
 0x2aa   :  { %5056 = vmatmul.mubr.msk.bf16.vlgmr.msra.gmra.mrb[96].mxu1 %vm64_vm3, %v4785_v29 }
 0x2ab   :  { %5060 = vmatpush3.bf16.msra.mxu1 %v3248_v33  ;;  %5061 = vmatprep.mubr.msk.bf16.mxu1 %vm5192_vm0, %v5190_v7 }
 0x2ac   :  { %5065 = vmatprep.subr.bf16.mxu1 %v5190_v7 }
 0x2ae   :  { %4792 = vmatmul.mubr.msk.bf16.vlgmr.msra.gmra.mrb[100].mxu0 %vm64_vm3, %v4790_v35 }
 0x2af   :  { %3374 = vmatpush1.bf16.msra.mxu0 %v3365_v36  ;;  %3405 = vmatprep.mubr.bf16.mxu0 %v5191_v9 }
 0x2b2   :  { %5062 = vmatmul.mubr.msk.bf16.vlgmr.msra.gmra.mrb[100].mxu1 %vm64_vm3, %v4790_v35 }
 0x2b3   :  { %5066 = vmatpush3.bf16.msra.mxu1 %v3371_v37  ;;  %5067 = vmatprep.mubr.msk.bf16.mxu1 %vm5192_vm0, %v5190_v7 }
 0x2b4   :  { %5071 = vmatprep.subr.bf16.mxu1 %v5190_v7 }
 0x2b6   :  { %4797 = vmatmul.mubr.msk.bf16.vlgmr.msra.gmra.mrb[104].mxu0 %vm64_vm3, %v4795_v38 }
 0x2b7   :  { %3589 = vmatprep.mubr.bf16.mxu0 %v5191_v9 }
 0x2ba   :  { %5068 = vmatmul.mubr.msk.bf16.vlgmr.msra.gmra.mrb[104].mxu1 %vm64_vm3, %v4795_v38 }
 0x2bb   :  { %5073 = vmatprep.mubr.msk.bf16.mxu1 %vm5192_vm0, %v5190_v7 }
 0x301   :  { %v1277_v60 = vpop.f32.mrb[36].mxu0 }
 0x302   :  { %v1279_v39 = vpop.f32.mrb[37].mxu0 }
 0x303   :  { %v1281_v40 = vpop.f32.mrb[38].mxu0 }
 0x304   :  { %v1282_v41 = vpop.f32.mrb[39].mxu0 }
 0x305   :  { %v1318_v4 = vpop.f32.mrb[36].mxu1 }
 0x306   :  { %v4967_v42 = vpop.f32.mrb[37].mxu1 }
 0x307   :  { %v1321_v43 = vpop.f32.mrb[38].mxu1 }
 0x308   :  { %v4968_v44 = vpop.f32.mrb[39].mxu1 }
 0x309   :  { %v1381_v45 = vpop.f32.mrb[40].mxu0 }
 0x30a   :  { %v1382_v46 = vadd.f32 %v1381_v45, %v1277_v60  ;;  %v1383_v47 = vpop.f32.mrb[41].mxu0 }
 0x30b   :  { %v1384_v48 = vadd.f32 %v1383_v47, %v1279_v39  ;;  %v1385_v49 = vpop.f32.mrb[42].mxu0 }
 0x30c   :  { %v1386_v50 = vpop.f32.mrb[43].mxu0 }
 0x30d   :  { %v1422_v52 = vpop.f32.mrb[40].mxu1 }
 0x30e   :  { %v1423_v53 = vadd.f32 %v1422_v52, %v1318_v4  ;;  %v4973_v54 = vpop.f32.mrb[41].mxu1 }
 0x30f   :  { %v1425_v55 = vpop.f32.mrb[42].mxu1 }
 0x310   :  { %v4974_v56 = vpop.f32.mrb[43].mxu1 }
 0x311   :  { %v1506_v57 = vpop.f32.mrb[44].mxu0 }
 0x312   :  { %v1553_v58 = vadd.f32 %v1506_v57, %v1382_v46  ;;  %v1508_v59 = vpop.f32.mrb[45].mxu0 }
 0x313   :  { %v1554_v61 = vadd.f32 %v1508_v59, %v1384_v48  ;;  %v1510_v62 = vpop.f32.mrb[46].mxu0 }
 0x314   :  { %v1511_v63 = vpop.f32.mrb[47].mxu0 }
 0x315   :  { %v1547_v0 = vpop.f32.mrb[44].mxu1 }
 0x316   :  { %v1555_v1 = vadd.f32 %v1547_v0, %v1423_v53  ;;  %v4979_v2 = vpop.f32.mrb[45].mxu1 }
 0x317   :  { %v1550_v3 = vpop.f32.mrb[46].mxu1 }
 0x318   :  { %v4980_v5 = vpop.f32.mrb[47].mxu1 }
 0x319   :  { %v1634_v6 = vpop.f32.mrb[48].mxu0 }
 0x31a   :  { %v1681_v10 = vadd.f32 %v1634_v6, %v1553_v58  ;;  %v1636_v11 = vpop.f32.mrb[49].mxu0 }
 0x31b   :  { %v1682_v12 = vadd.f32 %v1636_v11, %v1554_v61  ;;  %v1638_v13 = vpop.f32.mrb[50].mxu0 }
 0x31c   :  { %v1639_v14 = vpop.f32.mrb[51].mxu0 }
 0x31d   :  { %v1675_v15 = vpop.f32.mrb[48].mxu1 }
 0x31e   :  { %v1683_v16 = vadd.f32 %v1675_v15, %v1555_v1  ;;  %v4985_v17 = vpop.f32.mrb[49].mxu1 }
 0x31f   :  { %v1678_v18 = vpop.f32.mrb[50].mxu1 }
 0x320   :  { %v4986_v19 = vpop.f32.mrb[51].mxu1 }
 0x321   :  { %v1750_v22 = vpop.f32.mrb[52].mxu0 }
 0x322   :  { %v1797_v23 = vadd.f32 %v1750_v22, %v1681_v10  ;;  %v1752_v24 = vpop.f32.mrb[53].mxu0 }
 0x323   :  { %v1798_v25 = vadd.f32 %v1752_v24, %v1682_v12  ;;  %v1754_v27 = vpop.f32.mrb[54].mxu0 }
 0x324   :  { %v1755_v28 = vpop.f32.mrb[55].mxu0 }
 0x325   :  { %v1791_v29 = vpop.f32.mrb[52].mxu1 }
 0x326   :  { %v1799_v30 = vadd.f32 %v1791_v29, %v1683_v16  ;;  %v4991_v31 = vpop.f32.mrb[53].mxu1 }
 0x327   :  { %v1794_v32 = vpop.f32.mrb[54].mxu1 }
 0x328   :  { %v4992_v33 = vpop.f32.mrb[55].mxu1 }
 0x329   :  { %v1874_v34 = vpop.f32.mrb[56].mxu0 }
 0x32a   :  { %v1921_v35 = vadd.f32 %v1874_v34, %v1797_v23  ;;  %v1876_v36 = vpop.f32.mrb[57].mxu0 }
 0x32b   :  { %v1922_v37 = vadd.f32 %v1876_v36, %v1798_v25  ;;  %v1878_v38 = vpop.f32.mrb[58].mxu0 }
 0x32c   :  { %v1879_v60 = vpop.f32.mrb[59].mxu0 }
 0x32d   :  { %v1915_v39 = vpop.f32.mrb[56].mxu1 }
 0x32e   :  { %v1923_v40 = vadd.f32 %v1915_v39, %v1799_v30  ;;  %v4997_v41 = vpop.f32.mrb[57].mxu1 }
 0x32f   :  { %v1918_v4 = vpop.f32.mrb[58].mxu1 }
 0x330   :  { %v4998_v42 = vpop.f32.mrb[59].mxu1 }
 0x331   :  { %v1998_v43 = vpop.f32.mrb[60].mxu0 }
 0x332   :  { %v2045_v44 = vadd.f32 %v1998_v43, %v1921_v35  ;;  %v2000_v45 = vpop.f32.mrb[61].mxu0 }
 0x333   :  { %v2046_v46 = vadd.f32 %v2000_v45, %v1922_v37  ;;  %v2002_v47 = vpop.f32.mrb[62].mxu0 }
 0x334   :  { %v2003_v48 = vpop.f32.mrb[63].mxu0 }
 0x335   :  { %v2039_v49 = vpop.f32.mrb[60].mxu1 }
 0x336   :  { %v2047_v50 = vadd.f32 %v2039_v49, %v1923_v40  ;;  %v5003_v52 = vpop.f32.mrb[61].mxu1 }
 0x337   :  { %v2042_v53 = vpop.f32.mrb[62].mxu1 }
 0x338   :  { %v5004_v54 = vpop.f32.mrb[63].mxu1 }
 0x339   :  { %v2122_v55 = vpop.f32.mrb[64].mxu0 }
 0x33a   :  { %v2169_v56 = vadd.f32 %v2122_v55, %v2045_v44  ;;  %v2124_v57 = vpop.f32.mrb[65].mxu0 }
 0x33b   :  { %v2170_v58 = vadd.f32 %v2124_v57, %v2046_v46  ;;  %v2126_v59 = vpop.f32.mrb[66].mxu0 }
 0x33c   :  { %v2127_v61 = vpop.f32.mrb[67].mxu0 }
 0x33d   :  { %v2163_v62 = vpop.f32.mrb[64].mxu1 }
 0x33e   :  { %v2171_v63 = vadd.f32 %v2163_v62, %v2047_v50  ;;  %v5009_v0 = vpop.f32.mrb[65].mxu1 }
 0x33f   :  { %v2166_v1 = vpop.f32.mrb[66].mxu1 }
 0x340   :  { %v5010_v2 = vpop.f32.mrb[67].mxu1 }
 0x341   :  { %v2246_v3 = vpop.f32.mrb[68].mxu0 }
 0x342   :  { %v5837_v5 = vadd.f32 %v2246_v3, %v2169_v56  ;;  %v2248_v6 = vpop.f32.mrb[69].mxu0 }
 0x343   :  { %v5839_v10 = vadd.f32 %v2248_v6, %v2170_v58  ;;  %v2250_v11 = vpop.f32.mrb[70].mxu0 }
 0x344   :  { %v2251_v12 = vpop.f32.mrb[71].mxu0 }
 0x345   :  { %v2287_v13 = vpop.f32.mrb[68].mxu1 }
 0x346   :  { %v5841_v14 = vadd.f32 %v2287_v13, %v2171_v63  ;;  %v5015_v15 = vpop.f32.mrb[69].mxu1 }
 0x347   :  { %v2290_v16 = vpop.f32.mrb[70].mxu1 }
 0x348   :  { %v5016_v17 = vpop.f32.mrb[71].mxu1 }
 0x349   :  { %v2445_v18 = vpop.f32.mrb[72].mxu0 }
 0x34a   :  { %v2447_v19 = vpop.f32.mrb[73].mxu0 }
 0x34b   :  { %v2449_v22 = vpop.f32.mrb[74].mxu0 }
 0x34c   :  { %v2450_v23 = vpop.f32.mrb[75].mxu0 }
 0x34d   :  { %v2486_v24 = vpop.f32.mrb[72].mxu1 }
 0x34e   :  { %v5021_v25 = vpop.f32.mrb[73].mxu1 }
 0x34f   :  { %v2489_v27 = vpop.f32.mrb[74].mxu1 }
 0x350   :  { %v5022_v28 = vpop.f32.mrb[75].mxu1 }
 0x351   :  { %v2549_v29 = vpop.f32.mrb[76].mxu0 }
 0x352   :  { %v2550_v30 = vadd.f32 %v2549_v29, %v2445_v18  ;;  %v2551_v31 = vpop.f32.mrb[77].mxu0 }
 0x353   :  { %v2552_v32 = vadd.f32 %v2551_v31, %v2447_v19  ;;  %v2553_v33 = vpop.f32.mrb[78].mxu0 }
 0x354   :  { %v2554_v34 = vpop.f32.mrb[79].mxu0 }
 0x355   :  { %v2590_v35 = vpop.f32.mrb[76].mxu1 }
 0x356   :  { %v2591_v36 = vadd.f32 %v2590_v35, %v2486_v24  ;;  %v5027_v37 = vpop.f32.mrb[77].mxu1 }
 0x357   :  { %v2593_v38 = vpop.f32.mrb[78].mxu1 }
 0x358   :  { %v5028_v60 = vpop.f32.mrb[79].mxu1 }
 0x359   :  { %v2673_v39 = vpop.f32.mrb[80].mxu0 }
 0x35a   :  { %v2720_v40 = vadd.f32 %v2673_v39, %v2550_v30  ;;  %v2675_v41 = vpop.f32.mrb[81].mxu0 }
 0x35b   :  { %v2721_v4 = vadd.f32 %v2675_v41, %v2552_v32  ;;  %v2677_v42 = vpop.f32.mrb[82].mxu0 }
 0x35c   :  { %v2678_v43 = vpop.f32.mrb[83].mxu0 }
 0x35d   :  { %v2714_v44 = vpop.f32.mrb[80].mxu1 }
 0x35e   :  { %v2722_v45 = vadd.f32 %v2714_v44, %v2591_v36  ;;  %v5033_v46 = vpop.f32.mrb[81].mxu1 }
 0x35f   :  { %v2717_v47 = vpop.f32.mrb[82].mxu1 }
 0x360   :  { %v5034_v48 = vpop.f32.mrb[83].mxu1 }
 0x361   :  { %v2800_v49 = vpop.f32.mrb[84].mxu0 }
 0x362   :  { %v2847_v50 = vadd.f32 %v2800_v49, %v2720_v40  ;;  %v2802_v52 = vpop.f32.mrb[85].mxu0 }
 0x363   :  { %v2848_v53 = vadd.f32 %v2802_v52, %v2721_v4  ;;  %v2804_v54 = vpop.f32.mrb[86].mxu0  ;;  %v3469_v52 = vld [vmem:[%s6069_s5] sm:$0x7] }
 0x364   :  { %v2805_v55 = vpop.f32.mrb[87].mxu0 }
 0x365   :  { %v2841_v56 = vpop.f32.mrb[84].mxu1  ;;  %v3461_v55 = vpop.permute.xlu0 %3460 }
 0x366   :  { %v2849_v57 = vadd.f32 %v2841_v56, %v2722_v45  ;;  %v5039_v58 = vpop.f32.mrb[85].mxu1 }
 0x367   :  { %v2844_v59 = vpop.f32.mrb[86].mxu1 }
 0x368   :  { %v5040_v61 = vpop.f32.mrb[87].mxu1  ;;  %v3474_v59 = vrot.slane %v3469_v52, %v5449_v20 }
 0x369   :  { %v2915_v62 = vpop.f32.mrb[88].mxu0 }
 0x36a   :  { %v2962_v63 = vadd.f32 %v2915_v62, %v2847_v50  ;;  %v2917_v0 = vpop.f32.mrb[89].mxu0 }
 0x36b   :  { %v2963_v1 = vadd.f32 %v2917_v0, %v2848_v53  ;;  %v2919_v2 = vpop.f32.mrb[90].mxu0 }
 0x36c   :  { %v2920_v3 = vpop.f32.mrb[91].mxu0 }
 0x36d   :  { %v2956_v6 = vpop.f32.mrb[88].mxu1 }
 0x36e   :  { %v2964_v11 = vadd.f32 %v2956_v6, %v2849_v57  ;;  %v5045_v12 = vpop.f32.mrb[89].mxu1 }
 0x36f   :  { %v2959_v13 = vpop.f32.mrb[90].mxu1 }
 0x370   :  { %v5046_v15 = vpop.f32.mrb[91].mxu1 }
 0x371   :  { %v3038_v16 = vpop.f32.mrb[92].mxu0  ;;  %v3482_v15 = vrot.slane %v3469_v52, %v5452_v21 }
 0x372   :  { %v3085_v17 = vadd.f32 %v3038_v16, %v2962_v63  ;;  %v3040_v18 = vpop.f32.mrb[93].mxu0  ;;  %v3478_v63 = vrot.slane %v3469_v52, %v5458_v26 }
 0x373   :  { %v3086_v19 = vadd.f32 %v3040_v18, %v2963_v1  ;;  %v3042_v22 = vpop.f32.mrb[94].mxu0 }
 0x374   :  { %v3043_v23 = vpop.f32.mrb[95].mxu0 }
 0x375   :  { %v3079_v24 = vpop.f32.mrb[92].mxu1 }
 0x376   :  { %v3087_v25 = vadd.f32 %v3079_v24, %v2964_v11  ;;  %v5051_v27 = vpop.f32.mrb[93].mxu1 }
 0x377   :  { %v3082_v28 = vpop.f32.mrb[94].mxu1 }
 0x378   :  { %v5052_v29 = vpop.f32.mrb[95].mxu1 }
 0x379   :  { %v3161_v30 = vpop.f32.mrb[96].mxu0 }
 0x37a   :  { %v3208_v31 = vadd.f32 %v3161_v30, %v3085_v17  ;;  %v3163_v32 = vpop.f32.mrb[97].mxu0 }
 0x37b   :  { %v3209_v33 = vadd.f32 %v3163_v32, %v3086_v19  ;;  %v3165_v34 = vpop.f32.mrb[98].mxu0 }
 0x37c   :  { %v3166_v35 = vpop.f32.mrb[99].mxu0 }
 0x37d   :  { %v3202_v36 = vpop.f32.mrb[96].mxu1 }
 0x37e   :  { %v3210_v37 = vadd.f32 %v3202_v36, %v3087_v25  ;;  %v5057_v38 = vpop.f32.mrb[97].mxu1 }
 0x37f   :  { %v3205_v60 = vpop.f32.mrb[98].mxu1 }
 0x380   :  { %v5058_v39 = vpop.f32.mrb[99].mxu1 }
 0x381   :  { %v3284_v40 = vpop.f32.mrb[100].mxu0 }
 0x382   :  { %v3331_v41 = vadd.f32 %v3284_v40, %v3208_v31  ;;  %v3286_v4 = vpop.f32.mrb[101].mxu0 }
 0x383   :  { %v3332_v42 = vadd.f32 %v3286_v4, %v3209_v33  ;;  %v3288_v43 = vpop.f32.mrb[102].mxu0 }
 0x384   :  { %v3289_v44 = vpop.f32.mrb[103].mxu0 }
 0x385   :  { %v3325_v45 = vpop.f32.mrb[100].mxu1 }
 0x386   :  { %v3333_v46 = vadd.f32 %v3325_v45, %v3210_v37  ;;  %v5063_v47 = vpop.f32.mrb[101].mxu1 }
 0x387   :  { %v3328_v48 = vpop.f32.mrb[102].mxu1 }
 0x388   :  { %v5064_v49 = vpop.f32.mrb[103].mxu1 }
 0x389   :  { %v3407_v50 = vpop.f32.mrb[104].mxu0 }
 0x38a   :  { %v3454_v53 = vadd.f32 %v3407_v50, %v3331_v41  ;;  %v3409_v54 = vpop.f32.mrb[105].mxu0 }
 0x38b   :  { %v3455_v56 = vadd.f32 %v3409_v54, %v3332_v42  ;;  %v3411_v57 = vpop.f32.mrb[106].mxu0  ;;  %v4606_v54 = vld [vmem:[%s6068_s4] sm:$0xf] }
 0x38c   :  { %v3463_v58 = vadd.f32 %v3461_v55, %v3454_v53  ;;  %v3412_v61 = vpop.f32.mrb[107].mxu0  ;;  %v2299_v53 = vld [vmem:[%s6068_s4] sm:$0xf] }
 0x38d   :  { %v3464_v62 = vadd.f32 %v3461_v55, %v3455_v56  ;;  %v3448_v0 = vpop.f32.mrb[104].mxu1 }
 0x38e   :  { %v3466_v1 = vmax.f32 %v3463_v58, 0.0  ;;  %v3456_v2 = vadd.f32 %v3448_v0, %v3333_v46  ;;  %v5069_v3 = vpop.f32.mrb[105].mxu1  ;;  %v4800_v0 = vld [vmem:[%s6067_s3 + $0x2] sm:$0x3] }
 0x38f   :  { %v3467_v6 = vmax.f32 %v3464_v62, 0.0  ;;  %v3451_v11 = vpop.f32.mrb[106].mxu1 }
 0x390   :  { %v3486_v12 = vmul.f32 %v3474_v59, %v3466_v1  ;;  %v3465_v13 = vadd.f32 %v3461_v55, %v3456_v2  ;;  %v5070_v16 = vpop.f32.mrb[107].mxu1 }
 0x391   :  { %v3487_v17 = vmul.f32 %v3478_v63, %v3467_v6 }
 0x392   :  { %v3468_v18 = vmax.f32 %v3465_v13, 0.0 }
 0x393   :  { %v4799_v19 = vpack.c.bf16 %v3487_v17, %v3486_v12  ;;  %v3514_v17 = vld [vmem:[%s6067_s3] sm:$0x3] }
 0x394   :  { %v3488_v22 = vmul.f32 %v3482_v15, %v3468_v18 }
 0x395   :  { %v3502_v24 = vrot.slane %v4799_v19, %v5246_v8 }
 0x396   :  { %v3491_v23 = vpack.c.bf16 %v3488_v22, %v3488_v22 }
 0x398   :  { %v3509_v25 = vrot.slane %v3491_v23, %v5246_v8 }
 0x39a   :  { %v3510_v27 = vcombine.low %v3502_v24, %v3509_v25 }
 0x39c   :  { %3512 = vst.msk [vmem:[#allocation2 + $0x2] sm:$0x3f] %vm5466_vm15, %v3510_v27 }
 0x3a3   :  { %v3513_v28 = vld [vmem:[#allocation2] sm:$0xff] }
 0x3a4   :  { %v3524_v29 = vrot.slane %v3513_v28, %v5246_v8  ;;  %v3517_v30 = vcombine.high %v3513_v28, %v3513_v28  ;;  %v4111_v34 = vld [vmem:[#allocation2 + $0x2] sm:$0x3f] }
 0x3a5   :  { %v4121_v35 = vrot.slane %v4111_v34, %v5246_v8  ;;  %v4114_v36 = vcombine.high %v4111_v34, %v4111_v34  ;;  %v4234_v37 = vld [vmem:[#allocation2 + $0x2] sm:$0x3f] }
 0x3a6   :  { %3534 = vrot.lane.b32.xlu1 %v3524_v29, %s5193_s23  ;;  %v3532_v31 = vcombine.high %v3524_v29, %v3524_v29  ;;  %v3531_v32 = vrot.slane %v3517_v30, %v5246_v8  ;;  %v4244_v39 = vrot.slane %v4234_v37, %v5246_v8  ;;  %v4237_v40 = vcombine.high %v4234_v37, %v4234_v37  ;;  %v4357_v41 = vld [vmem:[#allocation2 + $0x2] sm:$0x3f] }
 0x3a7   :  { %v4129_v38 = vcombine.high %v4121_v35, %v4121_v35  ;;  %v4128_v60 = vrot.slane %v4114_v36, %v5246_v8  ;;  %v4367_v43 = vrot.slane %v4357_v41, %v5246_v8  ;;  %v4360_v44 = vcombine.high %v4357_v41, %v4357_v41  ;;  %v4480_v45 = vld [vmem:[#allocation2 + $0x2] sm:$0x3f] }
 0x3a8   :  { %3536 = vrot.lane.b32.xlu0 %v3532_v31, %s5193_s23  ;;  %v3533_v33 = vcombine.high %v3531_v32, %v3531_v32  ;;  %v4252_v4 = vcombine.high %v4244_v39, %v4244_v39  ;;  %v4251_v42 = vrot.slane %v4237_v40, %v5246_v8  ;;  %v4490_v48 = vrot.slane %v4480_v45, %v5246_v8  ;;  %v4807_v30 = vld [vmem:[%s6067_s3 + $0x4] sm:$0x3] }
 0x3a9   :  { %v4375_v46 = vcombine.high %v4367_v43, %v4367_v43  ;;  %v4374_v47 = vrot.slane %v4360_v44, %v5246_v8  ;;  %v4483_v49 = vcombine.high %v4480_v45, %v4480_v45 }
 0x3aa   :  { %3538 = vrot.lane.b32.xlu1 %v3531_v32, %s5193_s23  ;;  %v4498_v50 = vcombine.high %v4490_v48, %v4490_v48 }
 0x3ab   :  { %v4497_v52 = vrot.slane %v4483_v49, %v5246_v8 }
 0x3ac   :  { %3540 = vrot.lane.b32.xlu0 %v3533_v33, %s5193_s23 }
 0x3ae   :  { %3638 = vrot.lane.b32.xlu1 %v3524_v29, %s5194_s24 }
 0x3b0   :  { %3640 = vrot.lane.b32.xlu0 %v3532_v31, %s5194_s24 }
 0x3b2   :  { %3642 = vrot.lane.b32.xlu1 %v3531_v32, %s5194_s24 }
 0x3b4   :  { %3644 = vrot.lane.b32.xlu0 %v3533_v33, %s5194_s24 }
 0x3b6   :  { %3762 = vrot.lane.b32.xlu1 %v3524_v29, %s5195_s25 }
 0x3b8   :  { %3764 = vrot.lane.b32.xlu0 %v3532_v31, %s5195_s25 }
 0x3ba   :  { %3766 = vrot.lane.b32.xlu1 %v3531_v32, %s5195_s25 }
 0x3bc   :  { %3768 = vrot.lane.b32.xlu0 %v3533_v33, %s5195_s25 }
 0x3be   :  { %3889 = vrot.lane.b32.xlu1 %v3524_v29, %s5196_s28 }
 0x3c0   :  { %3891 = vrot.lane.b32.xlu0 %v3532_v31, %s5196_s28  ;;  %v3996_v31 = vld [vmem:[#allocation2 + $0x2] sm:$0x3f] }
 0x3c2   :  { %3893 = vrot.lane.b32.xlu1 %v3531_v32, %s5196_s28 }
 0x3c4   :  { %3895 = vrot.lane.b32.xlu0 %v3533_v33, %s5196_s28 }
 0x3c6   :  { %4130 = vrot.lane.b32.xlu1 %v4121_v35, %s5197_s7  ;;  %v4006_v35 = vrot.slane %v3996_v31, %v5246_v8 }
 0x3c8   :  { %4132 = vrot.lane.b32.xlu0 %v4129_v38, %s5197_s7  ;;  %v3999_v38 = vcombine.high %v3996_v31, %v3996_v31  ;;  %v4014_v41 = vcombine.high %v4006_v35, %v4006_v35  ;;  %v2317_v31 = vld [vmem:[%s6069_s5] sm:$0x7] }
 0x3ca   :  { %4134 = vrot.lane.b32.xlu1 %v4128_v60, %s5197_s7  ;;  %v4013_v45 = vrot.slane %v3999_v38, %v5246_v8  ;;  %v2330_v38 = vrot.slane %v2317_v31, %v5452_v21 }
 0x3cc   :  { %4253 = vrot.lane.b32.xlu0 %v4244_v39, %s5198_s10  ;;  %v4025_v49 = vsel %vm68_vm2, %v4013_v45, 0 }
 0x3ce   :  { %4255 = vrot.lane.b32.xlu1 %v4252_v4, %s5198_s10 }
 0x3d0   :  { %4257 = vrot.lane.b32.xlu0 %v4251_v42, %s5198_s10  ;;  %v4811_v42 = vld [vmem:[%s6067_s3 + $0x6] sm:$0x3] }
 0x3d2   :  { %4376 = vrot.lane.b32.xlu1 %v4367_v43, %s5199_s13 }
 0x3d4   :  { %4378 = vrot.lane.b32.xlu0 %v4375_v46, %s5199_s13 }
 0x3d6   :  { %4380 = vrot.lane.b32.xlu1 %v4374_v47, %s5199_s13  ;;  %v4019_v47 = vsel %vm68_vm2, %v4006_v35, 0  ;;  %v2322_v35 = vrot.slane %v2317_v31, %v5449_v20 }
 0x3d8   :  { %4499 = vrot.lane.b32.xlu0 %v4490_v48, %s5200_s14 }
 0x3da   :  { %4501 = vrot.lane.b32.xlu1 %v4498_v50, %s5200_s14 }
 0x3dc   :  { %4503 = vrot.lane.b32.xlu0 %v4497_v52, %s5200_s14 }
 0x3de   :  { %2302 = vperm.xlu1 %5141, %v2299_v53  }
 0x3e0   :  { %4609 = vperm.xlu0 %5140, %v4606_v54   ;;  %v4815_v54 = vld [vmem:[%s6067_s3 + $0x8] sm:$0x3] }
 0x418   :  { %v3535_v55 = vpop.permute.xlu1 %3534 }
 0x41a   :  { %v3537_v56 = vpop.permute.xlu0 %3536 }
 0x41b   :  { %v3542_v57 = vsel %vm60_vm1, %v3535_v55, %v3537_v56 }
 0x41c   :  { %v3539_v58 = vpop.permute.xlu1 %3538  ;;  %v3549_v61 = vsel %vm68_vm2, %v3542_v57, 0 }
 0x41d   :  { %v3543_v59 = vsel %vm60_vm1, %v3537_v56, %v3539_v58 }
 0x41e   :  { %4801 = vmatprep.subr.msk.bf16.mxu0 %vm68_vm2, %v3543_v59  ;;  %v3541_v62 = vpop.permute.xlu0 %3540 }
 0x41f   :  { %v3544_v63 = vsel %vm60_vm1, %v3539_v58, %v3541_v62  ;;  %3558 = vmatpush1.bf16.msra.mxu0 %v3549_v61 }
 0x420   :  { %v3555_v1 = vsel %vm68_vm2, %v3544_v63, 0  ;;  %v3639_v2 = vpop.permute.xlu1 %3638 }
 0x421   :  { %5072 = vmatpush3.bf16.msra.mxu1 %v3555_v1 }
 0x422   :  { %4802 = vmatmul.mubr.msk.bf16.vlgmr.msra.gmra.mrb[108].mxu0 %vm64_vm3, %v4800_v0  ;;  %v3641_v3 = vpop.permute.xlu0 %3640  ;;  %5077 = vmatprep.subr.bf16.mxu1 %v5190_v7 }
 0x423   :  { %v3646_v6 = vsel %vm167_vm4, %v3639_v2, %v3641_v3  ;;  %3693 = vmatprep.mubr.bf16.mxu0 %v5191_v9 }
 0x424   :  { %v3643_v11 = vpop.permute.xlu1 %3642  ;;  %5074 = vmatmul.mubr.msk.bf16.vlgmr.msra.gmra.mrb[108].mxu1 %vm64_vm3, %v4800_v0  ;;  %v3653_v13 = vsel %vm68_vm2, %v3646_v6, 0  ;;  %v4819_v0 = vld [vmem:[%s6067_s3 + $0xa] sm:$0x3] }
 0x425   :  { %v3647_v12 = vsel %vm167_vm4, %v3641_v3, %v3643_v11  ;;  %5079 = vmatprep.mubr.msk.bf16.mxu1 %vm5192_vm0, %v5190_v7 }
 0x426   :  { %4804 = vmatprep.subr.msk.bf16.mxu0 %vm68_vm2, %v3647_v12  ;;  %v3645_v15 = vpop.permute.xlu0 %3644 }
 0x427   :  { %v3648_v16 = vsel %vm167_vm4, %v3643_v11, %v3645_v15  ;;  %3662 = vmatpush1.bf16.msra.mxu0 %v3653_v13  ;;  %v4823_v13 = vld [vmem:[%s6067_s3 + $0xc] sm:$0x3] }
 0x428   :  { %v3659_v18 = vsel %vm68_vm2, %v3648_v16, 0  ;;  %v3763_v19 = vpop.permute.xlu1 %3762 }
 0x429   :  { %5078 = vmatpush3.bf16.msra.mxu1 %v3659_v18 }
 0x42a   :  { %4805 = vmatmul.mubr.msk.bf16.vlgmr.msra.gmra.mrb[112].mxu0 %vm64_vm3, %v3514_v17  ;;  %v3765_v22 = vpop.permute.xlu0 %3764  ;;  %5083 = vmatprep.subr.bf16.mxu1 %v5190_v7 }
 0x42b   :  { %v3770_v23 = vsel %vm293_vm5, %v3763_v19, %v3765_v22  ;;  %3817 = vmatprep.mubr.bf16.mxu0 %v5191_v9 }
 0x42c   :  { %v3767_v24 = vpop.permute.xlu1 %3766  ;;  %5080 = vmatmul.mubr.msk.bf16.vlgmr.msra.gmra.mrb[112].mxu1 %vm64_vm3, %v3514_v17  ;;  %v3777_v27 = vsel %vm68_vm2, %v3770_v23, 0 }
 0x42d   :  { %v3771_v25 = vsel %vm293_vm5, %v3765_v22, %v3767_v24  ;;  %5085 = vmatprep.mubr.msk.bf16.mxu1 %vm5192_vm0, %v5190_v7  ;;  %v2296_v22 = vld [vmem:[%s6064_s0 + $0x2] sm:$0x3f] }
 0x42e   :  { %4808 = vmatprep.subr.msk.bf16.mxu0 %vm68_vm2, %v3771_v25  ;;  %v3769_v28 = vpop.permute.xlu0 %3768  ;;  %v2297_v25 = vunpack.c.l.bf16 %v2296_v22 }
 0x42f   :  { %v3772_v29 = vsel %vm293_vm5, %v3767_v24, %v3769_v28  ;;  %3786 = vmatpush1.bf16.msra.mxu0 %v3777_v27  ;;  %v4827_v24 = vld [vmem:[%s6067_s3 + $0xe] sm:$0x3] }
 0x430   :  { %v3783_v32 = vsel %vm68_vm2, %v3772_v29, 0  ;;  %v3890_v33 = vpop.permute.xlu1 %3889  ;;  %v2298_v29 = vunpack.c.h.bf16 %v2296_v22 }
 0x431   :  { %5084 = vmatpush3.bf16.msra.mxu1 %v3783_v32 }
 0x432   :  { %4809 = vmatmul.mubr.msk.bf16.vlgmr.msra.gmra.mrb[116].mxu0 %vm64_vm3, %v4807_v30  ;;  %v3892_v34 = vpop.permute.xlu0 %3891  ;;  %5089 = vmatprep.subr.bf16.mxu1 %v5190_v7 }
 0x433   :  { %v3897_v36 = vsel %vm422_vm6, %v3890_v33, %v3892_v34  ;;  %3944 = vmatprep.mubr.bf16.mxu0 %v5191_v9 }
 0x434   :  { %v3894_v37 = vpop.permute.xlu1 %3893  ;;  %5086 = vmatmul.mubr.msk.bf16.vlgmr.msra.gmra.mrb[116].mxu1 %vm64_vm3, %v4807_v30  ;;  %v3904_v39 = vsel %vm68_vm2, %v3897_v36, 0  ;;  %v2309_v30 = vcombine.high %v2297_v25, %v2297_v25  ;;  %v2326_v36 = vrot.slane %v2317_v31, %v5458_v26 }
 0x435   :  { %v3898_v60 = vsel %vm422_vm6, %v3892_v34, %v3894_v37  ;;  %5091 = vmatprep.mubr.msk.bf16.mxu1 %vm5192_vm0, %v5190_v7 }
 0x436   :  { %4812 = vmatprep.subr.msk.bf16.mxu0 %vm68_vm2, %v3898_v60  ;;  %v3896_v40 = vpop.permute.xlu0 %3895 }
 0x437   :  { %v3899_v4 = vsel %vm422_vm6, %v3894_v37, %v3896_v40  ;;  %3913 = vmatpush1.bf16.msra.mxu0 %v3904_v39  ;;  %v4831_v37 = vld [vmem:[%s6067_s3 + $0x10] sm:$0x3] }
 0x438   :  { %v3910_v43 = vsel %vm68_vm2, %v3899_v4, 0  ;;  %v4131_v44 = vpop.permute.xlu1 %4130  ;;  %4816 = vmatprep.subr.msk.bf16.mxu0 %vm68_vm2, %v4014_v41 }
 0x439   :  { %5090 = vmatpush3.bf16.msra.mxu1 %v3910_v43 }
 0x43a   :  { %4813 = vmatmul.mubr.msk.bf16.vlgmr.msra.gmra.mrb[120].mxu0 %vm64_vm3, %v4811_v42  ;;  %v4133_v46 = vpop.permute.xlu0 %4132  ;;  %5095 = vmatprep.subr.bf16.mxu1 %v5190_v7 }
 0x43b   :  { %4028 = vmatpush1.bf16.msra.mxu0 %v4019_v47  ;;  %4059 = vmatprep.mubr.bf16.mxu0 %v5191_v9  ;;  %v4136_v53 = vsel %vm664_vm7, %v4131_v44, %v4133_v46 }
 0x43c   :  { %v4135_v48 = vpop.permute.xlu1 %4134  ;;  %5092 = vmatmul.mubr.msk.bf16.vlgmr.msra.gmra.mrb[120].mxu1 %vm64_vm3, %v4811_v42  ;;  %v4142_v56 = vsel %vm68_vm2, %v4136_v53, 0 }
 0x43d   :  { %v4137_v50 = vsel %vm664_vm7, %v4133_v46, %v4135_v48  ;;  %5096 = vmatpush3.bf16.msra.mxu1 %v4025_v49  ;;  %5097 = vmatprep.mubr.msk.bf16.mxu1 %vm5192_vm0, %v5190_v7  ;;  %v4148_v59 = vsel %vm68_vm2, %v4135_v48, 0 }
 0x43e   :  { %4820 = vmatprep.subr.msk.bf16.mxu0 %vm68_vm2, %v4137_v50  ;;  %v4254_v52 = vpop.permute.xlu0 %4253  ;;  %5101 = vmatprep.subr.bf16.mxu1 %v5190_v7 }
 0x440   :  { %v4256_v55 = vpop.permute.xlu1 %4255 }
 0x441   :  { %v4259_v63 = vsel %vm789_vm8, %v4254_v52, %v4256_v55 }
 0x442   :  { %4817 = vmatmul.mubr.msk.bf16.vlgmr.msra.gmra.mrb[124].mxu0 %vm64_vm3, %v4815_v54  ;;  %v4258_v57 = vpop.permute.xlu0 %4257  ;;  %v4265_v3 = vsel %vm68_vm2, %v4259_v63, 0 }
 0x443   :  { %4151 = vmatpush1.bf16.msra.mxu0 %v4142_v56  ;;  %v4260_v58 = vsel %vm789_vm8, %v4256_v55, %v4258_v57  ;;  %4182 = vmatprep.mubr.bf16.mxu0 %v5191_v9  ;;  %v4271_v11 = vsel %vm68_vm2, %v4258_v57, 0 }
 0x444   :  { %v4377_v61 = vpop.permute.xlu1 %4376  ;;  %5098 = vmatmul.mubr.msk.bf16.vlgmr.msra.gmra.mrb[124].mxu1 %vm64_vm3, %v4815_v54  ;;  %4824 = vmatprep.subr.msk.bf16.mxu0 %vm68_vm2, %v4260_v58 }
 0x445   :  { %5102 = vmatpush3.bf16.msra.mxu1 %v4148_v59  ;;  %5103 = vmatprep.mubr.msk.bf16.mxu1 %vm5192_vm0, %v5190_v7 }
 0x446   :  { %v4379_v62 = vpop.permute.xlu0 %4378  ;;  %5107 = vmatprep.subr.bf16.mxu1 %v5190_v7 }
 0x447   :  { %v4382_v12 = vsel %vm914_vm9, %v4377_v61, %v4379_v62 }
 0x448   :  { %v4381_v1 = vpop.permute.xlu1 %4380  ;;  %v4388_v16 = vsel %vm68_vm2, %v4382_v12, 0 }
 0x449   :  { %v4383_v2 = vsel %vm914_vm9, %v4379_v62, %v4381_v1  ;;  %v4394_v19 = vsel %vm68_vm2, %v4381_v1, 0 }
 0x44a   :  { %4821 = vmatmul.mubr.msk.bf16.vlgmr.msra.gmra.mrb[128].mxu0 %vm64_vm3, %v4819_v0  ;;  %v4500_v6 = vpop.permute.xlu0 %4499 }
 0x44b   :  { %4274 = vmatpush1.bf16.msra.mxu0 %v4265_v3  ;;  %4305 = vmatprep.mubr.bf16.mxu0 %v5191_v9 }
 0x44c   :  { %4828 = vmatprep.subr.msk.bf16.mxu0 %vm68_vm2, %v4383_v2  ;;  %5104 = vmatmul.mubr.msk.bf16.vlgmr.msra.gmra.mrb[128].mxu1 %vm64_vm3, %v4819_v0  ;;  %v4502_v17 = vpop.permute.xlu1 %4501 }
 0x44d   :  { %5108 = vmatpush3.bf16.msra.mxu1 %v4271_v11  ;;  %5109 = vmatprep.mubr.msk.bf16.mxu1 %vm5192_vm0, %v5190_v7  ;;  %v4505_v23 = vsel %vm1039_vm10, %v4500_v6, %v4502_v17 }
 0x44e   :  { %5113 = vmatprep.subr.bf16.mxu1 %v5190_v7  ;;  %v4504_v15 = vpop.permute.xlu0 %4503  ;;  %v4511_v27 = vsel %vm68_vm2, %v4505_v23, 0 }
 0x44f   :  { %v4506_v18 = vsel %vm1039_vm10, %v4502_v17, %v4504_v15  ;;  %v4517_v28 = vsel %vm68_vm2, %v4504_v15, 0 }
 0x452   :  { %4825 = vmatmul.mubr.msk.bf16.vlgmr.msra.gmra.mrb[132].mxu0 %vm64_vm3, %v4823_v13 }
 0x453   :  { %4397 = vmatpush1.bf16.msra.mxu0 %v4388_v16  ;;  %4428 = vmatprep.mubr.bf16.mxu0 %v5191_v9 }
 0x454   :  { %4832 = vmatprep.subr.msk.bf16.mxu0 %vm68_vm2, %v4506_v18  ;;  %5110 = vmatmul.mubr.msk.bf16.vlgmr.msra.gmra.mrb[132].mxu1 %vm64_vm3, %v4823_v13 }
 0x455   :  { %5114 = vmatpush3.bf16.msra.mxu1 %v4394_v19  ;;  %5115 = vmatprep.mubr.msk.bf16.mxu1 %vm5192_vm0, %v5190_v7 }
 0x456   :  { %5119 = vmatprep.subr.bf16.mxu1 %v5190_v7 }
 0x45a   :  { %4829 = vmatmul.mubr.msk.bf16.vlgmr.msra.gmra.mrb[136].mxu0 %vm64_vm3, %v4827_v24 }
 0x45b   :  { %4520 = vmatpush1.bf16.msra.mxu0 %v4511_v27  ;;  %4551 = vmatprep.mubr.bf16.mxu0 %v5191_v9 }
 0x45c   :  { %5116 = vmatmul.mubr.msk.bf16.vlgmr.msra.gmra.mrb[136].mxu1 %vm64_vm3, %v4827_v24 }
 0x45d   :  { %5120 = vmatpush3.bf16.msra.mxu1 %v4517_v28  ;;  %v2303_v32 = vpop.permute.xlu1 %2302  ;;  %5121 = vmatprep.mubr.msk.bf16.mxu1 %vm5192_vm0, %v5190_v7 }
 0x45e   :  { %v2305_v33 = vadd.f32 %v2303_v32, %v5837_v5  ;;  %v2306_v34 = vadd.f32 %v2303_v32, %v5839_v10  ;;  %v2307_v9 = vadd.f32 %v2303_v32, %v5841_v14 }
 0x460   :  { %v2311_v60 = vadd.f32 %v2305_v33, %v2297_v25  ;;  %v2312_v39 = vadd.f32 %v2309_v30, %v2306_v34  ;;  %v2313_v40 = vadd.f32 %v2307_v9, %v2298_v29 }
 0x462   :  { %v2314_v7 = vmax.f32 %v2311_v60, 0.0  ;;  %v2315_v41 = vmax.f32 %v2312_v39, 0.0  ;;  %v2316_v5 = vmax.f32 %v2313_v40, 0.0  ;;  %4833 = vmatmul.mubr.msk.bf16.vlgmr.msra.gmra.mrb[140].mxu0 %vm64_vm3, %v4831_v37 }
 0x464   :  { %v2334_v10 = vmul.f32 %v2322_v35, %v2314_v7  ;;  %v2335_v14 = vmul.f32 %v2326_v36, %v2315_v41  ;;  %v2336_v4 = vmul.f32 %v2330_v38, %v2316_v5  ;;  %5122 = vmatmul.mubr.msk.bf16.vlgmr.msra.gmra.mrb[140].mxu1 %vm64_vm3, %v4831_v37 }
 0x466   :  { %v2339_v42 = vpack.c.bf16 %v2336_v4, %v2336_v4  ;;  %v4755_v43 = vpack.c.bf16 %v2335_v14, %v2334_v10 }
 0x468   :  { %v2350_v44 = vrot.slane %v4755_v43, %v5246_v8  ;;  %v2357_v45 = vrot.slane %v2339_v42, %v5246_v8 }
 0x46a   :  { %v2358_v46 = vcombine.low %v2350_v44, %v2357_v45 }
 0x46c   :  { %2360 = vst.msk [vmem:[#allocation3 + $0x2] sm:$0x3f] %vm5466_vm15, %v2358_v46 }
 0x4f5   :  { %v3591_v47 = vpop.f32.mrb[108].mxu0 }
 0x4f6   :  { %v3593_v48 = vpop.f32.mrb[109].mxu0 }
 0x4f7   :  { %v3632_v49 = vpop.f32.mrb[108].mxu1  ;;  %v3595_v50 = vpop.f32.mrb[110].mxu0 }
 0x4f8   :  { %v5075_v52 = vpop.f32.mrb[109].mxu1  ;;  %v3596_v53 = vpop.f32.mrb[111].mxu0 }
 0x4f9   :  { %v3635_v54 = vpop.f32.mrb[110].mxu1 }
 0x4fa   :  { %v5076_v55 = vpop.f32.mrb[111].mxu1 }
 0x4fd   :  { %v3695_v56 = vpop.f32.mrb[112].mxu0 }
 0x4fe   :  { %v3696_v57 = vadd.f32 %v3695_v56, %v3591_v47  ;;  %v3697_v58 = vpop.f32.mrb[113].mxu0 }
 0x4ff   :  { %v3698_v59 = vadd.f32 %v3697_v58, %v3593_v48  ;;  %v3736_v61 = vpop.f32.mrb[112].mxu1  ;;  %v3699_v62 = vpop.f32.mrb[114].mxu0 }
 0x500   :  { %v3737_v63 = vadd.f32 %v3736_v61, %v3632_v49  ;;  %v5081_v0 = vpop.f32.mrb[113].mxu1  ;;  %v3700_v1 = vpop.f32.mrb[115].mxu0 }
 0x501   :  { %v3739_v2 = vpop.f32.mrb[114].mxu1 }
 0x502   :  { %v5082_v3 = vpop.f32.mrb[115].mxu1 }
 0x505   :  { %v3819_v6 = vpop.f32.mrb[116].mxu0 }
 0x506   :  { %v3866_v11 = vadd.f32 %v3819_v6, %v3696_v57  ;;  %v3821_v12 = vpop.f32.mrb[117].mxu0 }
 0x507   :  { %v3867_v13 = vadd.f32 %v3821_v12, %v3698_v59  ;;  %v3860_v15 = vpop.f32.mrb[116].mxu1  ;;  %v3823_v16 = vpop.f32.mrb[118].mxu0 }
 0x508   :  { %v3868_v17 = vadd.f32 %v3860_v15, %v3737_v63  ;;  %v5087_v18 = vpop.f32.mrb[117].mxu1  ;;  %v3824_v19 = vpop.f32.mrb[119].mxu0  ;;  %v4835_v16 = vld [vmem:[%s6064_s0 + $0xa] sm:$0x3f]  ;;  %s5201_s0 = smov [#allocation3]  }
 0x509   :  { %v3863_v22 = vpop.f32.mrb[118].mxu1  ;;  %v4604_v19 = vunpack.c.l.bf16 %v4835_v16 }
 0x50a   :  { %v5088_v23 = vpop.f32.mrb[119].mxu1 }
 0x50b   :  { %v4610_v23 = vpop.permute.xlu0 %4609 }
 0x50d   :  { %v3946_v24 = vpop.f32.mrb[120].mxu0 }
 0x50e   :  { %v3993_v25 = vadd.f32 %v3946_v24, %v3866_v11  ;;  %v3948_v27 = vpop.f32.mrb[121].mxu0 }
 0x50f   :  { %v3994_v28 = vadd.f32 %v3948_v27, %v3867_v13  ;;  %v3987_v29 = vpop.f32.mrb[120].mxu1  ;;  %v3950_v30 = vpop.f32.mrb[122].mxu0  ;;  %v4624_v27 = vld [vmem:[%s6069_s5] sm:$0x7]  ;;  %s4673_s5 = sshll.u32 %s5201_s0, 4  ;;  %s4674_s5 = int_to_ptr.vmem [resolvable:$true] %s4673_s5 }
 0x510   :  { %v3995_v31 = vadd.f32 %v3987_v29, %v3868_v17  ;;  %v5093_v32 = vpop.f32.mrb[121].mxu1  ;;  %v3951_v33 = vpop.f32.mrb[123].mxu0  ;;  %v4616_v29 = vcombine.high %v4604_v19, %v4604_v19  ;;  %s5165_s25 = scalar_lea.vmem %s4674_s5, 256  ;;  %p5170_p1 = scmp.lt.s32.totalorder %s4674_s5, %s4674_s5 }
 0x511   :  { %v3990_v34 = vpop.f32.mrb[122].mxu1  ;;  %p5166_p0 = scmp.ne.s32.totalorder %s4674_s5, %s5165_s25  ;;  %p5171_p2 = scmp.lt.s32.totalorder %s5165_s25, %s5165_s25 }
 0x512   :  { %v5094_v9 = vpop.f32.mrb[123].mxu1  ;;  %v4605_v34 = vunpack.c.h.bf16 %v4835_v16 }
 0x513   :  { %p5172_p3 = por %p5171_p2, %p5170_p1 }
 0x515   :  { %v4061_v35 = vpop.f32.mrb[124].mxu0  ;;  %p5173_p4 = pnand %p5172_p3, %p5166_p0 }
 0x516   :  { %v4108_v36 = vadd.f32 %v4061_v35, %v3993_v25  ;;  %v4063_v37 = vpop.f32.mrb[125].mxu0 }
 0x517   :  { %v4109_v38 = vadd.f32 %v4063_v37, %v3994_v28  ;;  %v4102_v60 = vpop.f32.mrb[124].mxu1  ;;  %v4065_v39 = vpop.f32.mrb[126].mxu0 }
 0x518   :  { %v4110_v40 = vadd.f32 %v4102_v60, %v3995_v31  ;;  %v5099_v7 = vpop.f32.mrb[125].mxu1  ;;  %v4066_v41 = vpop.f32.mrb[127].mxu0  ;;  %v4629_v60 = vrot.slane %v4624_v27, %v5449_v20 }
 0x519   :  { %v4105_v5 = vpop.f32.mrb[126].mxu1  ;;  %v4633_v41 = vrot.slane %v4624_v27, %v5458_v26 }
 0x51a   :  { %v5100_v10 = vpop.f32.mrb[127].mxu1 }
 0x51d   :  { %v4184_v14 = vpop.f32.mrb[128].mxu0 }
 0x51e   :  { %v4231_v4 = vadd.f32 %v4184_v14, %v4108_v36  ;;  %v4186_v42 = vpop.f32.mrb[129].mxu0  ;;  %v4637_v14 = vrot.slane %v4624_v27, %v5452_v21 }
 0x51f   :  { %v4232_v43 = vadd.f32 %v4186_v42, %v4109_v38  ;;  %v4225_v44 = vpop.f32.mrb[128].mxu1  ;;  %v4188_v45 = vpop.f32.mrb[130].mxu0 }
 0x520   :  { %v4233_v46 = vadd.f32 %v4225_v44, %v4110_v40  ;;  %v5105_v47 = vpop.f32.mrb[129].mxu1  ;;  %v4189_v48 = vpop.f32.mrb[131].mxu0 }
 0x521   :  { %v4228_v49 = vpop.f32.mrb[130].mxu1 }
 0x522   :  { %v5106_v50 = vpop.f32.mrb[131].mxu1 }
 0x525   :  { %v4307_v52 = vpop.f32.mrb[132].mxu0 }
 0x526   :  { %v4354_v53 = vadd.f32 %v4307_v52, %v4231_v4  ;;  %v4309_v54 = vpop.f32.mrb[133].mxu0 }
 0x527   :  { %v4355_v55 = vadd.f32 %v4309_v54, %v4232_v43  ;;  %v4348_v56 = vpop.f32.mrb[132].mxu1  ;;  %v4311_v57 = vpop.f32.mrb[134].mxu0 }
 0x528   :  { %v4356_v58 = vadd.f32 %v4348_v56, %v4233_v46  ;;  %v5111_v59 = vpop.f32.mrb[133].mxu1  ;;  %v4312_v61 = vpop.f32.mrb[135].mxu0 }
 0x529   :  { %v4351_v62 = vpop.f32.mrb[134].mxu1 }
 0x52a   :  { %v5112_v63 = vpop.f32.mrb[135].mxu1 }
 0x52d   :  { %v4430_v0 = vpop.f32.mrb[136].mxu0 }
 0x52e   :  { %v4477_v1 = vadd.f32 %v4430_v0, %v4354_v53  ;;  %v4432_v2 = vpop.f32.mrb[137].mxu0 }
 0x52f   :  { %v4478_v3 = vadd.f32 %v4432_v2, %v4355_v55  ;;  %v4471_v6 = vpop.f32.mrb[136].mxu1  ;;  %v4434_v11 = vpop.f32.mrb[138].mxu0 }
 0x530   :  { %v4479_v12 = vadd.f32 %v4471_v6, %v4356_v58  ;;  %v5117_v13 = vpop.f32.mrb[137].mxu1  ;;  %v4435_v15 = vpop.f32.mrb[139].mxu0 }
 0x531   :  { %v4474_v17 = vpop.f32.mrb[138].mxu1 }
 0x532   :  { %v5118_v18 = vpop.f32.mrb[139].mxu1 }
 0x535   :  { %v4553_v22 = vpop.f32.mrb[140].mxu0 }
 0x536   :  { %v4600_v24 = vadd.f32 %v4553_v22, %v4477_v1  ;;  %v4555_v25 = vpop.f32.mrb[141].mxu0 }
 0x537   :  { %v4601_v28 = vadd.f32 %v4555_v25, %v4478_v3  ;;  %v4594_v30 = vpop.f32.mrb[140].mxu1  ;;  %v4557_v31 = vpop.f32.mrb[142].mxu0 }
 0x538   :  { %v4612_v32 = vadd.f32 %v4610_v23, %v4600_v24  ;;  %v4602_v33 = vadd.f32 %v4594_v30, %v4479_v12  ;;  %v5123_v9 = vpop.f32.mrb[141].mxu1  ;;  %v4558_v35 = vpop.f32.mrb[143].mxu0 }
 0x539   :  { %v4613_v36 = vadd.f32 %v4610_v23, %v4601_v28  ;;  %v4597_v37 = vpop.f32.mrb[142].mxu1 }
 0x53a   :  { %v4618_v38 = vadd.f32 %v4612_v32, %v4604_v19  ;;  %v4614_v39 = vadd.f32 %v4610_v23, %v4602_v33  ;;  %v5124_v40 = vpop.f32.mrb[143].mxu1 }
 0x53b   :  { %v4619_v7 = vadd.f32 %v4616_v29, %v4613_v36 }
 0x53c   :  { %v4621_v5 = vmax.f32 %v4618_v38, 0.0  ;;  %v4620_v10 = vadd.f32 %v4614_v39, %v4605_v34 }
 0x53d   :  { %v4622_v4 = vmax.f32 %v4619_v7, 0.0 }
 0x53e   :  { %v4641_v42 = vmul.f32 %v4629_v60, %v4621_v5  ;;  %v4623_v43 = vmax.f32 %v4620_v10, 0.0 }
 0x53f   :  { %v4642_v44 = vmul.f32 %v4633_v41, %v4622_v4 }
 0x540   :  { %v4643_v45 = vmul.f32 %v4637_v14, %v4623_v43 }
 0x541   :  { %v4836_v46 = vpack.c.bf16 %v4642_v44, %v4641_v42 }
 0x542   :  { %v4646_v47 = vpack.c.bf16 %v4643_v45, %v4643_v45 }
 0x543   :  { %v4657_v48 = vrot.slane %v4836_v46, %v5246_v8 }
 0x544   :  { %v4664_v20 = vrot.slane %v4646_v47, %v5246_v8 }
 0x546   :  { %v4665_v49 = vcombine.low %v4657_v48, %v4664_v20 }
 0x548   :  { %4667 = vst.msk [vmem:[#allocation3 + $0xa] sm:$0x3f] %vm5466_vm15, %v4665_v49 }
 0x549   :  { %5176 = shalt.err (!%p5173_p4)
}
 0x54a   :  { %s5177_s10 = scalar_lea.hbm %s6070_s6, 256 }
 0x54b   :  { %p5178_p5 = scmp.ne.s32.totalorder %s6070_s6, %s5177_s10  ;;  %p5181_p6 = scmp.lt.u32.totalorder %s5177_s10, %s6070_s6 }
 0x54d   :  { %p5183_p7 = pnand %p5181_p6, %p5178_p5 }
 0x54f   :  { %5186 = shalt.err (!%p5183_p7)
}
 0x550   :  { %s5202_s27 = smov 128   ;;  %s5203_s29 = smov 8  }
 0x551   :  { %4679 = dma.vmem_to_hbm [thread:$0]  %s4674_s5, 256, %s6070_s6, [#allocation4], %s5202_s27, %s5202_s27, %s5203_s29  }
 0x552   :  { %5187 = dma.done.wait [#allocation4], 256  }
 0x553   :  { %5188 = vsyncadd [#allocation4], 4294967040 }
 0x554   :  { %4683 = vsyncpa [#allocation4], 1 }

</bundles_post_ra>
